<compile_context>
chip_gen: v7x
topology: tpu7x:2x2x1
jax: 0.10.0
libtpu: 0.0.40
codegen_flags: <defaults>
</compile_context>

<pallas_src>
import jax
import jax.numpy as jnp
from jax.experimental import pallas as pl
from jax.experimental.pallas import tpu as pltpu

# ---------------------------------------------------------------------------
# Model dimensions (small-scale but consistent with the module's contract)
# ---------------------------------------------------------------------------
VOCAB = 32000          # fixed by the module: MLM_RoBERTa(vocab_size=32000)
HIDDEN = 128           # scaled down from ff_dim=768 for a small test
NUM_POS_TAG = 16       # module default
SEQ = 8                # small sequence length
TV = 16000             # vocab tile (32000 / 16000 = 2 grid steps; 16000 % 128 == 0)


# ---------------------------------------------------------------------------
# Pallas kernel: fused (hidden -> vocab -> num_pos_tag) projection
# ---------------------------------------------------------------------------
def _pos_head_kernel(h_ref, wv_ref, wct_ref, beff_ref, out_ref):
    """Grid axis 0 walks vocab tiles (reduction axis).

    per step k:
      masked_logits_chunk = H @ Wv[:, k*TV:(k+1)*TV]            (MXU, bf16->f32)
      out += masked_logits_chunk @ WcT[:, k*TV:(k+1)*TV]^T      (MXU, bf16->f32)
    init (k==0): out = b_eff   where b_eff = b_vocab @ Wc + b_cls (prefolded)
    """
    k = pl.program_id(0)

    @pl.when(k == 0)
    def _init():
        out_ref[...] = jnp.broadcast_to(beff_ref[...], out_ref.shape)

    # masked_logits chunk: [SEQ, TV], bf16 operands, f32 accumulation.
    logits_chunk = jnp.dot(
        h_ref[...], wv_ref[...], preferred_element_type=jnp.float32
    )
    # POS-head contribution: contract the TV axis against the transposed
    # classifier tile [NUM_POS_TAG, TV]  (A @ B^T on the MXU). Both operands
    # bf16, accumulation f32.
    out_ref[...] += jax.lax.dot_general(
        logits_chunk.astype(jnp.bfloat16),
        wct_ref[...],
        dimension_numbers=(((1,), (1,)), ((), ())),
        preferred_element_type=jnp.float32,
    )


@jax.jit
def pos_head_pallas(h_bf16, w_vocab_bf16, w_cls_t_bf16, b_eff_f32):
    """h_bf16: [SEQ, HIDDEN] -> pos_logits: [SEQ, NUM_POS_TAG] (f32)."""
    seq, hidden = h_bf16.shape
    vocab = w_vocab_bf16.shape[1]
    n_pos = w_cls_t_bf16.shape[0]
    assert vocab % TV == 0
    grid = (vocab // TV,)

    flops = 2 * seq * hidden * vocab + 2 * seq * vocab * n_pos
    bytes_accessed = (
        h_bf16.size * h_bf16.dtype.itemsize
        + w_vocab_bf16.size * w_vocab_bf16.dtype.itemsize
        + w_cls_t_bf16.size * w_cls_t_bf16.dtype.itemsize
        + b_eff_f32.size * b_eff_f32.dtype.itemsize
        + seq * n_pos * 4
    )

    return pl.pallas_call(
        _pos_head_kernel,
        out_shape=jax.ShapeDtypeStruct((seq, n_pos), jnp.float32),
        grid_spec=pltpu.PrefetchScalarGridSpec(
            num_scalar_prefetch=0,
            grid=grid,
            in_specs=[
                pl.BlockSpec((seq, hidden), lambda k: (0, 0)),   # H (resident)
                pl.BlockSpec((hidden, TV), lambda k: (0, k)),    # Wv tile (bf16)
                pl.BlockSpec((n_pos, TV), lambda k: (0, k)),     # Wc^T tile (bf16)
                pl.BlockSpec((1, n_pos), lambda k: (0, 0)),      # b_eff (resident)
            ],
            out_specs=pl.BlockSpec((seq, n_pos), lambda k: (0, 0)),
        ),
        compiler_params=pltpu.CompilerParams(
            dimension_semantics=("arbitrary",),
        ),
        cost_estimate=pl.CostEstimate(
            flops=flops, transcendentals=0, bytes_accessed=bytes_accessed
        ),
    )(h_bf16, w_vocab_bf16, w_cls_t_bf16, b_eff_f32)


# ---------------------------------------------------------------------------
# Module wrapper (glue in plain JAX)
# ---------------------------------------------------------------------------
class MLMRobertaPosTagPallas:
    """JAX/Pallas analogue of MLM_Roberta_POS_Tag.forward."""

    def __init__(self, key):
        k_emb, k_wv, k_bv, k_wc, k_bc = jax.random.split(key, 5)
        hi = jax.lax.Precision.HIGHEST

        # TODO(synk): the MLM_RoBERTa transformer encoder body is undefined in
        # the reference source; only its output interface (hidden states that
        # feed the 32000-way MLM vocab projection) is reproduced here via a
        # deterministic token embedding.
        self.embedding = (
            jax.random.normal(k_emb, (VOCAB, HIDDEN), jnp.float32) * 0.02
        )
        # MLM head: hidden -> vocab. Dominant weight stream kept in bf16.
        self.w_vocab = (
            jax.random.normal(k_wv, (HIDDEN, VOCAB), jnp.float32) * 0.02
        ).astype(jnp.bfloat16)
        self.b_vocab = jax.random.normal(k_bv, (1, VOCAB), jnp.float32) * 0.02
        # classification_head = nn.Linear(32000, num_pos_tag), stored
        # transposed [num_pos_tag, vocab] for lane-dense (16, TV) tiles, and
        # in bf16 to halve its HBM stream.
        self.w_cls_t = (
            jax.random.normal(k_wc, (NUM_POS_TAG, VOCAB), jnp.float32) * 0.02
        ).astype(jnp.bfloat16)
        self.b_cls = (
            jax.random.normal(k_bc, (1, NUM_POS_TAG), jnp.float32) * 0.02
        )
        # Fold the vocab bias through the classifier once (f32, full precision,
        # using the same bf16-rounded classifier weights the kernel streams):
        #   b_eff = b_vocab @ w_cls + b_cls
        self.b_eff = (
            jnp.matmul(
                self.b_vocab, self.w_cls_t.astype(jnp.float32).T, precision=hi
            )
            + self.b_cls
        )

    def forward(self, input_ids):
        # glue: embedding lookup (gather) stands in for the encoder output
        h = self.embedding[input_ids].astype(jnp.bfloat16)   # [SEQ, HIDDEN]
        # hot path: fused MLM-vocab projection + POS classification head
        return pos_head_pallas(
            h, self.w_vocab, self.w_cls_t, self.b_eff
        )                                                     # [SEQ, NUM_POS_TAG]

    # pure-JAX reference (unfolded form) for correctness checking
    def forward_ref(self, input_ids):
        hi = jax.lax.Precision.HIGHEST
        h = self.embedding[input_ids].astype(jnp.bfloat16).astype(jnp.float32)
        wv = self.w_vocab.astype(jnp.float32)
        wct = self.w_cls_t.astype(jnp.float32)
        masked_logits = jnp.matmul(h, wv, precision=hi) + self.b_vocab
        return jnp.matmul(masked_logits, wct.T, precision=hi) + self.b_cls


if __name__ == "__main__":
    key = jax.random.PRNGKey(0)
    k_params, k_ids = jax.random.split(key)

    model = MLMRobertaPosTagPallas(k_params)

    # deterministic "tokenized sentence" (stands in for sp.encode_as_ids)
    input_ids = jax.random.randint(k_ids, (SEQ,), 0, VOCAB, dtype=jnp.int32)

    pos_logits = jax.block_until_ready(model.forward(input_ids))

    ref = model.forward_ref(input_ids)
    assert pos_logits.shape == (SEQ, NUM_POS_TAG)
    max_err = jnp.max(jnp.abs(pos_logits - ref))
    assert jnp.allclose(pos_logits, ref, atol=1e-3, rtol=1e-3), (
        f"max abs err = {max_err}"
    )

    print("KERNEL_OK")
</pallas_src>

<mosaic_0001>
module attributes {stable_mosaic.version = 11 : i64} {
  func.func @_pos_head_kernel(%arg0: i32, %arg1: memref<8x128xbf16, #tpu.memory_space<vmem>>, %arg2: memref<128x16000xbf16, #tpu.memory_space<vmem>>, %arg3: memref<16x16000xbf16, #tpu.memory_space<vmem>>, %arg4: memref<1x16xf32, #tpu.memory_space<vmem>>, %arg5: memref<8x16xf32, #tpu.memory_space<vmem>>) attributes {dimension_semantics = [#tpu.dimension_semantics<arbitrary>], iteration_bounds = array<i64: 2>, scalar_prefetch = 0 : i64, scratch_operands = 0 : i64, tpu.core_type = #tpu.core_type<tc>, window_params = [{pipeline_mode = #tpu.pipeline_mode<synchronous>, transform_indices = @transform_0, window_bounds = array<i64: 8, 128>}, {transform_indices = @transform_1, window_bounds = array<i64: 128, 16000>}, {transform_indices = @transform_2, window_bounds = array<i64: 16, 16000>}, {pipeline_mode = #tpu.pipeline_mode<synchronous>, transform_indices = @transform_3, window_bounds = array<i64: 1, 16>}, {pipeline_mode = #tpu.pipeline_mode<synchronous>, transform_indices = @transform_4, window_bounds = array<i64: 8, 16>}]} {
    %c0_i32 = arith.constant 0 : i32
    %0 = arith.cmpi eq, %arg0, %c0_i32 : i32
    %1 = arith.extui %0 : i1 to i32
    %c0_i32_0 = arith.constant 0 : i32
    %2 = arith.cmpi ne, %1, %c0_i32_0 : i32
    scf.if %2 {
      %c0_11 = arith.constant 0 : index
      %c0_12 = arith.constant 0 : index
      %12 = vector.load %arg4[%c0_11, %c0_12] : memref<1x16xf32, #tpu.memory_space<vmem>>, vector<1x16xf32>
      %13 = vector.shape_cast %12 : vector<1x16xf32> to vector<1x16xf32>
      %14 = vector.broadcast %13 : vector<1x16xf32> to vector<8x16xf32>
      %c0_13 = arith.constant 0 : index
      %c0_14 = arith.constant 0 : index
      %15 = vector.load %arg5[%c0_13, %c0_14] : memref<8x16xf32, #tpu.memory_space<vmem>>, vector<8x16xf32>
      tpu.vector_store %arg5[%c0_13, %c0_14], %14 {strides = array<i32>} : memref<8x16xf32, #tpu.memory_space<vmem>>, vector<8x16xf32>,
    } else {
    }
    %c0 = arith.constant 0 : index
    %c0_1 = arith.constant 0 : index
    %3 = vector.load %arg1[%c0, %c0_1] : memref<8x128xbf16, #tpu.memory_space<vmem>>, vector<8x128xbf16>
    %c0_2 = arith.constant 0 : index
    %c0_3 = arith.constant 0 : index
    %4 = vector.load %arg2[%c0_2, %c0_3] : memref<128x16000xbf16, #tpu.memory_space<vmem>>, vector<128x16000xbf16>
    %cst = arith.constant dense<0.000000e+00> : vector<8x16000xf32>
    %5 = tpu.matmul %3, %4, %cst {dimension_numbers = #tpu.dot_dimension_numbers<[1], [0], [0], [1], [0, 0, 1, 1], [], []>} : vector<8x128xbf16>, vector<128x16000xbf16>, vector<8x16000xf32> -> vector<8x16000xf32>
    %c0_4 = arith.constant 0 : index
    %c0_5 = arith.constant 0 : index
    %6 = vector.load %arg5[%c0_4, %c0_5] : memref<8x16xf32, #tpu.memory_space<vmem>>, vector<8x16xf32>
    %7 = arith.truncf %5 : vector<8x16000xf32> to vector<8x16000xbf16>
    %c0_6 = arith.constant 0 : index
    %c0_7 = arith.constant 0 : index
    %8 = vector.load %arg3[%c0_6, %c0_7] : memref<16x16000xbf16, #tpu.memory_space<vmem>>, vector<16x16000xbf16>
    %cst_8 = arith.constant dense<0.000000e+00> : vector<8x16xf32>
    %9 = tpu.matmul %7, %8, %cst_8 {dimension_numbers = #tpu.dot_dimension_numbers<[1], [1], [0], [0], [0, 0, 1, 0], [], []>} : vector<8x16000xbf16>, vector<16x16000xbf16>, vector<8x16xf32> -> vector<8x16xf32>
    %10 = arith.addf %6, %9 : vector<8x16xf32>
    %c0_9 = arith.constant 0 : index
    %c0_10 = arith.constant 0 : index
    %11 = vector.load %arg5[%c0_9, %c0_10] : memref<8x16xf32, #tpu.memory_space<vmem>>, vector<8x16xf32>
    tpu.vector_store %arg5[%c0_9, %c0_10], %10 {strides = array<i32>} : memref<8x16xf32, #tpu.memory_space<vmem>>, vector<8x16xf32>,
    return
  }
  func.func @transform_0(%arg0: i32) -> (i32, i32) {
    %c0_i32 = arith.constant 0 : i32
    %c0_i32_0 = arith.constant 0 : i32
    %c0_i32_1 = arith.constant 0 : i32
    return %c0_i32, %c0_i32_0 : i32, i32
  }
  func.func @transform_1(%arg0: i32) -> (i32, i32) {
    %c0_i32 = arith.constant 0 : i32
    %c0_i32_0 = arith.constant 0 : i32
    return %c0_i32, %arg0 : i32, i32
  }
  func.func @transform_2(%arg0: i32) -> (i32, i32) {
    %c0_i32 = arith.constant 0 : i32
    %c0_i32_0 = arith.constant 0 : i32
    return %c0_i32, %arg0 : i32, i32
  }
  func.func @transform_3(%arg0: i32) -> (i32, i32) {
    %c0_i32 = arith.constant 0 : i32
    %c0_i32_0 = arith.constant 0 : i32
    %c0_i32_1 = arith.constant 0 : i32
    return %c0_i32, %c0_i32_0 : i32, i32
  }
  func.func @transform_4(%arg0: i32) -> (i32, i32) {
    %c0_i32 = arith.constant 0 : i32
    %c0_i32_0 = arith.constant 0 : i32
    %c0_i32_1 = arith.constant 0 : i32
    return %c0_i32, %c0_i32_0 : i32, i32
  }
}

</mosaic_0001>

<bundles_post_ra>
// kernel: pos_head_pallas.1
= control target key start
LH: loop header
LB: loop body
LE: loop exit
PB: predicated region body
PF: predicated region fallthrough
CT: control target
= control target key end

     0   :  { %9 = vsyncpa [#allocation3], 0  ;;  %s17597_s0 = inlined_call_operand.hbm [shape: bf16[8,128], index: 0, kind: input, shape index: {}]   ;;  %s17598_s1 = inlined_call_operand.hbm [shape: bf16[128,32000], index: 1, kind: input, shape index: {}]   ;;  %s17599_s2 = inlined_call_operand.hbm [shape: bf16[16,32000], index: 2, kind: input, shape index: {}]   ;;  %s17600_s3 = inlined_call_operand.hbm [shape: f32[1,16], index: 3, kind: input, shape index: {}]   ;;  %s17601_s4 = inlined_call_operand.hbm [shape: f32[8,16], index: 4, kind: output, shape index: {}]  }
   0x1   :  { %10 = vsyncpa [#allocation6], 0 }
   0x2   :  { %12 = vsyncpa [#allocation6 + $0x1], 0 }
   0x3   :  { %13 = vsyncpa [#allocation9], 0 }
   0x4   :  { %14 = vsyncpa [#allocation4], 0  ;;  %s15559_s15 = smov 0   ;;  %s15561_s16 = smov 0  }
   0x5   :  { %s15563_s17 = smov 0   ;;  %s15565_s18 = smov 0  }
   0x6 LB: > { %s15580_s19 = sadd.s32 1, %s15521_s18   ;;  %s48_s20 = sadd.s32 1, %s15517_s17  ;;  %s15521_s18 = sphi %s15565_s18, %s17714_s18   ;;  %s15517_s17 = sphi %s15563_s17, %s17713_s17   ;;  %s15513_s16 = sphi %s15561_s16, %s17712_s16   ;;  %s15509_s15 = sphi %s15559_s15, %s17711_s15  }
   0x7   : > { %s45_s21 = ssub.s32 %s15521_s18, %s15580_s19  ;;  %p55_p0 = scmp.ne.s32.totalorder %s15517_s17, %s15513_s16 }
   0x8   : > { %p46_p1 = scmp.eq.s32.totalorder %s45_s21, 0  ;;  %p56_p2 = scmp.eq.s32.totalorder %s15521_s18, 0 }
   0x9   : > { %p13598_p3 = scmp.lt.s32.totalorder %s15521_s18, 2  ;;  %s175_s23 = sand.u32 1, %s15521_s18  }
   0xa   : > { %s15590_s22 = scalar_select %p46_p1, %s15517_s17, %s48_s20  }
   0xb   : > { %p57_p4 = por %p56_p2, %p55_p0  ;;  %s177_s24 = sand.u32 1, %s15517_s17  }
   0xc   : > { %s13562_s25 = smul.u32 8000, %s177_s24  ;;  %s15610_s8 = scalar_lea.sflag [#allocation6], %s175_s23 }
   0xd   : > { %p15594_p5 = pnand %p13598_p3, %p57_p4  ;;  %s13523_s27 = smul.u32 8000, %s15521_s18 }
   0xe   : > { %s179_s5 = scalar_lea.vmem [#allocation5], %s13562_s25  ;;  %s15608_s7 = smul.u32 1000, %s177_s24 }
   0xf   : > { %s15604_s30 = scalar_lea.hbm %s17598_s1, %s13523_s27  ;;  %s186_s6 = sshll.u32 %s179_s5, 4  ;;  %s15606_s6 = int_to_ptr.vmem [resolvable:$true] %s186_s6 }
  0x10   : > { %s15333_s9 = scalar_lea.hbm %s15604_s30, 128000  ;;  %p15335_p7 = pneg %p15594_p5 }
  0x11   : > { %p15334_p6 = scmp.ne.s32.totalorder %s15604_s30, %s15333_s9  ;;  %s15338_s12 = scalar_lea.hbm %s17598_s1, 256000 }
  0x12   : > { %p15339_p10 = scmp.lt.u32.totalorder %s15604_s30, %s17598_s1  ;;  %p15340_p11 = scmp.lt.u32.totalorder %s15338_s12, %s15333_s9 }
  0x13   : > { %p15336_p8 = pnand %p15335_p7, %p15334_p6  ;;  %p15342_p13 = scmp.lt.u32.totalorder %s15333_s9, %s15604_s30 }
  0x14   : > { %p15341_p12 = por %p15340_p11, %p15339_p10 }
  0x15   : > { %p15337_p9 = pneg %p15336_p8 }
  0x16   : > { %p15343_p0 = por %p15342_p13, %p15341_p12 }
  0x18   : > { %p15344_p1 = pnand %p15343_p0, %p15337_p9 }
  0x1a   : > { %15347 = shalt.err (!%p15344_p1)
}
  0x1b   : > { %s15348_s20 = scalar_lea.vmem %s15606_s6, 128000  ;;  %s15523_s21 = smov [#allocation5]  }
  0x1c   : > { %p15349_p2 = scmp.ne.s32.totalorder %s15606_s6, %s15348_s20  ;;  %s15353_s23 = sshll.u32 %s15523_s21, 4  ;;  %s15354_s23 = int_to_ptr.vmem [resolvable:$false] %s15353_s23 }
  0x1d   : > { %s15355_s24 = scalar_lea.vmem %s15354_s23, 256000  ;;  %p15356_p6 = scmp.lt.s32.totalorder %s15606_s6, %s15354_s23 }
  0x1e   : > { %p15351_p3 = pnand %p15349_p2, %p15335_p7  ;;  %p15357_p8 = scmp.lt.s32.totalorder %s15355_s24, %s15348_s20 }
  0x20   : > { %p15352_p4 = pneg %p15351_p3  ;;  %p15358_p10 = por %p15357_p8, %p15356_p6 }
  0x22   : > { %p15359_p11 = pnand %p15358_p10, %p15352_p4 }
  0x24   : > { %15362 = shalt.err (!%p15359_p11)
}
  0x25   : > { %s15524_s25 = smov 16000   ;;  %s15525_s28 = smov 8000  }
  0x26   : > { %s15526_s29 = smov 500   ;;  %s200_s5 = scalar_lea.vmem [#allocation7], %s15608_s7 }
  0x27   : > { %13592 = dma.hbm_to_vmem [thread:$0]  (!%p15594_p5), %s15604_s30, 128000, %s15606_s6, %s15610_s8, %s15524_s25, %s15525_s28, %s15526_s29  }
  0x28   : > { %s207_s9 = sshll.u32 %s200_s5, 4  ;;  %s15643_s10 = sadd.s32 4294967295, %s15521_s18   ;;  %s15680_s9 = int_to_ptr.vmem [resolvable:$true] %s207_s9 }
  0x29   : > { %p61_p9 = scmp.ne.s32.totalorder %s15513_s16, %s15509_s15  ;;  %p17602_p12 = scmp.eq.s32.totalorder %s15643_s10, 0 }
  0x2a   : > { %p12383_p13 = scmp.ge.s32.totalorder %s15521_s18, 1  ;;  %p140_p0 = scmp.lt.s32.totalorder %s15521_s18, 3 }
  0x2b   : > { %p15653_p2 = por %p17602_p12, %p61_p9  ;;  %s15527_s6 = smov [#allocation2]  }
  0x2c   : > { %p15657_p3 = pnand %p12383_p13, %p140_p0  ;;  %s153_s7 = sshll.u32 %s15527_s6, 4  ;;  %s15661_s7 = int_to_ptr.vmem [resolvable:$true] %s153_s7 }
  0x2d   : > { %s17608_s11 = scalar_select %p15653_p2, 1, 0 }
  0x2e   : > { %s17609_s30 = scalar_select %p15657_p3, 1, 0 }
  0x2f   : > { %p13582_p4 = pneg %p15657_p3  ;;  %s15528_s15 = smov [#allocation8]  }
  0x30   : > { %s164_s12 = sshll.u32 %s15528_s15, 4  ;;  %s15672_s20 = scalar_lea.hbm %s17599_s2, %s13523_s27  ;;  %s15665_s12 = int_to_ptr.vmem [resolvable:$true] %s164_s12 }
  0x31   : > { %p15676_p6 = pnand %p13582_p4, %p17602_p12  ;;  %s15363_s23 = scalar_lea.hbm %s15672_s20, 16000 }
  0x32   : > { %p15364_p8 = scmp.ne.s32.totalorder %s15672_s20, %s15363_s23  ;;  %s15368_s24 = scalar_lea.hbm %s17599_s2, 32000 }
  0x33   : > { %p15369_p9 = scmp.lt.u32.totalorder %s15672_s20, %s17599_s2  ;;  %p15370_p13 = scmp.lt.u32.totalorder %s15368_s24, %s15363_s23 }
  0x34   : > { %p15366_p10 = pnand %p15364_p8, %p15335_p7  ;;  %p15372_p4 = scmp.lt.u32.totalorder %s15363_s23, %s15672_s20 }
  0x35   : > { %p15371_p0 = por %p15370_p13, %p15369_p9 }
  0x36   : > { %p15367_p11 = pneg %p15366_p10 }
  0x37   : > { %p15373_p1 = por %p15372_p4, %p15371_p0 }
  0x39   : > { %p15374_p12 = pnand %p15373_p1, %p15367_p11 }
  0x3b   : > { %15377 = shalt.err (!%p15374_p12)
}
  0x3c   : > { %s15378_s15 = scalar_lea.vmem %s15680_s9, 16000  ;;  %s15529_s13 = smov [#allocation7]  }
  0x3d   : > { %p15379_p8 = scmp.ne.s32.totalorder %s15680_s9, %s15378_s15  ;;  %s15383_s14 = sshll.u32 %s15529_s13, 4  ;;  %s15384_s14 = int_to_ptr.vmem [resolvable:$false] %s15383_s14 }
  0x3e   : > { %s15385_s18 = scalar_lea.vmem %s15384_s14, 32000  ;;  %p15386_p3 = scmp.lt.s32.totalorder %s15680_s9, %s15384_s14 }
  0x3f   : > { %p15381_p10 = pnand %p15379_p8, %p15335_p7  ;;  %p15387_p9 = scmp.lt.s32.totalorder %s15385_s18, %s15378_s15 }
  0x41   : > { %p15382_p2 = pneg %p15381_p10  ;;  %p15388_p13 = por %p15387_p9, %p15386_p3 }
  0x43   : > { %p15389_p0 = pnand %p15388_p13, %p15382_p2 }
  0x45   : > { %15392 = shalt.err (!%p15389_p0)
}
  0x46   : > { %13595 = dma.hbm_to_vmem [thread:$0]  (!%p15594_p5), %s15672_s20, 16000, %s15680_s9, %s15610_s8, %s15524_s25, %s15525_s28, %s15526_s29  }
  0x47   : > { %s15393_s24 = scalar_lea.hbm %s17597_s0, 64  ;;  %p15395_p12 = pneg %p15676_p6 }
  0x48   : > { %p15394_p7 = scmp.ne.s32.totalorder %s17597_s0, %s15393_s24  ;;  %p15400_p3 = scmp.lt.u32.totalorder %s15393_s24, %s17597_s0 }
  0x4a   : > { %p15396_p1 = pnand %p15395_p12, %p15394_p7 }
  0x4c   : > { %p15397_p2 = pneg %p15396_p1 }
  0x4e   : > { %p15402_p11 = pnand %p15400_p3, %p15397_p2 }
  0x50   : > { %15405 = shalt.err (!%p15402_p11)
}
  0x51   : > { %s15406_s8 = scalar_lea.vmem %s15661_s7, 64  ;;  %p15414_p10 = scmp.lt.s32.totalorder %s15661_s7, %s15661_s7 }
  0x52   : > { %p15407_p5 = scmp.ne.s32.totalorder %s15661_s7, %s15406_s8  ;;  %p15415_p9 = scmp.lt.s32.totalorder %s15406_s8, %s15406_s8 }
  0x54   : > { %p15409_p4 = pnand %p15407_p5, %p15395_p12  ;;  %p15416_p13 = por %p15415_p9, %p15414_p10 }
  0x56   : > { %p15410_p8 = pneg %p15409_p4 }
  0x58   : > { %p15417_p0 = pnand %p15416_p13, %p15410_p8 }
  0x5a   : > { %15420 = shalt.err (!%p15417_p0)
}
  0x5b   : > { %13585 = dma.hbm_to_vmem [thread:$0]  (!%p15676_p6), %s17597_s0, 64, %s15661_s7, [#allocation3]  }
  0x5c   : > { %s15421_s20 = scalar_lea.hbm %s17600_s3, 16 }
  0x5d   : > { %p15422_p7 = scmp.ne.s32.totalorder %s17600_s3, %s15421_s20  ;;  %p15428_p3 = scmp.lt.u32.totalorder %s15421_s20, %s17600_s3 }
  0x5f   : > { %p15424_p1 = pnand %p15422_p7, %p15395_p12 }
  0x61   : > { %p15425_p2 = pneg %p15424_p1 }
  0x63   : > { %p15430_p11 = pnand %p15428_p3, %p15425_p2 }
  0x65   : > { %15433 = shalt.err (!%p15430_p11)
}
  0x66   : > { %s15434_s7 = scalar_lea.vmem %s15665_s12, 16  ;;  %s15441_s27 = scalar_lea.vmem %s15665_s12, 32 }
  0x67   : > { %p15435_p5 = scmp.ne.s32.totalorder %s15665_s12, %s15434_s7  ;;  %p15442_p10 = scmp.lt.s32.totalorder %s15665_s12, %s15665_s12 }
  0x68   : > { %p15443_p9 = scmp.lt.s32.totalorder %s15441_s27, %s15434_s7 }
  0x69   : > { %p15437_p4 = pnand %p15435_p5, %p15395_p12 }
  0x6a   : > { %p15444_p13 = por %p15443_p9, %p15442_p10 }
  0x6b   : > { %p15438_p8 = pneg %p15437_p4 }
  0x6d   : > { %p15445_p0 = pnand %p15444_p13, %p15438_p8 }
  0x6f   : > { %15448 = shalt.err (!%p15445_p0)
}
  0x70   : > { %13588 = dma.hbm_to_vmem [thread:$0]  (!%p15676_p6), %s17600_s3, 16, %s15665_s12, [#allocation9]  }
  0x71   : > { %p17611_p7 = scmp.ne.s32.totalorder %s17609_s30, 0 }
  0x73   : > { %219 = sbr.rel (%p17611_p7) target bundleno = 1645 (0x66d), region = 36 }
  0x7a   : > { %p17612_p12 = scmp.eq.s32.totalorder %s15643_s10, 0 }
  0x7c   : > { %15492 = dma.done.wait (%p17612_p12), [#allocation3], 64   ;;  %p17613_p1 = pmov %p17612_p12 }
  0x7d   : > { %s225_s6 = sand.u32 1, %s15643_s10   ;;  %s227_s26 = sand.u32 1, %s15513_s16  }
  0x7e   : > { %15494 = vsyncadd (%p17613_p1), [#allocation3], 4294967232  ;;  %s13564_s21 = smul.u32 8000, %s227_s26  ;;  %s226_s15 = scalar_lea.sflag [#allocation6], %s225_s6 }
  0x7f   : > { %p17614_p2 = scmp.ne.s32.totalorder %s17608_s11, 0 }
  0x80   : > { %s15770_s8 = scalar_lea.vmem [#allocation5], %s13564_s21 }
  0x81   : > { %15496 = dma.done.wait (%p17614_p2), %s226_s15, 144000  }
  0x82   : > { %15498 = vsyncadd (%p17614_p2), %s226_s15, 4294823296  ;;  %s13565_s30 = smul.u32 1000, %s227_s26  ;;  %p17615_p6 = pmov %p17613_p1 }
  0x84   : > { %s15776_s12 = scalar_lea.vmem [#allocation7], %s13565_s30 }
  0x85   : > { %15500 = dma.done.wait (%p17615_p6), [#allocation9], 16   ;;  %p17616_p3 = pmov %p17613_p1 }
  0x86   : > { %p17617_p11 = scmp.ne.s32.totalorder %s15643_s10, 0 }
  0x87   : > { %15502 = vsyncadd (%p17616_p3), [#allocation9], 4294967280  ;;  %v12393_v0 = vld [vmem:[#allocation8] ss:$0 sm:$0xff] (!%p17617_p11)  ;;  %vm281_vm0 = vcmask (!%p17617_p11), 130048  }
  0x88   : > { %273 = sbr.rel (%p17617_p11) target bundleno = 143 (0x8f), region = 56  ;;  %282 = vst.msk [vmem:[#allocation10] sm:$0xff] (!%p17617_p11), %vm281_vm0, %v12393_v0 }
  0x8f PF: > { %v13644_v1 = vld [vmem:[%s15770_s8 + $0x4] ss:$500 sps:$4 sm:$0xff]   ;;  %v13646_v2 = vld [vmem:[%s15770_s8 + $0xc] ss:$500 sps:$4 sm:$0xff]   ;;  %v17605_v3 = vmov 0   ;;  %vm15532_vm1 = vmmov 0  }
  0x90   : > { %6332 = vmatprep.mubr.bf16.mxu0 %v17605_v3  ;;  %6373 = vmatprep.mubr.bf16.mxu1 %v17605_v3  ;;  %v13648_v4 = vld [vmem:[%s15770_s8] ss:$500 sps:$4 sm:$0xff]   ;;  %v13649_v5 = vld [vmem:[%s15770_s8 + $0x8] ss:$500 sps:$4 sm:$0xff]   ;;  %v13655_v9 = vld [vmem:[%s15770_s8 + $0x3f0] ss:$500 sps:$4 sm:$0xff]  }
  0x91   : > { %6300 = vmatprep.subr.bf16.mxu0 %v13644_v1  ;;  %6341 = vmatprep.subr.bf16.mxu1 %v13646_v2  ;;  %v13650_v6 = vld [vmem:[%s15770_s8 + $0x3ec] ss:$500 sps:$4 sm:$0xff]   ;;  %v13652_v7 = vld [vmem:[%s15770_s8 + $0x3f4] ss:$500 sps:$4 sm:$0xff]   ;;  %v13658_v11 = vld [vmem:[%s15770_s8 + $0x7dc] ss:$500 sps:$4 sm:$0xff]  }
  0x92   : > { %6301 = vmatpush1.bf16.msra.mxu0 %v13648_v4  ;;  %6342 = vmatpush1.bf16.msra.mxu1 %v13649_v5  ;;  %v13654_v8 = vld [vmem:[%s15770_s8 + $0x3e8] ss:$500 sps:$4 sm:$0xff]   ;;  %v13660_v12 = vld [vmem:[%s15770_s8 + $0x7d0] ss:$500 sps:$4 sm:$0xff]   ;;  %v13661_v13 = vld [vmem:[%s15770_s8 + $0x7d8] ss:$500 sps:$4 sm:$0xff]  }
  0x93   : > { %6302 = vmatprep.subr.bf16.mxu0 %v13650_v6  ;;  %6343 = vmatprep.subr.bf16.mxu1 %v13652_v7  ;;  %v13656_v10 = vld [vmem:[%s15770_s8 + $0x7d4] ss:$500 sps:$4 sm:$0xff]   ;;  %v13662_v14 = vld [vmem:[%s15770_s8 + $0xbbc] ss:$500 sps:$4 sm:$0xff]   ;;  %v13664_v15 = vld [vmem:[%s15770_s8 + $0xbc4] ss:$500 sps:$4 sm:$0xff]  }
  0x94   : > { %v13666_v16 = vld [vmem:[%s15770_s8 + $0xbb8] ss:$500 sps:$4 sm:$0xff]   ;;  %v13667_v17 = vld [vmem:[%s15770_s8 + $0xbc0] ss:$500 sps:$4 sm:$0xff]   ;;  %v13673_v21 = vld [vmem:[%s15770_s8 + $0xfa8] ss:$500 sps:$4 sm:$0xff]  }
  0x95   : > { %v13668_v18 = vld [vmem:[%s15770_s8 + $0xfa4] ss:$500 sps:$4 sm:$0xff]   ;;  %v13670_v19 = vld [vmem:[%s15770_s8 + $0xfac] ss:$500 sps:$4 sm:$0xff]   ;;  %v13676_v23 = vld [vmem:[%s15770_s8 + $0x1394] ss:$500 sps:$4 sm:$0xff]  }
  0x96   : > { %6303 = vmatpush1.bf16.msra.mxu0 %v13654_v8  ;;  %6344 = vmatpush1.bf16.msra.mxu1 %v13655_v9  ;;  %v13672_v20 = vld [vmem:[%s15770_s8 + $0xfa0] ss:$500 sps:$4 sm:$0xff]   ;;  %v13678_v24 = vld [vmem:[%s15770_s8 + $0x1388] ss:$500 sps:$4 sm:$0xff]   ;;  %v13679_v25 = vld [vmem:[%s15770_s8 + $0x1390] ss:$500 sps:$4 sm:$0xff]  }
  0x97   : > { %6304 = vmatprep.subr.bf16.mxu0 %v13656_v10  ;;  %6345 = vmatprep.subr.bf16.mxu1 %v13658_v11  ;;  %v13674_v22 = vld [vmem:[%s15770_s8 + $0x138c] ss:$500 sps:$4 sm:$0xff]   ;;  %v13680_v26 = vld [vmem:[%s15770_s8 + $0x1774] ss:$500 sps:$4 sm:$0xff]   ;;  %v13682_v27 = vld [vmem:[%s15770_s8 + $0x177c] ss:$500 sps:$4 sm:$0xff]  }
  0x98   : > { %v13684_v28 = vld [vmem:[%s15770_s8 + $0x1770] ss:$500 sps:$4 sm:$0xff]   ;;  %v13685_v29 = vld [vmem:[%s15770_s8 + $0x1778] ss:$500 sps:$4 sm:$0xff]   ;;  %v13691_v33 = vld [vmem:[%s15770_s8 + $0x1b60] ss:$500 sps:$4 sm:$0xff]  }
  0x99   : > { %v13686_v30 = vld [vmem:[%s15770_s8 + $0x1b5c] ss:$500 sps:$4 sm:$0xff]   ;;  %v13688_v31 = vld [vmem:[%s15770_s8 + $0x1b64] ss:$500 sps:$4 sm:$0xff]   ;;  %v13694_v34 = vld [vmem:[%s15770_s8 + $0x14] ss:$500 sps:$4 sm:$0xff]  }
  0x9a   : > { %6305 = vmatpush1.bf16.msra.mxu0 %v13660_v12  ;;  %6346 = vmatpush1.bf16.msra.mxu1 %v13661_v13  ;;  %v13690_v32 = vld [vmem:[%s15770_s8 + $0x1b58] ss:$500 sps:$4 sm:$0xff]   ;;  %v13697_v35 = vld [vmem:[%s15770_s8 + $0x1c] ss:$500 sps:$4 sm:$0xff]   ;;  %v13701_v42 = vld [vmem:[%s15770_s8 + $0x400] ss:$500 sps:$4 sm:$0xff]  }
  0x9b   : > { %6306 = vmatprep.subr.bf16.mxu0 %v13662_v14  ;;  %6347 = vmatprep.subr.bf16.mxu1 %v13664_v15  ;;  %v15820_v36 = vld [vmem:[#allocation2] sm:$0xf]  ;;  %v13692_v37 = vld [vmem:[%s15770_s8 + $0x10] ss:$500 sps:$4 sm:$0xff]   ;;  %v13695_v38 = vld [vmem:[%s15770_s8 + $0x18] ss:$500 sps:$4 sm:$0xff]  }
  0x9c   : > { %v13700_v39 = vld [vmem:[%s15770_s8 + $0x3fc] ss:$500 sps:$4 sm:$0xff]   ;;  %v13703_v40 = vld [vmem:[%s15770_s8 + $0x404] ss:$500 sps:$4 sm:$0xff]   ;;  %v13709_v44 = vld [vmem:[%s15770_s8 + $0x7ec] ss:$500 sps:$4 sm:$0xff]  }
  0x9d   : > { %v13698_v41 = vld [vmem:[%s15770_s8 + $0x3f8] ss:$500 sps:$4 sm:$0xff]   ;;  %v13704_v45 = vld [vmem:[%s15770_s8 + $0x7e0] ss:$500 sps:$4 sm:$0xff]   ;;  %v13707_v46 = vld [vmem:[%s15770_s8 + $0x7e8] ss:$500 sps:$4 sm:$0xff]  }
  0x9e   : > { %6307 = vmatpush1.bf16.msra.mxu0 %v13666_v16  ;;  %6348 = vmatpush1.bf16.msra.mxu1 %v13667_v17  ;;  %v13706_v43 = vld [vmem:[%s15770_s8 + $0x7e4] ss:$500 sps:$4 sm:$0xff]   ;;  %v13712_v47 = vld [vmem:[%s15770_s8 + $0xbcc] ss:$500 sps:$4 sm:$0xff]   ;;  %v13715_v48 = vld [vmem:[%s15770_s8 + $0xbd4] ss:$500 sps:$4 sm:$0xff]  }
  0x9f   : > { %6308 = vmatprep.subr.bf16.mxu0 %v13668_v18  ;;  %6349 = vmatprep.subr.bf16.mxu1 %v13670_v19  ;;  %v13710_v49 = vld [vmem:[%s15770_s8 + $0xbc8] ss:$500 sps:$4 sm:$0xff]   ;;  %v13713_v50 = vld [vmem:[%s15770_s8 + $0xbd0] ss:$500 sps:$4 sm:$0xff]   ;;  %v13719_v54 = vld [vmem:[%s15770_s8 + $0xfb8] ss:$500 sps:$4 sm:$0xff]  }
  0xa0   : > { %v13718_v51 = vld [vmem:[%s15770_s8 + $0xfb4] ss:$500 sps:$4 sm:$0xff]   ;;  %v13721_v52 = vld [vmem:[%s15770_s8 + $0xfbc] ss:$500 sps:$4 sm:$0xff]   ;;  %v13727_v56 = vld [vmem:[%s15770_s8 + $0x13a4] ss:$500 sps:$4 sm:$0xff]  }
  0xa1   : > { %v13716_v53 = vld [vmem:[%s15770_s8 + $0xfb0] ss:$500 sps:$4 sm:$0xff]   ;;  %v13722_v57 = vld [vmem:[%s15770_s8 + $0x1398] ss:$500 sps:$4 sm:$0xff]   ;;  %v13725_v58 = vld [vmem:[%s15770_s8 + $0x13a0] ss:$500 sps:$4 sm:$0xff]  }
  0xa2   : > { %6309 = vmatpush1.bf16.msra.mxu0 %v13672_v20  ;;  %6350 = vmatpush1.bf16.msra.mxu1 %v13673_v21  ;;  %v13724_v55 = vld [vmem:[%s15770_s8 + $0x139c] ss:$500 sps:$4 sm:$0xff]   ;;  %v13730_v59 = vld [vmem:[%s15770_s8 + $0x1784] ss:$500 sps:$4 sm:$0xff]   ;;  %v13733_v60 = vld [vmem:[%s15770_s8 + $0x178c] ss:$500 sps:$4 sm:$0xff]  }
  0xa3   : > { %6310 = vmatprep.subr.bf16.mxu0 %v13674_v22  ;;  %6351 = vmatprep.subr.bf16.mxu1 %v13676_v23  ;;  %v13728_v61 = vld [vmem:[%s15770_s8 + $0x1780] ss:$500 sps:$4 sm:$0xff]   ;;  %v13731_v62 = vld [vmem:[%s15770_s8 + $0x1788] ss:$500 sps:$4 sm:$0xff]   ;;  %v13737_v2 = vld [vmem:[%s15770_s8 + $0x1b70] ss:$500 sps:$4 sm:$0xff]  }
  0xa4   : > { %v13736_v63 = vld [vmem:[%s15770_s8 + $0x1b6c] ss:$500 sps:$4 sm:$0xff]   ;;  %v13739_v0 = vld [vmem:[%s15770_s8 + $0x1b74] ss:$500 sps:$4 sm:$0xff]   ;;  %v13742_v4 = vld [vmem:[%s15770_s8 + $0x24] ss:$500 sps:$4 sm:$0xff]  }
  0xa5   : > { %v13734_v1 = vld [vmem:[%s15770_s8 + $0x1b68] ss:$500 sps:$4 sm:$0xff]   ;;  %v13745_v5 = vld [vmem:[%s15770_s8 + $0x2c] ss:$500 sps:$4 sm:$0xff]   ;;  %v13749_v11 = vld [vmem:[%s15770_s8 + $0x410] ss:$500 sps:$4 sm:$0xff]  }
  0xa6   : > { %6311 = vmatpush1.bf16.msra.mxu0 %v13678_v24  ;;  %6352 = vmatpush1.bf16.msra.mxu1 %v13679_v25  ;;  %v13740_v6 = vld [vmem:[%s15770_s8 + $0x20] ss:$500 sps:$4 sm:$0xff]   ;;  %v13743_v7 = vld [vmem:[%s15770_s8 + $0x28] ss:$500 sps:$4 sm:$0xff]   ;;  %v13752_v14 = vld [vmem:[%s15770_s8 + $0x7f0] ss:$500 sps:$4 sm:$0xff]  }
  0xa7   : > { %6312 = vmatprep.subr.bf16.mxu0 %v13680_v26  ;;  %6353 = vmatprep.subr.bf16.mxu1 %v13682_v27  ;;  %v13748_v8 = vld [vmem:[%s15770_s8 + $0x40c] ss:$500 sps:$4 sm:$0xff]   ;;  %v13751_v9 = vld [vmem:[%s15770_s8 + $0x414] ss:$500 sps:$4 sm:$0xff]   ;;  %v13757_v13 = vld [vmem:[%s15770_s8 + $0x7fc] ss:$500 sps:$4 sm:$0xff]  }
  0xa8   : > { %v13746_v10 = vld [vmem:[%s15770_s8 + $0x408] ss:$500 sps:$4 sm:$0xff]   ;;  %v13755_v15 = vld [vmem:[%s15770_s8 + $0x7f8] ss:$500 sps:$4 sm:$0xff]   ;;  %v13761_v19 = vld [vmem:[%s15770_s8 + $0xbe0] ss:$500 sps:$4 sm:$0xff]  }
  0xa9   : > { %v13754_v12 = vld [vmem:[%s15770_s8 + $0x7f4] ss:$500 sps:$4 sm:$0xff]   ;;  %v13760_v16 = vld [vmem:[%s15770_s8 + $0xbdc] ss:$500 sps:$4 sm:$0xff]   ;;  %v13763_v17 = vld [vmem:[%s15770_s8 + $0xbe4] ss:$500 sps:$4 sm:$0xff]  }
  0xaa   : > { %6313 = vmatpush1.bf16.msra.mxu0 %v13684_v28  ;;  %6354 = vmatpush1.bf16.msra.mxu1 %v13685_v29  ;;  %v13758_v18 = vld [vmem:[%s15770_s8 + $0xbd8] ss:$500 sps:$4 sm:$0xff]   ;;  %v13764_v22 = vld [vmem:[%s15770_s8 + $0xfc0] ss:$500 sps:$4 sm:$0xff]   ;;  %v13767_v23 = vld [vmem:[%s15770_s8 + $0xfc8] ss:$500 sps:$4 sm:$0xff]  }
  0xab   : > { %6314 = vmatprep.subr.bf16.mxu0 %v13686_v30  ;;  %6355 = vmatprep.subr.bf16.mxu1 %v13688_v31  ;;  %v13766_v20 = vld [vmem:[%s15770_s8 + $0xfc4] ss:$500 sps:$4 sm:$0xff]   ;;  %v13769_v21 = vld [vmem:[%s15770_s8 + $0xfcc] ss:$500 sps:$4 sm:$0xff]   ;;  %v13775_v25 = vld [vmem:[%s15770_s8 + $0x13b4] ss:$500 sps:$4 sm:$0xff]  }
  0xac   : > { %v13772_v24 = vld [vmem:[%s15770_s8 + $0x13ac] ss:$500 sps:$4 sm:$0xff]   ;;  %v13770_v26 = vld [vmem:[%s15770_s8 + $0x13a8] ss:$500 sps:$4 sm:$0xff]   ;;  %v13773_v27 = vld [vmem:[%s15770_s8 + $0x13b0] ss:$500 sps:$4 sm:$0xff]  }
  0xad   : > { %v13778_v28 = vld [vmem:[%s15770_s8 + $0x1794] ss:$500 sps:$4 sm:$0xff]   ;;  %v13781_v29 = vld [vmem:[%s15770_s8 + $0x179c] ss:$500 sps:$4 sm:$0xff]   ;;  %v13779_v31 = vld [vmem:[%s15770_s8 + $0x1798] ss:$500 sps:$4 sm:$0xff]  }
  0xae   : > { %6315 = vmatpush1.bf16.msra.mxu0 %v13690_v32  ;;  %6356 = vmatpush1.bf16.msra.mxu1 %v13691_v33  ;;  %v13776_v30 = vld [vmem:[%s15770_s8 + $0x1790] ss:$500 sps:$4 sm:$0xff]   ;;  %s15533_s11 = smov [#allocation10]   ;;  %vm12281_vm2 = vcmask 130048   ;;  %p13601_p5 = scmp.eq.s32.totalorder %s15643_s10, 1 }
  0xaf   : > { %6382 = vmatprep.subr.bf16.mxu0 %v13694_v34  ;;  %6423 = vmatprep.subr.bf16.mxu1 %v13697_v35  ;;  %v13784_v32 = vld [vmem:[%s15770_s8 + $0x1b7c] ss:$500 sps:$4 sm:$0xff]   ;;  %v13787_v33 = vld [vmem:[%s15770_s8 + $0x1b84] ss:$500 sps:$4 sm:$0xff]   ;;  %v13785_v35 = vld [vmem:[%s15770_s8 + $0x1b80] ss:$500 sps:$4 sm:$0xff]  }
  0xb0   : > { %v13782_v34 = vld [vmem:[%s15770_s8 + $0x1b78] ss:$500 sps:$4 sm:$0xff]   ;;  %s12290_s25 = sshll.u32 %s15533_s11, 4  ;;  %s12291_s25 = int_to_ptr.vmem [resolvable:$true] %s12290_s25 }
  0xb1   : > { %6333 = vmatmul.mubr.bf16.vlgmr.msra.gmra.mrb[0].mxu0 %v15820_v36  ;;  %6374 = vmatmul.mubr.bf16.vlgmr.msra.gmra.mrb[0].mxu1 %v15820_v36  ;;  %s15449_s28 = scalar_lea.vmem %s12291_s25, 128  ;;  %p15456_p9 = scmp.lt.s32.totalorder %s12291_s25, %s12291_s25 }
  0xb2   : > { %6383 = vmatpush1.bf16.msra.mxu0 %v13692_v37  ;;  %6424 = vmatpush1.bf16.msra.mxu1 %v13695_v38  ;;  %v13790_v37 = vld [vmem:[%s15770_s8 + $0x34] ss:$500 sps:$4 sm:$0xff]   ;;  %v13793_v38 = vld [vmem:[%s15770_s8 + $0x3c] ss:$500 sps:$4 sm:$0xff]   ;;  %p15450_p4 = scmp.ne.s32.totalorder %s12291_s25, %s15449_s28  ;;  %p15457_p13 = scmp.lt.s32.totalorder %s15449_s28, %s15449_s28 }
  0xb3   : > { %6384 = vmatprep.subr.bf16.mxu0 %v13700_v39  ;;  %6425 = vmatprep.subr.bf16.mxu1 %v13703_v40  ;;  %v13788_v39 = vld [vmem:[%s15770_s8 + $0x30] ss:$500 sps:$4 sm:$0xff]   ;;  %v13791_v40 = vld [vmem:[%s15770_s8 + $0x38] ss:$500 sps:$4 sm:$0xff]  }
  0xb4   : > { %6414 = vmatprep.mubr.bf16.mxu0 %v17605_v3  ;;  %6455 = vmatprep.mubr.bf16.mxu1 %v17605_v3  ;;  %p15451_p8 = pnand %p15450_p4, %p13601_p5  ;;  %p15458_p0 = por %p15457_p13, %p15456_p9 }
  0xb6   : > { %6385 = vmatpush1.bf16.msra.mxu0 %v13698_v41  ;;  %6426 = vmatpush1.bf16.msra.mxu1 %v13701_v42  ;;  %v13796_v41 = vld [vmem:[%s15770_s8 + $0x41c] ss:$500 sps:$4 sm:$0xff]   ;;  %v13799_v42 = vld [vmem:[%s15770_s8 + $0x424] ss:$500 sps:$4 sm:$0xff]   ;;  %p15452_p10 = pneg %p15451_p8 }
  0xb7   : > { %6386 = vmatprep.subr.bf16.mxu0 %v13706_v43  ;;  %6427 = vmatprep.subr.bf16.mxu1 %v13709_v44  ;;  %v13794_v43 = vld [vmem:[%s15770_s8 + $0x418] ss:$500 sps:$4 sm:$0xff]   ;;  %v13797_v44 = vld [vmem:[%s15770_s8 + $0x420] ss:$500 sps:$4 sm:$0xff]  }
  0xb8   : > { %p15459_p7 = pnand %p15458_p0, %p15452_p10 }
  0xba   : > { %6387 = vmatpush1.bf16.msra.mxu0 %v13704_v45  ;;  %6428 = vmatpush1.bf16.msra.mxu1 %v13707_v46  ;;  %v13802_v45 = vld [vmem:[%s15770_s8 + $0x804] ss:$500 sps:$4 sm:$0xff]   ;;  %v13805_v46 = vld [vmem:[%s15770_s8 + $0x80c] ss:$500 sps:$4 sm:$0xff]  }
  0xbb   : > { %6388 = vmatprep.subr.bf16.mxu0 %v13712_v47  ;;  %6429 = vmatprep.subr.bf16.mxu1 %v13715_v48  ;;  %v13800_v47 = vld [vmem:[%s15770_s8 + $0x800] ss:$500 sps:$4 sm:$0xff]   ;;  %v13803_v48 = vld [vmem:[%s15770_s8 + $0x808] ss:$500 sps:$4 sm:$0xff]  }
  0xbe   : > { %6389 = vmatpush1.bf16.msra.mxu0 %v13710_v49  ;;  %6430 = vmatpush1.bf16.msra.mxu1 %v13713_v50  ;;  %v13808_v49 = vld [vmem:[%s15770_s8 + $0xbec] ss:$500 sps:$4 sm:$0xff]   ;;  %v13811_v50 = vld [vmem:[%s15770_s8 + $0xbf4] ss:$500 sps:$4 sm:$0xff]  }
  0xbf   : > { %6390 = vmatprep.subr.bf16.mxu0 %v13718_v51  ;;  %6431 = vmatprep.subr.bf16.mxu1 %v13721_v52  ;;  %v13806_v51 = vld [vmem:[%s15770_s8 + $0xbe8] ss:$500 sps:$4 sm:$0xff]   ;;  %v13809_v52 = vld [vmem:[%s15770_s8 + $0xbf0] ss:$500 sps:$4 sm:$0xff]  }
  0xc2   : > { %6391 = vmatpush1.bf16.msra.mxu0 %v13716_v53  ;;  %6432 = vmatpush1.bf16.msra.mxu1 %v13719_v54  ;;  %v13814_v53 = vld [vmem:[%s15770_s8 + $0xfd4] ss:$500 sps:$4 sm:$0xff]   ;;  %v13817_v54 = vld [vmem:[%s15770_s8 + $0xfdc] ss:$500 sps:$4 sm:$0xff]  }
  0xc3   : > { %6392 = vmatprep.subr.bf16.mxu0 %v13724_v55  ;;  %6433 = vmatprep.subr.bf16.mxu1 %v13727_v56  ;;  %v13812_v55 = vld [vmem:[%s15770_s8 + $0xfd0] ss:$500 sps:$4 sm:$0xff]   ;;  %v13815_v56 = vld [vmem:[%s15770_s8 + $0xfd8] ss:$500 sps:$4 sm:$0xff]  }
  0xc6   : > { %6393 = vmatpush1.bf16.msra.mxu0 %v13722_v57  ;;  %6434 = vmatpush1.bf16.msra.mxu1 %v13725_v58  ;;  %v13820_v57 = vld [vmem:[%s15770_s8 + $0x13bc] ss:$500 sps:$4 sm:$0xff]   ;;  %v13823_v58 = vld [vmem:[%s15770_s8 + $0x13c4] ss:$500 sps:$4 sm:$0xff]  }
  0xc7   : > { %6394 = vmatprep.subr.bf16.mxu0 %v13730_v59  ;;  %6435 = vmatprep.subr.bf16.mxu1 %v13733_v60  ;;  %v13818_v59 = vld [vmem:[%s15770_s8 + $0x13b8] ss:$500 sps:$4 sm:$0xff]   ;;  %v13821_v60 = vld [vmem:[%s15770_s8 + $0x13c0] ss:$500 sps:$4 sm:$0xff]  }
  0xca   : > { %6395 = vmatpush1.bf16.msra.mxu0 %v13728_v61  ;;  %6436 = vmatpush1.bf16.msra.mxu1 %v13731_v62  ;;  %v13826_v61 = vld [vmem:[%s15770_s8 + $0x17a4] ss:$500 sps:$4 sm:$0xff]   ;;  %v13829_v62 = vld [vmem:[%s15770_s8 + $0x17ac] ss:$500 sps:$4 sm:$0xff]  }
  0xcb   : > { %6396 = vmatprep.subr.bf16.mxu0 %v13736_v63  ;;  %6437 = vmatprep.subr.bf16.mxu1 %v13739_v0  ;;  %v13824_v63 = vld [vmem:[%s15770_s8 + $0x17a0] ss:$500 sps:$4 sm:$0xff]   ;;  %v13827_v0 = vld [vmem:[%s15770_s8 + $0x17a8] ss:$500 sps:$4 sm:$0xff]  }
  0xce   : > { %6397 = vmatpush1.bf16.msra.mxu0 %v13734_v1  ;;  %6438 = vmatpush1.bf16.msra.mxu1 %v13737_v2  ;;  %v13832_v1 = vld [vmem:[%s15770_s8 + $0x1b8c] ss:$500 sps:$4 sm:$0xff]   ;;  %v13835_v2 = vld [vmem:[%s15770_s8 + $0x1b94] ss:$500 sps:$4 sm:$0xff]  }
  0xcf   : > { %6464 = vmatprep.subr.bf16.mxu0 %v13742_v4  ;;  %6505 = vmatprep.subr.bf16.mxu1 %v13745_v5  ;;  %v13830_v4 = vld [vmem:[%s15770_s8 + $0x1b88] ss:$500 sps:$4 sm:$0xff]   ;;  %v13833_v5 = vld [vmem:[%s15770_s8 + $0x1b90] ss:$500 sps:$4 sm:$0xff]  }
  0xd1   : > { %6415 = vmatmul.mubr.bf16.vlgmr.msra.gmra.mrb[4].mxu0 %v15820_v36  ;;  %6456 = vmatmul.mubr.bf16.vlgmr.msra.gmra.mrb[4].mxu1 %v15820_v36 }
  0xd2   : > { %6465 = vmatpush1.bf16.msra.mxu0 %v13740_v6  ;;  %6506 = vmatpush1.bf16.msra.mxu1 %v13743_v7  ;;  %v13838_v6 = vld [vmem:[%s15770_s8 + $0x44] ss:$500 sps:$4 sm:$0xff]   ;;  %v13841_v7 = vld [vmem:[%s15770_s8 + $0x4c] ss:$500 sps:$4 sm:$0xff]  }
  0xd3   : > { %6466 = vmatprep.subr.bf16.mxu0 %v13748_v8  ;;  %6507 = vmatprep.subr.bf16.mxu1 %v13751_v9  ;;  %v13836_v8 = vld [vmem:[%s15770_s8 + $0x40] ss:$500 sps:$4 sm:$0xff]   ;;  %v13839_v9 = vld [vmem:[%s15770_s8 + $0x48] ss:$500 sps:$4 sm:$0xff]  }
  0xd4   : > { %6496 = vmatprep.mubr.bf16.mxu0 %v17605_v3  ;;  %6537 = vmatprep.mubr.bf16.mxu1 %v17605_v3 }
  0xd6   : > { %6467 = vmatpush1.bf16.msra.mxu0 %v13746_v10  ;;  %6508 = vmatpush1.bf16.msra.mxu1 %v13749_v11  ;;  %v13844_v10 = vld [vmem:[%s15770_s8 + $0x42c] ss:$500 sps:$4 sm:$0xff]   ;;  %v13847_v11 = vld [vmem:[%s15770_s8 + $0x434] ss:$500 sps:$4 sm:$0xff]  }
  0xd7   : > { %6468 = vmatprep.subr.bf16.mxu0 %v13754_v12  ;;  %6509 = vmatprep.subr.bf16.mxu1 %v13757_v13  ;;  %v13842_v12 = vld [vmem:[%s15770_s8 + $0x428] ss:$500 sps:$4 sm:$0xff]   ;;  %v13845_v13 = vld [vmem:[%s15770_s8 + $0x430] ss:$500 sps:$4 sm:$0xff]  }
  0xda   : > { %6469 = vmatpush1.bf16.msra.mxu0 %v13752_v14  ;;  %6510 = vmatpush1.bf16.msra.mxu1 %v13755_v15  ;;  %v13850_v14 = vld [vmem:[%s15770_s8 + $0x814] ss:$500 sps:$4 sm:$0xff]   ;;  %v13853_v15 = vld [vmem:[%s15770_s8 + $0x81c] ss:$500 sps:$4 sm:$0xff]  }
  0xdb   : > { %6470 = vmatprep.subr.bf16.mxu0 %v13760_v16  ;;  %6511 = vmatprep.subr.bf16.mxu1 %v13763_v17  ;;  %v13848_v16 = vld [vmem:[%s15770_s8 + $0x810] ss:$500 sps:$4 sm:$0xff]   ;;  %v13851_v17 = vld [vmem:[%s15770_s8 + $0x818] ss:$500 sps:$4 sm:$0xff]  }
  0xde   : > { %6471 = vmatpush1.bf16.msra.mxu0 %v13758_v18  ;;  %6512 = vmatpush1.bf16.msra.mxu1 %v13761_v19  ;;  %v13856_v18 = vld [vmem:[%s15770_s8 + $0xbfc] ss:$500 sps:$4 sm:$0xff]   ;;  %v13859_v19 = vld [vmem:[%s15770_s8 + $0xc04] ss:$500 sps:$4 sm:$0xff]  }
  0xdf   : > { %6472 = vmatprep.subr.bf16.mxu0 %v13766_v20  ;;  %6513 = vmatprep.subr.bf16.mxu1 %v13769_v21  ;;  %v13854_v20 = vld [vmem:[%s15770_s8 + $0xbf8] ss:$500 sps:$4 sm:$0xff]   ;;  %v13857_v21 = vld [vmem:[%s15770_s8 + $0xc00] ss:$500 sps:$4 sm:$0xff]  }
  0xe2   : > { %6473 = vmatpush1.bf16.msra.mxu0 %v13764_v22  ;;  %6514 = vmatpush1.bf16.msra.mxu1 %v13767_v23  ;;  %v13862_v22 = vld [vmem:[%s15770_s8 + $0xfe4] ss:$500 sps:$4 sm:$0xff]   ;;  %v13865_v23 = vld [vmem:[%s15770_s8 + $0xfec] ss:$500 sps:$4 sm:$0xff]  }
  0xe3   : > { %6474 = vmatprep.subr.bf16.mxu0 %v13772_v24  ;;  %6515 = vmatprep.subr.bf16.mxu1 %v13775_v25  ;;  %v13860_v24 = vld [vmem:[%s15770_s8 + $0xfe0] ss:$500 sps:$4 sm:$0xff]   ;;  %v13863_v25 = vld [vmem:[%s15770_s8 + $0xfe8] ss:$500 sps:$4 sm:$0xff]  }
  0xe6   : > { %6475 = vmatpush1.bf16.msra.mxu0 %v13770_v26  ;;  %6516 = vmatpush1.bf16.msra.mxu1 %v13773_v27  ;;  %v13868_v26 = vld [vmem:[%s15770_s8 + $0x13cc] ss:$500 sps:$4 sm:$0xff]   ;;  %v13871_v27 = vld [vmem:[%s15770_s8 + $0x13d4] ss:$500 sps:$4 sm:$0xff]  }
  0xe7   : > { %6476 = vmatprep.subr.bf16.mxu0 %v13778_v28  ;;  %6517 = vmatprep.subr.bf16.mxu1 %v13781_v29  ;;  %v13866_v28 = vld [vmem:[%s15770_s8 + $0x13c8] ss:$500 sps:$4 sm:$0xff]   ;;  %v13869_v29 = vld [vmem:[%s15770_s8 + $0x13d0] ss:$500 sps:$4 sm:$0xff]  }
  0xea   : > { %6477 = vmatpush1.bf16.msra.mxu0 %v13776_v30  ;;  %6518 = vmatpush1.bf16.msra.mxu1 %v13779_v31  ;;  %v13874_v30 = vld [vmem:[%s15770_s8 + $0x17b4] ss:$500 sps:$4 sm:$0xff]   ;;  %v13877_v31 = vld [vmem:[%s15770_s8 + $0x17bc] ss:$500 sps:$4 sm:$0xff]  }
  0xeb   : > { %6478 = vmatprep.subr.bf16.mxu0 %v13784_v32  ;;  %6519 = vmatprep.subr.bf16.mxu1 %v13787_v33  ;;  %v13872_v32 = vld [vmem:[%s15770_s8 + $0x17b0] ss:$500 sps:$4 sm:$0xff]   ;;  %v13875_v33 = vld [vmem:[%s15770_s8 + $0x17b8] ss:$500 sps:$4 sm:$0xff]  }
  0xee   : > { %6479 = vmatpush1.bf16.msra.mxu0 %v13782_v34  ;;  %6520 = vmatpush1.bf16.msra.mxu1 %v13785_v35  ;;  %v13880_v34 = vld [vmem:[%s15770_s8 + $0x1b9c] ss:$500 sps:$4 sm:$0xff]   ;;  %v13883_v35 = vld [vmem:[%s15770_s8 + $0x1ba4] ss:$500 sps:$4 sm:$0xff]  }
  0xef   : > { %6546 = vmatprep.subr.bf16.mxu0 %v13790_v37  ;;  %6587 = vmatprep.subr.bf16.mxu1 %v13793_v38  ;;  %v13878_v37 = vld [vmem:[%s15770_s8 + $0x1b98] ss:$500 sps:$4 sm:$0xff]   ;;  %v13881_v38 = vld [vmem:[%s15770_s8 + $0x1ba0] ss:$500 sps:$4 sm:$0xff]  }
  0xf1   : > { %6497 = vmatmul.mubr.bf16.vlgmr.msra.gmra.mrb[8].mxu0 %v15820_v36  ;;  %6538 = vmatmul.mubr.bf16.vlgmr.msra.gmra.mrb[8].mxu1 %v15820_v36 }
  0xf2   : > { %6547 = vmatpush1.bf16.msra.mxu0 %v13788_v39  ;;  %6588 = vmatpush1.bf16.msra.mxu1 %v13791_v40  ;;  %v13886_v39 = vld [vmem:[%s15770_s8 + $0x54] ss:$500 sps:$4 sm:$0xff]   ;;  %v13889_v40 = vld [vmem:[%s15770_s8 + $0x5c] ss:$500 sps:$4 sm:$0xff]  }
  0xf3   : > { %6548 = vmatprep.subr.bf16.mxu0 %v13796_v41  ;;  %6589 = vmatprep.subr.bf16.mxu1 %v13799_v42  ;;  %v13884_v41 = vld [vmem:[%s15770_s8 + $0x50] ss:$500 sps:$4 sm:$0xff]   ;;  %v13887_v42 = vld [vmem:[%s15770_s8 + $0x58] ss:$500 sps:$4 sm:$0xff]  }
  0xf4   : > { %6578 = vmatprep.mubr.bf16.mxu0 %v17605_v3  ;;  %6619 = vmatprep.mubr.bf16.mxu1 %v17605_v3 }
  0xf6   : > { %6549 = vmatpush1.bf16.msra.mxu0 %v13794_v43  ;;  %6590 = vmatpush1.bf16.msra.mxu1 %v13797_v44  ;;  %v13892_v43 = vld [vmem:[%s15770_s8 + $0x43c] ss:$500 sps:$4 sm:$0xff]   ;;  %v13895_v44 = vld [vmem:[%s15770_s8 + $0x444] ss:$500 sps:$4 sm:$0xff]  }
  0xf7   : > { %6550 = vmatprep.subr.bf16.mxu0 %v13802_v45  ;;  %6591 = vmatprep.subr.bf16.mxu1 %v13805_v46  ;;  %v13890_v45 = vld [vmem:[%s15770_s8 + $0x438] ss:$500 sps:$4 sm:$0xff]   ;;  %v13893_v46 = vld [vmem:[%s15770_s8 + $0x440] ss:$500 sps:$4 sm:$0xff]  }
  0xfa   : > { %6551 = vmatpush1.bf16.msra.mxu0 %v13800_v47  ;;  %6592 = vmatpush1.bf16.msra.mxu1 %v13803_v48  ;;  %v13898_v47 = vld [vmem:[%s15770_s8 + $0x824] ss:$500 sps:$4 sm:$0xff]   ;;  %v13901_v48 = vld [vmem:[%s15770_s8 + $0x82c] ss:$500 sps:$4 sm:$0xff]  }
  0xfb   : > { %6552 = vmatprep.subr.bf16.mxu0 %v13808_v49  ;;  %6593 = vmatprep.subr.bf16.mxu1 %v13811_v50  ;;  %v13896_v49 = vld [vmem:[%s15770_s8 + $0x820] ss:$500 sps:$4 sm:$0xff]  }
  0xfc   : > { %v13904_v50 = vld [vmem:[%s15770_s8 + $0xc0c] ss:$500 sps:$4 sm:$0xff]  }
  0xfe   : > { %6553 = vmatpush1.bf16.msra.mxu0 %v13806_v51  ;;  %6594 = vmatpush1.bf16.msra.mxu1 %v13809_v52  ;;  %v13907_v51 = vld [vmem:[%s15770_s8 + $0xc14] ss:$500 sps:$4 sm:$0xff]  }
  0xff   : > { %6554 = vmatprep.subr.bf16.mxu0 %v13814_v53  ;;  %6595 = vmatprep.subr.bf16.mxu1 %v13817_v54  ;;  %v13902_v52 = vld [vmem:[%s15770_s8 + $0xc08] ss:$500 sps:$4 sm:$0xff]   ;;  %v13905_v53 = vld [vmem:[%s15770_s8 + $0xc10] ss:$500 sps:$4 sm:$0xff]  }
 0x100   : > { %v13910_v54 = vld [vmem:[%s15770_s8 + $0xff4] ss:$500 sps:$4 sm:$0xff]  }
 0x102   : > { %6555 = vmatpush1.bf16.msra.mxu0 %v13812_v55  ;;  %6596 = vmatpush1.bf16.msra.mxu1 %v13815_v56  ;;  %v13913_v55 = vld [vmem:[%s15770_s8 + $0xffc] ss:$500 sps:$4 sm:$0xff]  }
 0x103   : > { %6556 = vmatprep.subr.bf16.mxu0 %v13820_v57  ;;  %6597 = vmatprep.subr.bf16.mxu1 %v13823_v58  ;;  %v13908_v56 = vld [vmem:[%s15770_s8 + $0xff0] ss:$500 sps:$4 sm:$0xff]   ;;  %v13911_v57 = vld [vmem:[%s15770_s8 + $0xff8] ss:$500 sps:$4 sm:$0xff]  }
 0x104   : > { %v13916_v58 = vld [vmem:[%s15770_s8 + $0x13dc] ss:$500 sps:$4 sm:$0xff]  }
 0x106   : > { %6557 = vmatpush1.bf16.msra.mxu0 %v13818_v59  ;;  %6598 = vmatpush1.bf16.msra.mxu1 %v13821_v60  ;;  %v13919_v59 = vld [vmem:[%s15770_s8 + $0x13e4] ss:$500 sps:$4 sm:$0xff]  }
 0x107   : > { %6558 = vmatprep.subr.bf16.mxu0 %v13826_v61  ;;  %6599 = vmatprep.subr.bf16.mxu1 %v13829_v62  ;;  %v13914_v60 = vld [vmem:[%s15770_s8 + $0x13d8] ss:$500 sps:$4 sm:$0xff]   ;;  %v13917_v61 = vld [vmem:[%s15770_s8 + $0x13e0] ss:$500 sps:$4 sm:$0xff]  }
 0x108   : > { %v13922_v62 = vld [vmem:[%s15770_s8 + $0x17c4] ss:$500 sps:$4 sm:$0xff]  }
 0x10a   : > { %6559 = vmatpush1.bf16.msra.mxu0 %v13824_v63  ;;  %6600 = vmatpush1.bf16.msra.mxu1 %v13827_v0  ;;  %v13925_v63 = vld [vmem:[%s15770_s8 + $0x17cc] ss:$500 sps:$4 sm:$0xff]  }
 0x10b   : > { %6560 = vmatprep.subr.bf16.mxu0 %v13832_v1  ;;  %6601 = vmatprep.subr.bf16.mxu1 %v13835_v2  ;;  %v13920_v0 = vld [vmem:[%s15770_s8 + $0x17c0] ss:$500 sps:$4 sm:$0xff]   ;;  %v13923_v1 = vld [vmem:[%s15770_s8 + $0x17c8] ss:$500 sps:$4 sm:$0xff]  }
 0x10c   : > { %v13928_v2 = vld [vmem:[%s15770_s8 + $0x1bac] ss:$500 sps:$4 sm:$0xff]  }
 0x10e   : > { %6561 = vmatpush1.bf16.msra.mxu0 %v13830_v4  ;;  %6602 = vmatpush1.bf16.msra.mxu1 %v13833_v5  ;;  %v13931_v4 = vld [vmem:[%s15770_s8 + $0x1bb4] ss:$500 sps:$4 sm:$0xff]  }
 0x10f   : > { %6628 = vmatprep.subr.bf16.mxu0 %v13838_v6  ;;  %6669 = vmatprep.subr.bf16.mxu1 %v13841_v7  ;;  %v13926_v5 = vld [vmem:[%s15770_s8 + $0x1ba8] ss:$500 sps:$4 sm:$0xff]   ;;  %v13929_v6 = vld [vmem:[%s15770_s8 + $0x1bb0] ss:$500 sps:$4 sm:$0xff]  }
 0x110   : > { %v13934_v7 = vld [vmem:[%s15770_s8 + $0x64] ss:$500 sps:$4 sm:$0xff]  }
 0x111   : > { %6579 = vmatmul.mubr.bf16.vlgmr.msra.gmra.mrb[12].mxu0 %v15820_v36  ;;  %6620 = vmatmul.mubr.bf16.vlgmr.msra.gmra.mrb[12].mxu1 %v15820_v36 }
 0x112   : > { %6629 = vmatpush1.bf16.msra.mxu0 %v13836_v8  ;;  %6670 = vmatpush1.bf16.msra.mxu1 %v13839_v9  ;;  %v13937_v8 = vld [vmem:[%s15770_s8 + $0x6c] ss:$500 sps:$4 sm:$0xff]  }
 0x113   : > { %6630 = vmatprep.subr.bf16.mxu0 %v13844_v10  ;;  %6671 = vmatprep.subr.bf16.mxu1 %v13847_v11  ;;  %v13932_v9 = vld [vmem:[%s15770_s8 + $0x60] ss:$500 sps:$4 sm:$0xff]   ;;  %v13935_v10 = vld [vmem:[%s15770_s8 + $0x68] ss:$500 sps:$4 sm:$0xff]  }
 0x114   : > { %6660 = vmatprep.mubr.bf16.mxu0 %v17605_v3  ;;  %6701 = vmatprep.mubr.bf16.mxu1 %v17605_v3  ;;  %v13940_v11 = vld [vmem:[%s15770_s8 + $0x44c] ss:$500 sps:$4 sm:$0xff]  }
 0x116   : > { %6631 = vmatpush1.bf16.msra.mxu0 %v13842_v12  ;;  %6672 = vmatpush1.bf16.msra.mxu1 %v13845_v13  ;;  %v13943_v12 = vld [vmem:[%s15770_s8 + $0x454] ss:$500 sps:$4 sm:$0xff]   ;;  %v16006_v13 = vld [vmem:[#allocation2] sm:$0xf] }
 0x117   : > { %6632 = vmatprep.subr.bf16.mxu0 %v13850_v14  ;;  %6673 = vmatprep.subr.bf16.mxu1 %v13853_v15  ;;  %v13938_v14 = vld [vmem:[%s15770_s8 + $0x448] ss:$500 sps:$4 sm:$0xff]   ;;  %v13941_v15 = vld [vmem:[%s15770_s8 + $0x450] ss:$500 sps:$4 sm:$0xff]  }
 0x11a   : > { %6633 = vmatpush1.bf16.msra.mxu0 %v13848_v16  ;;  %6674 = vmatpush1.bf16.msra.mxu1 %v13851_v17  ;;  %v13946_v16 = vld [vmem:[%s15770_s8 + $0x834] ss:$500 sps:$4 sm:$0xff]   ;;  %v13949_v17 = vld [vmem:[%s15770_s8 + $0x83c] ss:$500 sps:$4 sm:$0xff]  }
 0x11b   : > { %6634 = vmatprep.subr.bf16.mxu0 %v13856_v18  ;;  %6675 = vmatprep.subr.bf16.mxu1 %v13859_v19  ;;  %v13944_v18 = vld [vmem:[%s15770_s8 + $0x830] ss:$500 sps:$4 sm:$0xff]   ;;  %v13947_v19 = vld [vmem:[%s15770_s8 + $0x838] ss:$500 sps:$4 sm:$0xff]  }
 0x11e   : > { %6635 = vmatpush1.bf16.msra.mxu0 %v13854_v20  ;;  %6676 = vmatpush1.bf16.msra.mxu1 %v13857_v21  ;;  %v13952_v20 = vld [vmem:[%s15770_s8 + $0xc1c] ss:$500 sps:$4 sm:$0xff]   ;;  %v13955_v21 = vld [vmem:[%s15770_s8 + $0xc24] ss:$500 sps:$4 sm:$0xff]  }
 0x11f   : > { %6636 = vmatprep.subr.bf16.mxu0 %v13862_v22  ;;  %6677 = vmatprep.subr.bf16.mxu1 %v13865_v23  ;;  %v13950_v22 = vld [vmem:[%s15770_s8 + $0xc18] ss:$500 sps:$4 sm:$0xff]   ;;  %v13953_v23 = vld [vmem:[%s15770_s8 + $0xc20] ss:$500 sps:$4 sm:$0xff]  }
 0x122   : > { %6637 = vmatpush1.bf16.msra.mxu0 %v13860_v24  ;;  %6678 = vmatpush1.bf16.msra.mxu1 %v13863_v25  ;;  %v13958_v24 = vld [vmem:[%s15770_s8 + $0x1004] ss:$500 sps:$4 sm:$0xff]   ;;  %v13961_v25 = vld [vmem:[%s15770_s8 + $0x100c] ss:$500 sps:$4 sm:$0xff]  }
 0x123   : > { %6638 = vmatprep.subr.bf16.mxu0 %v13868_v26  ;;  %6679 = vmatprep.subr.bf16.mxu1 %v13871_v27  ;;  %v13956_v26 = vld [vmem:[%s15770_s8 + $0x1000] ss:$500 sps:$4 sm:$0xff]   ;;  %v13959_v27 = vld [vmem:[%s15770_s8 + $0x1008] ss:$500 sps:$4 sm:$0xff]  }
 0x126   : > { %6639 = vmatpush1.bf16.msra.mxu0 %v13866_v28  ;;  %6680 = vmatpush1.bf16.msra.mxu1 %v13869_v29  ;;  %v13964_v28 = vld [vmem:[%s15770_s8 + $0x13ec] ss:$500 sps:$4 sm:$0xff]   ;;  %v13967_v29 = vld [vmem:[%s15770_s8 + $0x13f4] ss:$500 sps:$4 sm:$0xff]  }
 0x127   : > { %6640 = vmatprep.subr.bf16.mxu0 %v13874_v30  ;;  %6681 = vmatprep.subr.bf16.mxu1 %v13877_v31  ;;  %v13962_v30 = vld [vmem:[%s15770_s8 + $0x13e8] ss:$500 sps:$4 sm:$0xff]   ;;  %v13965_v31 = vld [vmem:[%s15770_s8 + $0x13f0] ss:$500 sps:$4 sm:$0xff]  }
 0x12a   : > { %6641 = vmatpush1.bf16.msra.mxu0 %v13872_v32  ;;  %6682 = vmatpush1.bf16.msra.mxu1 %v13875_v33  ;;  %v13970_v32 = vld [vmem:[%s15770_s8 + $0x17d4] ss:$500 sps:$4 sm:$0xff]   ;;  %v13973_v33 = vld [vmem:[%s15770_s8 + $0x17dc] ss:$500 sps:$4 sm:$0xff]  }
 0x12b   : > { %6642 = vmatprep.subr.bf16.mxu0 %v13880_v34  ;;  %6683 = vmatprep.subr.bf16.mxu1 %v13883_v35  ;;  %v13968_v34 = vld [vmem:[%s15770_s8 + $0x17d0] ss:$500 sps:$4 sm:$0xff]   ;;  %v13971_v35 = vld [vmem:[%s15770_s8 + $0x17d8] ss:$500 sps:$4 sm:$0xff]  }
 0x12e   : > { %6643 = vmatpush1.bf16.msra.mxu0 %v13878_v37  ;;  %6684 = vmatpush1.bf16.msra.mxu1 %v13881_v38  ;;  %v13976_v37 = vld [vmem:[%s15770_s8 + $0x1bbc] ss:$500 sps:$4 sm:$0xff]   ;;  %v13979_v38 = vld [vmem:[%s15770_s8 + $0x1bc4] ss:$500 sps:$4 sm:$0xff]  }
 0x12f   : > { %6710 = vmatprep.subr.bf16.mxu0 %v13886_v39  ;;  %6751 = vmatprep.subr.bf16.mxu1 %v13889_v40  ;;  %v13974_v39 = vld [vmem:[%s15770_s8 + $0x1bb8] ss:$500 sps:$4 sm:$0xff]   ;;  %v13977_v40 = vld [vmem:[%s15770_s8 + $0x1bc0] ss:$500 sps:$4 sm:$0xff]  }
 0x131   : > { %6661 = vmatmul.mubr.bf16.vlgmr.msra.gmra.mrb[16].mxu0 %v15820_v36  ;;  %6702 = vmatmul.mubr.bf16.vlgmr.msra.gmra.mrb[16].mxu1 %v15820_v36  ;;  %v13899_v36 = vld [vmem:[%s15770_s8 + $0x828] ss:$500 sps:$4 sm:$0xff]  }
 0x132   : > { %6711 = vmatpush1.bf16.msra.mxu0 %v13884_v41  ;;  %6752 = vmatpush1.bf16.msra.mxu1 %v13887_v42  ;;  %v13982_v41 = vld [vmem:[%s15770_s8 + $0x74] ss:$500 sps:$4 sm:$0xff]   ;;  %v13985_v42 = vld [vmem:[%s15770_s8 + $0x7c] ss:$500 sps:$4 sm:$0xff]  }
 0x133   : > { %6712 = vmatprep.subr.bf16.mxu0 %v13892_v43  ;;  %6753 = vmatprep.subr.bf16.mxu1 %v13895_v44  ;;  %v13980_v43 = vld [vmem:[%s15770_s8 + $0x70] ss:$500 sps:$4 sm:$0xff]   ;;  %v13983_v44 = vld [vmem:[%s15770_s8 + $0x78] ss:$500 sps:$4 sm:$0xff]  }
 0x134   : > { %6742 = vmatprep.mubr.bf16.mxu0 %v17605_v3  ;;  %6783 = vmatprep.mubr.bf16.mxu1 %v17605_v3 }
 0x136   : > { %6713 = vmatpush1.bf16.msra.mxu0 %v13890_v45  ;;  %6754 = vmatpush1.bf16.msra.mxu1 %v13893_v46  ;;  %v13988_v45 = vld [vmem:[%s15770_s8 + $0x45c] ss:$500 sps:$4 sm:$0xff]   ;;  %v13991_v46 = vld [vmem:[%s15770_s8 + $0x464] ss:$500 sps:$4 sm:$0xff]  }
 0x137   : > { %6714 = vmatprep.subr.bf16.mxu0 %v13898_v47  ;;  %6755 = vmatprep.subr.bf16.mxu1 %v13901_v48  ;;  %v13986_v47 = vld [vmem:[%s15770_s8 + $0x458] ss:$500 sps:$4 sm:$0xff]   ;;  %v13989_v48 = vld [vmem:[%s15770_s8 + $0x460] ss:$500 sps:$4 sm:$0xff]  }
 0x13a   : > { %6715 = vmatpush1.bf16.msra.mxu0 %v13896_v49  ;;  %6756 = vmatpush1.bf16.msra.mxu1 %v13899_v36  ;;  %v13994_v49 = vld [vmem:[%s15770_s8 + $0x844] ss:$500 sps:$4 sm:$0xff]   ;;  %v13997_v36 = vld [vmem:[%s15770_s8 + $0x84c] ss:$500 sps:$4 sm:$0xff]  }
 0x13b   : > { %6716 = vmatprep.subr.bf16.mxu0 %v13904_v50  ;;  %6757 = vmatprep.subr.bf16.mxu1 %v13907_v51  ;;  %v13992_v50 = vld [vmem:[%s15770_s8 + $0x840] ss:$500 sps:$4 sm:$0xff]   ;;  %v13995_v51 = vld [vmem:[%s15770_s8 + $0x848] ss:$500 sps:$4 sm:$0xff]  }
 0x13e   : > { %6717 = vmatpush1.bf16.msra.mxu0 %v13902_v52  ;;  %6758 = vmatpush1.bf16.msra.mxu1 %v13905_v53  ;;  %v14000_v52 = vld [vmem:[%s15770_s8 + $0xc2c] ss:$500 sps:$4 sm:$0xff]   ;;  %v14003_v53 = vld [vmem:[%s15770_s8 + $0xc34] ss:$500 sps:$4 sm:$0xff]  }
 0x13f   : > { %6718 = vmatprep.subr.bf16.mxu0 %v13910_v54  ;;  %6759 = vmatprep.subr.bf16.mxu1 %v13913_v55  ;;  %v13998_v54 = vld [vmem:[%s15770_s8 + $0xc28] ss:$500 sps:$4 sm:$0xff]   ;;  %v14001_v55 = vld [vmem:[%s15770_s8 + $0xc30] ss:$500 sps:$4 sm:$0xff]  }
 0x142   : > { %6719 = vmatpush1.bf16.msra.mxu0 %v13908_v56  ;;  %6760 = vmatpush1.bf16.msra.mxu1 %v13911_v57  ;;  %v14006_v56 = vld [vmem:[%s15770_s8 + $0x1014] ss:$500 sps:$4 sm:$0xff]   ;;  %v14009_v57 = vld [vmem:[%s15770_s8 + $0x101c] ss:$500 sps:$4 sm:$0xff]  }
 0x143   : > { %6720 = vmatprep.subr.bf16.mxu0 %v13916_v58  ;;  %6761 = vmatprep.subr.bf16.mxu1 %v13919_v59  ;;  %v14004_v58 = vld [vmem:[%s15770_s8 + $0x1010] ss:$500 sps:$4 sm:$0xff]   ;;  %v14007_v59 = vld [vmem:[%s15770_s8 + $0x1018] ss:$500 sps:$4 sm:$0xff]  }
 0x146   : > { %6721 = vmatpush1.bf16.msra.mxu0 %v13914_v60  ;;  %6762 = vmatpush1.bf16.msra.mxu1 %v13917_v61  ;;  %v14012_v60 = vld [vmem:[%s15770_s8 + $0x13fc] ss:$500 sps:$4 sm:$0xff]   ;;  %v14015_v61 = vld [vmem:[%s15770_s8 + $0x1404] ss:$500 sps:$4 sm:$0xff]  }
 0x147   : > { %6722 = vmatprep.subr.bf16.mxu0 %v13922_v62  ;;  %6763 = vmatprep.subr.bf16.mxu1 %v13925_v63  ;;  %v14010_v62 = vld [vmem:[%s15770_s8 + $0x13f8] ss:$500 sps:$4 sm:$0xff]   ;;  %v14013_v63 = vld [vmem:[%s15770_s8 + $0x1400] ss:$500 sps:$4 sm:$0xff]  }
 0x14a   : > { %6723 = vmatpush1.bf16.msra.mxu0 %v13920_v0  ;;  %6764 = vmatpush1.bf16.msra.mxu1 %v13923_v1  ;;  %v14018_v0 = vld [vmem:[%s15770_s8 + $0x17e4] ss:$500 sps:$4 sm:$0xff]   ;;  %v14021_v1 = vld [vmem:[%s15770_s8 + $0x17ec] ss:$500 sps:$4 sm:$0xff]  }
 0x14b   : > { %6724 = vmatprep.subr.bf16.mxu0 %v13928_v2  ;;  %6765 = vmatprep.subr.bf16.mxu1 %v13931_v4 }
 0x14e   : > { %6725 = vmatpush1.bf16.msra.mxu0 %v13926_v5  ;;  %6766 = vmatpush1.bf16.msra.mxu1 %v13929_v6 }
 0x14f   : > { %6792 = vmatprep.subr.bf16.mxu0 %v13934_v7  ;;  %6833 = vmatprep.subr.bf16.mxu1 %v13937_v8  ;;  %v14016_v7 = vld [vmem:[%s15770_s8 + $0x17e0] ss:$500 sps:$4 sm:$0xff]  }
 0x151   : > { %6743 = vmatmul.mubr.bf16.vlgmr.msra.gmra.mrb[20].mxu0 %v16006_v13  ;;  %6784 = vmatmul.mubr.bf16.vlgmr.msra.gmra.mrb[20].mxu1 %v16006_v13 }
 0x152   : > { %6793 = vmatpush1.bf16.msra.mxu0 %v13932_v9  ;;  %6834 = vmatpush1.bf16.msra.mxu1 %v13935_v10  ;;  %v14019_v9 = vld [vmem:[%s15770_s8 + $0x17e8] ss:$500 sps:$4 sm:$0xff]  }
 0x153   : > { %6794 = vmatprep.subr.bf16.mxu0 %v13940_v11  ;;  %6835 = vmatprep.subr.bf16.mxu1 %v13943_v12  ;;  %v14024_v11 = vld [vmem:[%s15770_s8 + $0x1bcc] ss:$500 sps:$4 sm:$0xff]  }
 0x154   : > { %6824 = vmatprep.mubr.bf16.mxu0 %v17605_v3  ;;  %6865 = vmatprep.mubr.bf16.mxu1 %v17605_v3 }
 0x156   : > { %6795 = vmatpush1.bf16.msra.mxu0 %v13938_v14  ;;  %6836 = vmatpush1.bf16.msra.mxu1 %v13941_v15  ;;  %v14027_v15 = vld [vmem:[%s15770_s8 + $0x1bd4] ss:$500 sps:$4 sm:$0xff]  }
 0x157   : > { %6796 = vmatprep.subr.bf16.mxu0 %v13946_v16  ;;  %6837 = vmatprep.subr.bf16.mxu1 %v13949_v17  ;;  %v14022_v16 = vld [vmem:[%s15770_s8 + $0x1bc8] ss:$500 sps:$4 sm:$0xff]   ;;  %v14025_v17 = vld [vmem:[%s15770_s8 + $0x1bd0] ss:$500 sps:$4 sm:$0xff]  }
 0x15a   : > { %6797 = vmatpush1.bf16.msra.mxu0 %v13944_v18  ;;  %6838 = vmatpush1.bf16.msra.mxu1 %v13947_v19  ;;  %v14030_v18 = vld [vmem:[%s15770_s8 + $0x84] ss:$500 sps:$4 sm:$0xff]   ;;  %v14033_v19 = vld [vmem:[%s15770_s8 + $0x8c] ss:$500 sps:$4 sm:$0xff]  }
 0x15b   : > { %6798 = vmatprep.subr.bf16.mxu0 %v13952_v20  ;;  %6839 = vmatprep.subr.bf16.mxu1 %v13955_v21  ;;  %v14028_v20 = vld [vmem:[%s15770_s8 + $0x80] ss:$500 sps:$4 sm:$0xff]   ;;  %v14031_v21 = vld [vmem:[%s15770_s8 + $0x88] ss:$500 sps:$4 sm:$0xff]  }
 0x15e   : > { %6799 = vmatpush1.bf16.msra.mxu0 %v13950_v22  ;;  %6840 = vmatpush1.bf16.msra.mxu1 %v13953_v23  ;;  %v14036_v22 = vld [vmem:[%s15770_s8 + $0x46c] ss:$500 sps:$4 sm:$0xff]   ;;  %v14039_v23 = vld [vmem:[%s15770_s8 + $0x474] ss:$500 sps:$4 sm:$0xff]  }
 0x15f   : > { %6800 = vmatprep.subr.bf16.mxu0 %v13958_v24  ;;  %6841 = vmatprep.subr.bf16.mxu1 %v13961_v25  ;;  %v14034_v24 = vld [vmem:[%s15770_s8 + $0x468] ss:$500 sps:$4 sm:$0xff]   ;;  %v14037_v25 = vld [vmem:[%s15770_s8 + $0x470] ss:$500 sps:$4 sm:$0xff]  }
 0x162   : > { %6801 = vmatpush1.bf16.msra.mxu0 %v13956_v26  ;;  %6842 = vmatpush1.bf16.msra.mxu1 %v13959_v27  ;;  %v14042_v26 = vld [vmem:[%s15770_s8 + $0x854] ss:$500 sps:$4 sm:$0xff]   ;;  %v14045_v27 = vld [vmem:[%s15770_s8 + $0x85c] ss:$500 sps:$4 sm:$0xff]  }
 0x163   : > { %6802 = vmatprep.subr.bf16.mxu0 %v13964_v28  ;;  %6843 = vmatprep.subr.bf16.mxu1 %v13967_v29  ;;  %v14040_v28 = vld [vmem:[%s15770_s8 + $0x850] ss:$500 sps:$4 sm:$0xff]   ;;  %v14043_v29 = vld [vmem:[%s15770_s8 + $0x858] ss:$500 sps:$4 sm:$0xff]  }
 0x166   : > { %6803 = vmatpush1.bf16.msra.mxu0 %v13962_v30  ;;  %6844 = vmatpush1.bf16.msra.mxu1 %v13965_v31  ;;  %v14048_v30 = vld [vmem:[%s15770_s8 + $0xc3c] ss:$500 sps:$4 sm:$0xff]   ;;  %v14051_v31 = vld [vmem:[%s15770_s8 + $0xc44] ss:$500 sps:$4 sm:$0xff]  }
 0x167   : > { %6804 = vmatprep.subr.bf16.mxu0 %v13970_v32  ;;  %6845 = vmatprep.subr.bf16.mxu1 %v13973_v33  ;;  %v14046_v32 = vld [vmem:[%s15770_s8 + $0xc38] ss:$500 sps:$4 sm:$0xff]   ;;  %v14049_v33 = vld [vmem:[%s15770_s8 + $0xc40] ss:$500 sps:$4 sm:$0xff]  }
 0x16a   : > { %6805 = vmatpush1.bf16.msra.mxu0 %v13968_v34  ;;  %6846 = vmatpush1.bf16.msra.mxu1 %v13971_v35  ;;  %v14054_v34 = vld [vmem:[%s15770_s8 + $0x1024] ss:$500 sps:$4 sm:$0xff]   ;;  %v14057_v35 = vld [vmem:[%s15770_s8 + $0x102c] ss:$500 sps:$4 sm:$0xff]  }
 0x16b   : > { %6806 = vmatprep.subr.bf16.mxu0 %v13976_v37  ;;  %6847 = vmatprep.subr.bf16.mxu1 %v13979_v38  ;;  %v14052_v37 = vld [vmem:[%s15770_s8 + $0x1020] ss:$500 sps:$4 sm:$0xff]   ;;  %v14055_v38 = vld [vmem:[%s15770_s8 + $0x1028] ss:$500 sps:$4 sm:$0xff]  }
 0x16e   : > { %6807 = vmatpush1.bf16.msra.mxu0 %v13974_v39  ;;  %6848 = vmatpush1.bf16.msra.mxu1 %v13977_v40  ;;  %v14060_v39 = vld [vmem:[%s15770_s8 + $0x140c] ss:$500 sps:$4 sm:$0xff]   ;;  %v14063_v40 = vld [vmem:[%s15770_s8 + $0x1414] ss:$500 sps:$4 sm:$0xff]  }
 0x16f   : > { %6874 = vmatprep.subr.bf16.mxu0 %v13982_v41  ;;  %6915 = vmatprep.subr.bf16.mxu1 %v13985_v42  ;;  %v14058_v41 = vld [vmem:[%s15770_s8 + $0x1408] ss:$500 sps:$4 sm:$0xff]   ;;  %v14061_v42 = vld [vmem:[%s15770_s8 + $0x1410] ss:$500 sps:$4 sm:$0xff]  }
 0x171   : > { %6825 = vmatmul.mubr.bf16.vlgmr.msra.gmra.mrb[24].mxu0 %v16006_v13  ;;  %6866 = vmatmul.mubr.bf16.vlgmr.msra.gmra.mrb[24].mxu1 %v16006_v13 }
 0x172   : > { %6875 = vmatpush1.bf16.msra.mxu0 %v13980_v43  ;;  %6916 = vmatpush1.bf16.msra.mxu1 %v13983_v44  ;;  %v14066_v43 = vld [vmem:[%s15770_s8 + $0x17f4] ss:$500 sps:$4 sm:$0xff]   ;;  %v14069_v44 = vld [vmem:[%s15770_s8 + $0x17fc] ss:$500 sps:$4 sm:$0xff]  }
 0x173   : > { %6876 = vmatprep.subr.bf16.mxu0 %v13988_v45  ;;  %6917 = vmatprep.subr.bf16.mxu1 %v13991_v46 }
 0x174   : > { %6906 = vmatprep.mubr.bf16.mxu0 %v17605_v3  ;;  %6947 = vmatprep.mubr.bf16.mxu1 %v17605_v3 }
 0x176   : > { %6877 = vmatpush1.bf16.msra.mxu0 %v13986_v47  ;;  %6918 = vmatpush1.bf16.msra.mxu1 %v13989_v48  ;;  %v14064_v47 = vld [vmem:[%s15770_s8 + $0x17f0] ss:$500 sps:$4 sm:$0xff]   ;;  %v14067_v48 = vld [vmem:[%s15770_s8 + $0x17f8] ss:$500 sps:$4 sm:$0xff]  }
 0x177   : > { %6878 = vmatprep.subr.bf16.mxu0 %v13994_v49  ;;  %6919 = vmatprep.subr.bf16.mxu1 %v13997_v36 }
 0x17a   : > { %6879 = vmatpush1.bf16.msra.mxu0 %v13992_v50  ;;  %6920 = vmatpush1.bf16.msra.mxu1 %v13995_v51 }
 0x17b   : > { %6880 = vmatprep.subr.bf16.mxu0 %v14000_v52  ;;  %6921 = vmatprep.subr.bf16.mxu1 %v14003_v53 }
 0x17e   : > { %6881 = vmatpush1.bf16.msra.mxu0 %v13998_v54  ;;  %6922 = vmatpush1.bf16.msra.mxu1 %v14001_v55  ;;  %v14072_v54 = vld [vmem:[%s15770_s8 + $0x1bdc] ss:$500 sps:$4 sm:$0xff]   ;;  %v14075_v55 = vld [vmem:[%s15770_s8 + $0x1be4] ss:$500 sps:$4 sm:$0xff]  }
 0x17f   : > { %6882 = vmatprep.subr.bf16.mxu0 %v14006_v56  ;;  %6923 = vmatprep.subr.bf16.mxu1 %v14009_v57  ;;  %v14070_v56 = vld [vmem:[%s15770_s8 + $0x1bd8] ss:$500 sps:$4 sm:$0xff]   ;;  %v14073_v57 = vld [vmem:[%s15770_s8 + $0x1be0] ss:$500 sps:$4 sm:$0xff]  }
 0x182   : > { %6883 = vmatpush1.bf16.msra.mxu0 %v14004_v58  ;;  %6924 = vmatpush1.bf16.msra.mxu1 %v14007_v59  ;;  %v14078_v58 = vld [vmem:[%s15770_s8 + $0x94] ss:$500 sps:$4 sm:$0xff]   ;;  %v14081_v59 = vld [vmem:[%s15770_s8 + $0x9c] ss:$500 sps:$4 sm:$0xff]  }
 0x183   : > { %6884 = vmatprep.subr.bf16.mxu0 %v14012_v60  ;;  %6925 = vmatprep.subr.bf16.mxu1 %v14015_v61  ;;  %v14076_v60 = vld [vmem:[%s15770_s8 + $0x90] ss:$500 sps:$4 sm:$0xff]   ;;  %v14079_v61 = vld [vmem:[%s15770_s8 + $0x98] ss:$500 sps:$4 sm:$0xff]  }
 0x184   : > { %v16068_v2 = vpop.f32.mrb[0].mxu0  ;;  %v16070_v4 = vpop.f32.mrb[0].mxu1 }
 0x185   : > { %v16072_v5 = vpop.f32.mrb[1].mxu0  ;;  %v16074_v6 = vpop.f32.mrb[1].mxu1 }
 0x186   : > { %v6338_v8 = vpop.f32.mrb[2].mxu0  ;;  %6885 = vmatpush1.bf16.msra.mxu0 %v14010_v62  ;;  %6926 = vmatpush1.bf16.msra.mxu1 %v14013_v63  ;;  %v6379_v10 = vpop.f32.mrb[2].mxu1  ;;  %v14084_v62 = vld [vmem:[%s15770_s8 + $0x47c] ss:$500 sps:$4 sm:$0xff]   ;;  %v14087_v63 = vld [vmem:[%s15770_s8 + $0x484] ss:$500 sps:$4 sm:$0xff]  }
 0x187   : > { %v6339_v12 = vpop.f32.mrb[3].mxu0  ;;  %6886 = vmatprep.subr.bf16.mxu0 %v14018_v0  ;;  %6927 = vmatprep.subr.bf16.mxu1 %v14021_v1  ;;  %v6380_v14 = vpop.f32.mrb[3].mxu1  ;;  %v14082_v0 = vld [vmem:[%s15770_s8 + $0x478] ss:$500 sps:$4 sm:$0xff]   ;;  %v14085_v1 = vld [vmem:[%s15770_s8 + $0x480] ss:$500 sps:$4 sm:$0xff]  }
 0x188   : > { %v14093_v8 = vld [vmem:[%s15770_s8 + $0x86c] ss:$500 sps:$4 sm:$0xff]   ;;  %v14094_v12 = vld [vmem:[%s15770_s8 + $0xc48] ss:$500 sps:$4 sm:$0xff]   ;;  %v14097_v14 = vld [vmem:[%s15770_s8 + $0xc50] ss:$500 sps:$4 sm:$0xff]  }
 0x189   : > { %v14096_v10 = vld [vmem:[%s15770_s8 + $0xc4c] ss:$500 sps:$4 sm:$0xff]  }
 0x18a   : > { %6887 = vmatpush1.bf16.msra.mxu0 %v14016_v7  ;;  %6928 = vmatpush1.bf16.msra.mxu1 %v14019_v9  ;;  %v14090_v7 = vld [vmem:[%s15770_s8 + $0x864] ss:$500 sps:$4 sm:$0xff]   ;;  %v14091_v9 = vld [vmem:[%s15770_s8 + $0x868] ss:$500 sps:$4 sm:$0xff]  }
 0x18b   : > { %6888 = vmatprep.subr.bf16.mxu0 %v14024_v11  ;;  %6929 = vmatprep.subr.bf16.mxu1 %v14027_v15  ;;  %v14099_v11 = vld [vmem:[%s15770_s8 + $0xc54] ss:$500 sps:$4 sm:$0xff]  }
 0x18c   : > { %v14102_v15 = vld [vmem:[%s15770_s8 + $0x1034] ss:$500 sps:$4 sm:$0xff]  }
 0x18e   : > { %6889 = vmatpush1.bf16.msra.mxu0 %v14022_v16  ;;  %6930 = vmatpush1.bf16.msra.mxu1 %v14025_v17  ;;  %v14105_v16 = vld [vmem:[%s15770_s8 + $0x103c] ss:$500 sps:$4 sm:$0xff]  }
 0x18f   : > { %6956 = vmatprep.subr.bf16.mxu0 %v14030_v18  ;;  %6997 = vmatprep.subr.bf16.mxu1 %v14033_v19  ;;  %v14100_v17 = vld [vmem:[%s15770_s8 + $0x1030] ss:$500 sps:$4 sm:$0xff]   ;;  %v14103_v18 = vld [vmem:[%s15770_s8 + $0x1038] ss:$500 sps:$4 sm:$0xff]  }
 0x190   : > { %v14108_v19 = vld [vmem:[%s15770_s8 + $0x141c] ss:$500 sps:$4 sm:$0xff]  }
 0x191   : > { %6907 = vmatmul.mubr.bf16.vlgmr.msra.gmra.mrb[28].mxu0 %v16006_v13  ;;  %6948 = vmatmul.mubr.bf16.vlgmr.msra.gmra.mrb[28].mxu1 %v16006_v13 }
 0x192   : > { %6957 = vmatpush1.bf16.msra.mxu0 %v14028_v20  ;;  %6998 = vmatpush1.bf16.msra.mxu1 %v14031_v21  ;;  %v14111_v20 = vld [vmem:[%s15770_s8 + $0x1424] ss:$500 sps:$4 sm:$0xff]  }
 0x193   : > { %6958 = vmatprep.subr.bf16.mxu0 %v14036_v22  ;;  %6999 = vmatprep.subr.bf16.mxu1 %v14039_v23  ;;  %v14106_v21 = vld [vmem:[%s15770_s8 + $0x1418] ss:$500 sps:$4 sm:$0xff]   ;;  %v14109_v22 = vld [vmem:[%s15770_s8 + $0x1420] ss:$500 sps:$4 sm:$0xff]  }
 0x194   : > { %6988 = vmatprep.mubr.bf16.mxu0 %v17605_v3  ;;  %7029 = vmatprep.mubr.bf16.mxu1 %v17605_v3  ;;  %v14114_v23 = vld [vmem:[%s15770_s8 + $0x1804] ss:$500 sps:$4 sm:$0xff]  }
 0x196   : > { %6959 = vmatpush1.bf16.msra.mxu0 %v14034_v24  ;;  %7000 = vmatpush1.bf16.msra.mxu1 %v14037_v25  ;;  %v14117_v24 = vld [vmem:[%s15770_s8 + $0x180c] ss:$500 sps:$4 sm:$0xff]  }
 0x197   : > { %6960 = vmatprep.subr.bf16.mxu0 %v14042_v26  ;;  %7001 = vmatprep.subr.bf16.mxu1 %v14045_v27  ;;  %v14112_v27 = vld [vmem:[%s15770_s8 + $0x1800] ss:$500 sps:$4 sm:$0xff]  }
 0x19a   : > { %6961 = vmatpush1.bf16.msra.mxu0 %v14040_v28  ;;  %7002 = vmatpush1.bf16.msra.mxu1 %v14043_v29  ;;  %v14115_v28 = vld [vmem:[%s15770_s8 + $0x1808] ss:$500 sps:$4 sm:$0xff]  }
 0x19b   : > { %6962 = vmatprep.subr.bf16.mxu0 %v14048_v30  ;;  %7003 = vmatprep.subr.bf16.mxu1 %v14051_v31 }
 0x19e   : > { %6963 = vmatpush1.bf16.msra.mxu0 %v14046_v32  ;;  %7004 = vmatpush1.bf16.msra.mxu1 %v14049_v33 }
 0x19f   : > { %6964 = vmatprep.subr.bf16.mxu0 %v14054_v34  ;;  %7005 = vmatprep.subr.bf16.mxu1 %v14057_v35  ;;  %v14120_v35 = vld [vmem:[%s15770_s8 + $0x1bec] ss:$500 sps:$4 sm:$0xff]  }
 0x1a2   : > { %6965 = vmatpush1.bf16.msra.mxu0 %v14052_v37  ;;  %7006 = vmatpush1.bf16.msra.mxu1 %v14055_v38  ;;  %v14123_v37 = vld [vmem:[%s15770_s8 + $0x1bf4] ss:$500 sps:$4 sm:$0xff]  }
 0x1a3   : > { %6966 = vmatprep.subr.bf16.mxu0 %v14060_v39  ;;  %7007 = vmatprep.subr.bf16.mxu1 %v14063_v40  ;;  %v14118_v38 = vld [vmem:[%s15770_s8 + $0x1be8] ss:$500 sps:$4 sm:$0xff]   ;;  %v14121_v39 = vld [vmem:[%s15770_s8 + $0x1bf0] ss:$500 sps:$4 sm:$0xff]  }
 0x1a4   : > { %v16112_v45 = vpop.f32.mrb[4].mxu0  ;;  %v16114_v46 = vpop.f32.mrb[4].mxu1  ;;  %v14126_v40 = vld [vmem:[%s15770_s8 + $0xa4] ss:$500 sps:$4 sm:$0xff]  }
 0x1a5   : > { %v16118_v49 = vpop.f32.mrb[5].mxu0  ;;  %v16120_v36 = vpop.f32.mrb[5].mxu1 }
 0x1a6   : > { %v6420_v50 = vpop.f32.mrb[6].mxu0  ;;  %6967 = vmatpush1.bf16.msra.mxu0 %v14058_v41  ;;  %7008 = vmatpush1.bf16.msra.mxu1 %v14061_v42  ;;  %v6461_v51 = vpop.f32.mrb[6].mxu1  ;;  %v14129_v41 = vld [vmem:[%s15770_s8 + $0xac] ss:$500 sps:$4 sm:$0xff]  }
 0x1a7   : > { %v6421_v52 = vpop.f32.mrb[7].mxu0  ;;  %6968 = vmatprep.subr.bf16.mxu0 %v14066_v43  ;;  %7009 = vmatprep.subr.bf16.mxu1 %v14069_v44  ;;  %v6462_v53 = vpop.f32.mrb[7].mxu1  ;;  %v14124_v42 = vld [vmem:[%s15770_s8 + $0xa0] ss:$500 sps:$4 sm:$0xff]   ;;  %v14127_v43 = vld [vmem:[%s15770_s8 + $0xa8] ss:$500 sps:$4 sm:$0xff]  }
 0x1a8   : > { %v14132_v44 = vld [vmem:[%s15770_s8 + $0x48c] ss:$500 sps:$4 sm:$0xff]   ;;  %v14130_v50 = vld [vmem:[%s15770_s8 + $0x488] ss:$500 sps:$4 sm:$0xff]   ;;  %v14133_v51 = vld [vmem:[%s15770_s8 + $0x490] ss:$500 sps:$4 sm:$0xff]  }
 0x1a9   : > { %v14138_v52 = vld [vmem:[%s15770_s8 + $0x874] ss:$500 sps:$4 sm:$0xff]   ;;  %v14141_v53 = vld [vmem:[%s15770_s8 + $0x87c] ss:$500 sps:$4 sm:$0xff]  }
 0x1aa   : > { %6969 = vmatpush1.bf16.msra.mxu0 %v14064_v47  ;;  %7010 = vmatpush1.bf16.msra.mxu1 %v14067_v48  ;;  %v14135_v47 = vld [vmem:[%s15770_s8 + $0x494] ss:$500 sps:$4 sm:$0xff]   ;;  %v16176_v48 = vld [vmem:[#allocation2] sm:$0xf] }
 0x1ab   : > { %6970 = vmatprep.subr.bf16.mxu0 %v14072_v54  ;;  %7011 = vmatprep.subr.bf16.mxu1 %v14075_v55  ;;  %v14136_v54 = vld [vmem:[%s15770_s8 + $0x870] ss:$500 sps:$4 sm:$0xff]   ;;  %v14139_v55 = vld [vmem:[%s15770_s8 + $0x878] ss:$500 sps:$4 sm:$0xff]  }
 0x1ae   : > { %6971 = vmatpush1.bf16.msra.mxu0 %v14070_v56  ;;  %7012 = vmatpush1.bf16.msra.mxu1 %v14073_v57  ;;  %v14144_v56 = vld [vmem:[%s15770_s8 + $0xc5c] ss:$500 sps:$4 sm:$0xff]   ;;  %v14147_v57 = vld [vmem:[%s15770_s8 + $0xc64] ss:$500 sps:$4 sm:$0xff]  }
 0x1af   : > { %7038 = vmatprep.subr.bf16.mxu0 %v14078_v58  ;;  %7079 = vmatprep.subr.bf16.mxu1 %v14081_v59  ;;  %v14142_v58 = vld [vmem:[%s15770_s8 + $0xc58] ss:$500 sps:$4 sm:$0xff]   ;;  %v14145_v59 = vld [vmem:[%s15770_s8 + $0xc60] ss:$500 sps:$4 sm:$0xff]  }
 0x1b1   : > { %6989 = vmatmul.mubr.bf16.vlgmr.msra.gmra.mrb[32].mxu0 %v16006_v13  ;;  %7030 = vmatmul.mubr.bf16.vlgmr.msra.gmra.mrb[32].mxu1 %v16006_v13  ;;  %v14088_v13 = vld [vmem:[%s15770_s8 + $0x860] ss:$500 sps:$4 sm:$0xff]  }
 0x1b2   : > { %7039 = vmatpush1.bf16.msra.mxu0 %v14076_v60  ;;  %7080 = vmatpush1.bf16.msra.mxu1 %v14079_v61  ;;  %v14150_v60 = vld [vmem:[%s15770_s8 + $0x1044] ss:$500 sps:$4 sm:$0xff]   ;;  %v14153_v61 = vld [vmem:[%s15770_s8 + $0x104c] ss:$500 sps:$4 sm:$0xff]  }
 0x1b3   : > { %7040 = vmatprep.subr.bf16.mxu0 %v14084_v62  ;;  %7081 = vmatprep.subr.bf16.mxu1 %v14087_v63  ;;  %v14148_v62 = vld [vmem:[%s15770_s8 + $0x1040] ss:$500 sps:$4 sm:$0xff]   ;;  %v14151_v63 = vld [vmem:[%s15770_s8 + $0x1048] ss:$500 sps:$4 sm:$0xff]  }
 0x1b4   : > { %7070 = vmatprep.mubr.bf16.mxu0 %v17605_v3  ;;  %7111 = vmatprep.mubr.bf16.mxu1 %v17605_v3 }
 0x1b6   : > { %7041 = vmatpush1.bf16.msra.mxu0 %v14082_v0  ;;  %7082 = vmatpush1.bf16.msra.mxu1 %v14085_v1  ;;  %v14156_v0 = vld [vmem:[%s15770_s8 + $0x142c] ss:$500 sps:$4 sm:$0xff]   ;;  %v14159_v1 = vld [vmem:[%s15770_s8 + $0x1434] ss:$500 sps:$4 sm:$0xff]  }
 0x1b7   : > { %7042 = vmatprep.subr.bf16.mxu0 %v14090_v7  ;;  %7083 = vmatprep.subr.bf16.mxu1 %v14093_v8  ;;  %v14154_v7 = vld [vmem:[%s15770_s8 + $0x1428] ss:$500 sps:$4 sm:$0xff]   ;;  %v14157_v8 = vld [vmem:[%s15770_s8 + $0x1430] ss:$500 sps:$4 sm:$0xff]  }
 0x1ba   : > { %7043 = vmatpush1.bf16.msra.mxu0 %v14088_v13  ;;  %7084 = vmatpush1.bf16.msra.mxu1 %v14091_v9  ;;  %v14162_v13 = vld [vmem:[%s15770_s8 + $0x1814] ss:$500 sps:$4 sm:$0xff]   ;;  %v14165_v9 = vld [vmem:[%s15770_s8 + $0x181c] ss:$500 sps:$4 sm:$0xff]  }
 0x1bb   : > { %7044 = vmatprep.subr.bf16.mxu0 %v14096_v10  ;;  %7085 = vmatprep.subr.bf16.mxu1 %v14099_v11 }
 0x1be   : > { %7045 = vmatpush1.bf16.msra.mxu0 %v14094_v12  ;;  %7086 = vmatpush1.bf16.msra.mxu1 %v14097_v14  ;;  %v14160_v12 = vld [vmem:[%s15770_s8 + $0x1810] ss:$500 sps:$4 sm:$0xff]   ;;  %v14163_v14 = vld [vmem:[%s15770_s8 + $0x1818] ss:$500 sps:$4 sm:$0xff]  }
 0x1bf   : > { %7046 = vmatprep.subr.bf16.mxu0 %v14102_v15  ;;  %7087 = vmatprep.subr.bf16.mxu1 %v14105_v16 }
 0x1c2   : > { %7047 = vmatpush1.bf16.msra.mxu0 %v14100_v17  ;;  %7088 = vmatpush1.bf16.msra.mxu1 %v14103_v18 }
 0x1c3   : > { %7048 = vmatprep.subr.bf16.mxu0 %v14108_v19  ;;  %7089 = vmatprep.subr.bf16.mxu1 %v14111_v20 }
 0x1c4   : > { %v16156_v25 = vpop.f32.mrb[8].mxu0  ;;  %v16158_v26 = vpop.f32.mrb[8].mxu1 }
 0x1c5   : > { %v16162_v29 = vpop.f32.mrb[9].mxu0  ;;  %v16164_v30 = vpop.f32.mrb[9].mxu1 }
 0x1c6   : > { %v6502_v31 = vpop.f32.mrb[10].mxu0  ;;  %7049 = vmatpush1.bf16.msra.mxu0 %v14106_v21  ;;  %7090 = vmatpush1.bf16.msra.mxu1 %v14109_v22  ;;  %v6543_v32 = vpop.f32.mrb[10].mxu1  ;;  %v14168_v21 = vld [vmem:[%s15770_s8 + $0x1bfc] ss:$500 sps:$4 sm:$0xff]   ;;  %v14171_v22 = vld [vmem:[%s15770_s8 + $0x1c04] ss:$500 sps:$4 sm:$0xff]  }
 0x1c7   : > { %v6503_v33 = vpop.f32.mrb[11].mxu0  ;;  %7050 = vmatprep.subr.bf16.mxu0 %v14114_v23  ;;  %7091 = vmatprep.subr.bf16.mxu1 %v14117_v24  ;;  %v6544_v34 = vpop.f32.mrb[11].mxu1  ;;  %v14166_v23 = vld [vmem:[%s15770_s8 + $0x1bf8] ss:$500 sps:$4 sm:$0xff]   ;;  %v14169_v24 = vld [vmem:[%s15770_s8 + $0x1c00] ss:$500 sps:$4 sm:$0xff]  }
 0x1c8   : > { %v14172_v31 = vld [vmem:[%s15770_s8 + $0xb0] ss:$500 sps:$4 sm:$0xff]   ;;  %v14175_v32 = vld [vmem:[%s15770_s8 + $0xb8] ss:$500 sps:$4 sm:$0xff]  }
 0x1c9   : > { %v14180_v33 = vld [vmem:[%s15770_s8 + $0x49c] ss:$500 sps:$4 sm:$0xff]   ;;  %v14183_v34 = vld [vmem:[%s15770_s8 + $0x4a4] ss:$500 sps:$4 sm:$0xff]  }
 0x1ca   : > { %7051 = vmatpush1.bf16.msra.mxu0 %v14112_v27  ;;  %7092 = vmatpush1.bf16.msra.mxu1 %v14115_v28  ;;  %v14174_v27 = vld [vmem:[%s15770_s8 + $0xb4] ss:$500 sps:$4 sm:$0xff]   ;;  %v14177_v28 = vld [vmem:[%s15770_s8 + $0xbc] ss:$500 sps:$4 sm:$0xff]  }
 0x1cb   : > { %7052 = vmatprep.subr.bf16.mxu0 %v14120_v35  ;;  %7093 = vmatprep.subr.bf16.mxu1 %v14123_v37  ;;  %v14178_v35 = vld [vmem:[%s15770_s8 + $0x498] ss:$500 sps:$4 sm:$0xff]   ;;  %v14181_v37 = vld [vmem:[%s15770_s8 + $0x4a0] ss:$500 sps:$4 sm:$0xff]  }
 0x1ce   : > { %7053 = vmatpush1.bf16.msra.mxu0 %v14118_v38  ;;  %7094 = vmatpush1.bf16.msra.mxu1 %v14121_v39  ;;  %v14186_v38 = vld [vmem:[%s15770_s8 + $0x884] ss:$500 sps:$4 sm:$0xff]   ;;  %v14189_v39 = vld [vmem:[%s15770_s8 + $0x88c] ss:$500 sps:$4 sm:$0xff]  }
 0x1cf   : > { %7120 = vmatprep.subr.bf16.mxu0 %v14126_v40  ;;  %7161 = vmatprep.subr.bf16.mxu1 %v14129_v41  ;;  %v14184_v40 = vld [vmem:[%s15770_s8 + $0x880] ss:$500 sps:$4 sm:$0xff]   ;;  %v14187_v41 = vld [vmem:[%s15770_s8 + $0x888] ss:$500 sps:$4 sm:$0xff]  }
 0x1d1   : > { %7071 = vmatmul.mubr.bf16.vlgmr.msra.gmra.mrb[36].mxu0 %v16176_v48  ;;  %7112 = vmatmul.mubr.bf16.vlgmr.msra.gmra.mrb[36].mxu1 %v16176_v48 }
 0x1d2   : > { %7121 = vmatpush1.bf16.msra.mxu0 %v14124_v42  ;;  %7162 = vmatpush1.bf16.msra.mxu1 %v14127_v43  ;;  %v14192_v42 = vld [vmem:[%s15770_s8 + $0xc6c] ss:$500 sps:$4 sm:$0xff]   ;;  %v14195_v43 = vld [vmem:[%s15770_s8 + $0xc74] ss:$500 sps:$4 sm:$0xff]  }
 0x1d3   : > { %7122 = vmatprep.subr.bf16.mxu0 %v14132_v44  ;;  %7163 = vmatprep.subr.bf16.mxu1 %v14135_v47  ;;  %v14190_v44 = vld [vmem:[%s15770_s8 + $0xc68] ss:$500 sps:$4 sm:$0xff]   ;;  %v14193_v47 = vld [vmem:[%s15770_s8 + $0xc70] ss:$500 sps:$4 sm:$0xff]  }
 0x1d4   : > { %7152 = vmatprep.mubr.bf16.mxu0 %v17605_v3  ;;  %7193 = vmatprep.mubr.bf16.mxu1 %v17605_v3 }
 0x1d6   : > { %7123 = vmatpush1.bf16.msra.mxu0 %v14130_v50  ;;  %7164 = vmatpush1.bf16.msra.mxu1 %v14133_v51  ;;  %v14198_v50 = vld [vmem:[%s15770_s8 + $0x1054] ss:$500 sps:$4 sm:$0xff]   ;;  %v14201_v51 = vld [vmem:[%s15770_s8 + $0x105c] ss:$500 sps:$4 sm:$0xff]  }
 0x1d7   : > { %7124 = vmatprep.subr.bf16.mxu0 %v14138_v52  ;;  %7165 = vmatprep.subr.bf16.mxu1 %v14141_v53  ;;  %v14196_v52 = vld [vmem:[%s15770_s8 + $0x1050] ss:$500 sps:$4 sm:$0xff]   ;;  %v14199_v53 = vld [vmem:[%s15770_s8 + $0x1058] ss:$500 sps:$4 sm:$0xff]  }
 0x1da   : > { %7125 = vmatpush1.bf16.msra.mxu0 %v14136_v54  ;;  %7166 = vmatpush1.bf16.msra.mxu1 %v14139_v55  ;;  %v14204_v54 = vld [vmem:[%s15770_s8 + $0x143c] ss:$500 sps:$4 sm:$0xff]   ;;  %v14207_v55 = vld [vmem:[%s15770_s8 + $0x1444] ss:$500 sps:$4 sm:$0xff]  }
 0x1db   : > { %7126 = vmatprep.subr.bf16.mxu0 %v14144_v56  ;;  %7167 = vmatprep.subr.bf16.mxu1 %v14147_v57  ;;  %v14202_v56 = vld [vmem:[%s15770_s8 + $0x1438] ss:$500 sps:$4 sm:$0xff]   ;;  %v14205_v57 = vld [vmem:[%s15770_s8 + $0x1440] ss:$500 sps:$4 sm:$0xff]  }
 0x1de   : > { %7127 = vmatpush1.bf16.msra.mxu0 %v14142_v58  ;;  %7168 = vmatpush1.bf16.msra.mxu1 %v14145_v59  ;;  %v14210_v58 = vld [vmem:[%s15770_s8 + $0x1824] ss:$500 sps:$4 sm:$0xff]   ;;  %v14213_v59 = vld [vmem:[%s15770_s8 + $0x182c] ss:$500 sps:$4 sm:$0xff]  }
 0x1df   : > { %7128 = vmatprep.subr.bf16.mxu0 %v14150_v60  ;;  %7169 = vmatprep.subr.bf16.mxu1 %v14153_v61 }
 0x1e2   : > { %7129 = vmatpush1.bf16.msra.mxu0 %v14148_v62  ;;  %7170 = vmatpush1.bf16.msra.mxu1 %v14151_v63  ;;  %v14208_v62 = vld [vmem:[%s15770_s8 + $0x1820] ss:$500 sps:$4 sm:$0xff]   ;;  %v14211_v63 = vld [vmem:[%s15770_s8 + $0x1828] ss:$500 sps:$4 sm:$0xff]  }
 0x1e3   : > { %7130 = vmatprep.subr.bf16.mxu0 %v14156_v0  ;;  %7171 = vmatprep.subr.bf16.mxu1 %v14159_v1 }
 0x1e4   : > { %v16202_v10 = vpop.f32.mrb[12].mxu0  ;;  %v16204_v11 = vpop.f32.mrb[12].mxu1 }
 0x1e5   : > { %v16208_v15 = vpop.f32.mrb[13].mxu0  ;;  %v16210_v16 = vpop.f32.mrb[13].mxu1 }
 0x1e6   : > { %v6584_v17 = vpop.f32.mrb[14].mxu0  ;;  %7131 = vmatpush1.bf16.msra.mxu0 %v14154_v7  ;;  %7172 = vmatpush1.bf16.msra.mxu1 %v14157_v8  ;;  %v6625_v18 = vpop.f32.mrb[14].mxu1 }
 0x1e7   : > { %v6585_v19 = vpop.f32.mrb[15].mxu0  ;;  %7132 = vmatprep.subr.bf16.mxu0 %v14162_v13  ;;  %7173 = vmatprep.subr.bf16.mxu1 %v14165_v9  ;;  %v6626_v20 = vpop.f32.mrb[15].mxu1  ;;  %v14214_v17 = vld [vmem:[%s15770_s8 + $0x1c08] ss:$500 sps:$4 sm:$0xff]   ;;  %v14217_v18 = vld [vmem:[%s15770_s8 + $0x1c10] ss:$500 sps:$4 sm:$0xff]  }
 0x1e8   : > { %v14222_v19 = vld [vmem:[%s15770_s8 + $0xc4] ss:$500 sps:$4 sm:$0xff]   ;;  %v14225_v20 = vld [vmem:[%s15770_s8 + $0xcc] ss:$500 sps:$4 sm:$0xff]  }
 0x1ea   : > { %7133 = vmatpush1.bf16.msra.mxu0 %v14160_v12  ;;  %7174 = vmatpush1.bf16.msra.mxu1 %v14163_v14  ;;  %v14216_v12 = vld [vmem:[%s15770_s8 + $0x1c0c] ss:$500 sps:$4 sm:$0xff]   ;;  %v14219_v14 = vld [vmem:[%s15770_s8 + $0x1c14] ss:$500 sps:$4 sm:$0xff]  }
 0x1eb   : > { %7134 = vmatprep.subr.bf16.mxu0 %v14168_v21  ;;  %7175 = vmatprep.subr.bf16.mxu1 %v14171_v22  ;;  %v14220_v21 = vld [vmem:[%s15770_s8 + $0xc0] ss:$500 sps:$4 sm:$0xff]   ;;  %v14223_v22 = vld [vmem:[%s15770_s8 + $0xc8] ss:$500 sps:$4 sm:$0xff]  }
 0x1ee   : > { %7135 = vmatpush1.bf16.msra.mxu0 %v14166_v23  ;;  %7176 = vmatpush1.bf16.msra.mxu1 %v14169_v24  ;;  %v14228_v23 = vld [vmem:[%s15770_s8 + $0x4ac] ss:$500 sps:$4 sm:$0xff]   ;;  %v14231_v24 = vld [vmem:[%s15770_s8 + $0x4b4] ss:$500 sps:$4 sm:$0xff]  }
 0x1ef   : > { %7202 = vmatprep.subr.bf16.mxu0 %v14174_v27  ;;  %7243 = vmatprep.subr.bf16.mxu1 %v14177_v28  ;;  %v14226_v27 = vld [vmem:[%s15770_s8 + $0x4a8] ss:$500 sps:$4 sm:$0xff]   ;;  %v14229_v28 = vld [vmem:[%s15770_s8 + $0x4b0] ss:$500 sps:$4 sm:$0xff]  }
 0x1f1   : > { %7153 = vmatmul.mubr.bf16.vlgmr.msra.gmra.mrb[40].mxu0 %v16176_v48  ;;  %7194 = vmatmul.mubr.bf16.vlgmr.msra.gmra.mrb[40].mxu1 %v16176_v48 }
 0x1f2   : > { %7203 = vmatpush1.bf16.msra.mxu0 %v14172_v31  ;;  %7244 = vmatpush1.bf16.msra.mxu1 %v14175_v32  ;;  %v14234_v31 = vld [vmem:[%s15770_s8 + $0x894] ss:$500 sps:$4 sm:$0xff]   ;;  %v14237_v32 = vld [vmem:[%s15770_s8 + $0x89c] ss:$500 sps:$4 sm:$0xff]  }
 0x1f3   : > { %7204 = vmatprep.subr.bf16.mxu0 %v14180_v33  ;;  %7245 = vmatprep.subr.bf16.mxu1 %v14183_v34  ;;  %v14232_v33 = vld [vmem:[%s15770_s8 + $0x890] ss:$500 sps:$4 sm:$0xff]   ;;  %v14235_v34 = vld [vmem:[%s15770_s8 + $0x898] ss:$500 sps:$4 sm:$0xff]  }
 0x1f4   : > { %7234 = vmatprep.mubr.bf16.mxu0 %v17605_v3  ;;  %7275 = vmatprep.mubr.bf16.mxu1 %v17605_v3 }
 0x1f6   : > { %7205 = vmatpush1.bf16.msra.mxu0 %v14178_v35  ;;  %7246 = vmatpush1.bf16.msra.mxu1 %v14181_v37  ;;  %v14240_v35 = vld [vmem:[%s15770_s8 + $0xc7c] ss:$500 sps:$4 sm:$0xff]   ;;  %v14243_v37 = vld [vmem:[%s15770_s8 + $0xc84] ss:$500 sps:$4 sm:$0xff]  }
 0x1f7   : > { %7206 = vmatprep.subr.bf16.mxu0 %v14186_v38  ;;  %7247 = vmatprep.subr.bf16.mxu1 %v14189_v39  ;;  %v14238_v38 = vld [vmem:[%s15770_s8 + $0xc78] ss:$500 sps:$4 sm:$0xff]   ;;  %v14241_v39 = vld [vmem:[%s15770_s8 + $0xc80] ss:$500 sps:$4 sm:$0xff]  }
 0x1fa   : > { %7207 = vmatpush1.bf16.msra.mxu0 %v14184_v40  ;;  %7248 = vmatpush1.bf16.msra.mxu1 %v14187_v41  ;;  %v14246_v40 = vld [vmem:[%s15770_s8 + $0x1064] ss:$500 sps:$4 sm:$0xff]   ;;  %v14249_v41 = vld [vmem:[%s15770_s8 + $0x106c] ss:$500 sps:$4 sm:$0xff]  }
 0x1fb   : > { %7208 = vmatprep.subr.bf16.mxu0 %v14192_v42  ;;  %7249 = vmatprep.subr.bf16.mxu1 %v14195_v43  ;;  %v14244_v42 = vld [vmem:[%s15770_s8 + $0x1060] ss:$500 sps:$4 sm:$0xff]   ;;  %v14247_v43 = vld [vmem:[%s15770_s8 + $0x1068] ss:$500 sps:$4 sm:$0xff]  }
 0x1fe   : > { %7209 = vmatpush1.bf16.msra.mxu0 %v14190_v44  ;;  %7250 = vmatpush1.bf16.msra.mxu1 %v14193_v47  ;;  %v14252_v44 = vld [vmem:[%s15770_s8 + $0x144c] ss:$500 sps:$4 sm:$0xff]   ;;  %v14255_v47 = vld [vmem:[%s15770_s8 + $0x1454] ss:$500 sps:$4 sm:$0xff]  }
 0x1ff   : > { %7210 = vmatprep.subr.bf16.mxu0 %v14198_v50  ;;  %7251 = vmatprep.subr.bf16.mxu1 %v14201_v51  ;;  %v14250_v50 = vld [vmem:[%s15770_s8 + $0x1448] ss:$500 sps:$4 sm:$0xff]   ;;  %v14253_v51 = vld [vmem:[%s15770_s8 + $0x1450] ss:$500 sps:$4 sm:$0xff]  }
 0x202   : > { %7211 = vmatpush1.bf16.msra.mxu0 %v14196_v52  ;;  %7252 = vmatpush1.bf16.msra.mxu1 %v14199_v53  ;;  %v14258_v52 = vld [vmem:[%s15770_s8 + $0x1834] ss:$500 sps:$4 sm:$0xff]   ;;  %v14261_v53 = vld [vmem:[%s15770_s8 + $0x183c] ss:$500 sps:$4 sm:$0xff]  }
 0x203   : > { %7212 = vmatprep.subr.bf16.mxu0 %v14204_v54  ;;  %7253 = vmatprep.subr.bf16.mxu1 %v14207_v55 }
 0x204   : > { %v16246_v60 = vpop.f32.mrb[16].mxu0  ;;  %v16248_v61 = vpop.f32.mrb[16].mxu1 }
 0x205   : > { %v16252_v0 = vpop.f32.mrb[17].mxu0  ;;  %v16254_v1 = vpop.f32.mrb[17].mxu1 }
 0x206   : > { %v6666_v7 = vpop.f32.mrb[18].mxu0  ;;  %7213 = vmatpush1.bf16.msra.mxu0 %v14202_v56  ;;  %7254 = vmatpush1.bf16.msra.mxu1 %v14205_v57  ;;  %v6707_v8 = vpop.f32.mrb[18].mxu1  ;;  %v14256_v56 = vld [vmem:[%s15770_s8 + $0x1830] ss:$500 sps:$4 sm:$0xff]   ;;  %v14259_v57 = vld [vmem:[%s15770_s8 + $0x1838] ss:$500 sps:$4 sm:$0xff]  }
 0x207   : > { %v6667_v13 = vpop.f32.mrb[19].mxu0  ;;  %7214 = vmatprep.subr.bf16.mxu0 %v14210_v58  ;;  %7255 = vmatprep.subr.bf16.mxu1 %v14213_v59  ;;  %v6708_v9 = vpop.f32.mrb[19].mxu1 }
 0x208   : > { %v14264_v13 = vld [vmem:[%s15770_s8 + $0x1c1c] ss:$500 sps:$4 sm:$0xff]   ;;  %v14267_v9 = vld [vmem:[%s15770_s8 + $0x1c24] ss:$500 sps:$4 sm:$0xff]  }
 0x20a   : > { %7215 = vmatpush1.bf16.msra.mxu0 %v14208_v62  ;;  %7256 = vmatpush1.bf16.msra.mxu1 %v14211_v63 }
 0x20b   : > { %7216 = vmatprep.subr.bf16.mxu0 %v14216_v12  ;;  %7257 = vmatprep.subr.bf16.mxu1 %v14219_v14  ;;  %v14262_v12 = vld [vmem:[%s15770_s8 + $0x1c18] ss:$500 sps:$4 sm:$0xff]   ;;  %v14265_v14 = vld [vmem:[%s15770_s8 + $0x1c20] ss:$500 sps:$4 sm:$0xff]  }
 0x20e   : > { %7217 = vmatpush1.bf16.msra.mxu0 %v14214_v17  ;;  %7258 = vmatpush1.bf16.msra.mxu1 %v14217_v18  ;;  %v14270_v17 = vld [vmem:[%s15770_s8 + $0xd4] ss:$500 sps:$4 sm:$0xff]   ;;  %v14273_v18 = vld [vmem:[%s15770_s8 + $0xdc] ss:$500 sps:$4 sm:$0xff]  }
 0x20f   : > { %7284 = vmatprep.subr.bf16.mxu0 %v14222_v19  ;;  %7325 = vmatprep.subr.bf16.mxu1 %v14225_v20  ;;  %v14268_v19 = vld [vmem:[%s15770_s8 + $0xd0] ss:$500 sps:$4 sm:$0xff]   ;;  %v14271_v20 = vld [vmem:[%s15770_s8 + $0xd8] ss:$500 sps:$4 sm:$0xff]  }
 0x211   : > { %7235 = vmatmul.mubr.bf16.vlgmr.msra.gmra.mrb[44].mxu0 %v16176_v48  ;;  %7276 = vmatmul.mubr.bf16.vlgmr.msra.gmra.mrb[44].mxu1 %v16176_v48 }
 0x212   : > { %7285 = vmatpush1.bf16.msra.mxu0 %v14220_v21  ;;  %7326 = vmatpush1.bf16.msra.mxu1 %v14223_v22  ;;  %v14276_v21 = vld [vmem:[%s15770_s8 + $0x4bc] ss:$500 sps:$4 sm:$0xff]   ;;  %v14279_v22 = vld [vmem:[%s15770_s8 + $0x4c4] ss:$500 sps:$4 sm:$0xff]  }
 0x213   : > { %7286 = vmatprep.subr.bf16.mxu0 %v14228_v23  ;;  %7327 = vmatprep.subr.bf16.mxu1 %v14231_v24  ;;  %v14274_v23 = vld [vmem:[%s15770_s8 + $0x4b8] ss:$500 sps:$4 sm:$0xff]   ;;  %v14277_v24 = vld [vmem:[%s15770_s8 + $0x4c0] ss:$500 sps:$4 sm:$0xff]  }
 0x214   : > { %7316 = vmatprep.mubr.bf16.mxu0 %v17605_v3  ;;  %7357 = vmatprep.mubr.bf16.mxu1 %v17605_v3 }
 0x216   : > { %7287 = vmatpush1.bf16.msra.mxu0 %v14226_v27  ;;  %7328 = vmatpush1.bf16.msra.mxu1 %v14229_v28  ;;  %v14282_v27 = vld [vmem:[%s15770_s8 + $0x8a4] ss:$500 sps:$4 sm:$0xff]   ;;  %v14285_v28 = vld [vmem:[%s15770_s8 + $0x8ac] ss:$500 sps:$4 sm:$0xff]  }
 0x217   : > { %7288 = vmatprep.subr.bf16.mxu0 %v14234_v31  ;;  %7329 = vmatprep.subr.bf16.mxu1 %v14237_v32  ;;  %v14283_v31 = vld [vmem:[%s15770_s8 + $0x8a8] ss:$500 sps:$4 sm:$0xff]   ;;  %v14288_v32 = vld [vmem:[%s15770_s8 + $0xc8c] ss:$500 sps:$4 sm:$0xff]  }
 0x21a   : > { %7289 = vmatpush1.bf16.msra.mxu0 %v14232_v33  ;;  %7330 = vmatpush1.bf16.msra.mxu1 %v14235_v34  ;;  %v14291_v33 = vld [vmem:[%s15770_s8 + $0xc94] ss:$500 sps:$4 sm:$0xff]  }
 0x21b   : > { %7290 = vmatprep.subr.bf16.mxu0 %v14240_v35  ;;  %7331 = vmatprep.subr.bf16.mxu1 %v14243_v37  ;;  %v14286_v34 = vld [vmem:[%s15770_s8 + $0xc88] ss:$500 sps:$4 sm:$0xff]   ;;  %v14289_v35 = vld [vmem:[%s15770_s8 + $0xc90] ss:$500 sps:$4 sm:$0xff]  }
 0x21c   : > { %v14294_v37 = vld [vmem:[%s15770_s8 + $0x1074] ss:$500 sps:$4 sm:$0xff]  }
 0x21e   : > { %7291 = vmatpush1.bf16.msra.mxu0 %v14238_v38  ;;  %7332 = vmatpush1.bf16.msra.mxu1 %v14241_v39  ;;  %v14297_v38 = vld [vmem:[%s15770_s8 + $0x107c] ss:$500 sps:$4 sm:$0xff]  }
 0x21f   : > { %7292 = vmatprep.subr.bf16.mxu0 %v14246_v40  ;;  %7333 = vmatprep.subr.bf16.mxu1 %v14249_v41  ;;  %v14292_v39 = vld [vmem:[%s15770_s8 + $0x1070] ss:$500 sps:$4 sm:$0xff]   ;;  %v14295_v40 = vld [vmem:[%s15770_s8 + $0x1078] ss:$500 sps:$4 sm:$0xff]  }
 0x220   : > { %v14300_v41 = vld [vmem:[%s15770_s8 + $0x145c] ss:$500 sps:$4 sm:$0xff]  }
 0x222   : > { %7293 = vmatpush1.bf16.msra.mxu0 %v14244_v42  ;;  %7334 = vmatpush1.bf16.msra.mxu1 %v14247_v43  ;;  %v14303_v42 = vld [vmem:[%s15770_s8 + $0x1464] ss:$500 sps:$4 sm:$0xff]  }
 0x223   : > { %7294 = vmatprep.subr.bf16.mxu0 %v14252_v44  ;;  %7335 = vmatprep.subr.bf16.mxu1 %v14255_v47  ;;  %v14298_v43 = vld [vmem:[%s15770_s8 + $0x1458] ss:$500 sps:$4 sm:$0xff]   ;;  %v14301_v44 = vld [vmem:[%s15770_s8 + $0x1460] ss:$500 sps:$4 sm:$0xff]  }
 0x224   : > { %v16290_v54 = vpop.f32.mrb[20].mxu0  ;;  %v16292_v55 = vpop.f32.mrb[20].mxu1  ;;  %v14306_v47 = vld [vmem:[%s15770_s8 + $0x1844] ss:$500 sps:$4 sm:$0xff]  }
 0x225   : > { %v16296_v58 = vpop.f32.mrb[21].mxu0  ;;  %v16298_v59 = vpop.f32.mrb[21].mxu1 }
 0x226   : > { %v6748_v62 = vpop.f32.mrb[22].mxu0  ;;  %7295 = vmatpush1.bf16.msra.mxu0 %v14250_v50  ;;  %7336 = vmatpush1.bf16.msra.mxu1 %v14253_v51  ;;  %v6789_v63 = vpop.f32.mrb[22].mxu1  ;;  %v14309_v50 = vld [vmem:[%s15770_s8 + $0x184c] ss:$500 sps:$4 sm:$0xff]  }
 0x227   : > { %v6749_v7 = vpop.f32.mrb[23].mxu0  ;;  %7296 = vmatprep.subr.bf16.mxu0 %v14258_v52  ;;  %7337 = vmatprep.subr.bf16.mxu1 %v14261_v53  ;;  %v6790_v8 = vpop.f32.mrb[23].mxu1  ;;  %v14304_v53 = vld [vmem:[%s15770_s8 + $0x1840] ss:$500 sps:$4 sm:$0xff]  }
 0x22a   : > { %7297 = vmatpush1.bf16.msra.mxu0 %v14256_v56  ;;  %7338 = vmatpush1.bf16.msra.mxu1 %v14259_v57  ;;  %v14307_v56 = vld [vmem:[%s15770_s8 + $0x1848] ss:$500 sps:$4 sm:$0xff]  }
 0x22b   : > { %7298 = vmatprep.subr.bf16.mxu0 %v14264_v13  ;;  %7339 = vmatprep.subr.bf16.mxu1 %v14267_v9  ;;  %v14312_v9 = vld [vmem:[%s15770_s8 + $0x1c2c] ss:$500 sps:$4 sm:$0xff]  }
 0x22e   : > { %7299 = vmatpush1.bf16.msra.mxu0 %v14262_v12  ;;  %7340 = vmatpush1.bf16.msra.mxu1 %v14265_v14  ;;  %v14315_v12 = vld [vmem:[%s15770_s8 + $0x1c34] ss:$500 sps:$4 sm:$0xff]  }
 0x22f   : > { %7366 = vmatprep.subr.bf16.mxu0 %v14270_v17  ;;  %7407 = vmatprep.subr.bf16.mxu1 %v14273_v18  ;;  %v14310_v14 = vld [vmem:[%s15770_s8 + $0x1c28] ss:$500 sps:$4 sm:$0xff]   ;;  %v14313_v17 = vld [vmem:[%s15770_s8 + $0x1c30] ss:$500 sps:$4 sm:$0xff]  }
 0x230   : > { %v14318_v18 = vld [vmem:[%s15770_s8 + $0xe4] ss:$500 sps:$4 sm:$0xff]  }
 0x231   : > { %7317 = vmatmul.mubr.bf16.vlgmr.msra.gmra.mrb[48].mxu0 %v16176_v48  ;;  %7358 = vmatmul.mubr.bf16.vlgmr.msra.gmra.mrb[48].mxu1 %v16176_v48  ;;  %v14280_v48 = vld [vmem:[%s15770_s8 + $0x8a0] ss:$500 sps:$4 sm:$0xff]  }
 0x232   : > { %7367 = vmatpush1.bf16.msra.mxu0 %v14268_v19  ;;  %7408 = vmatpush1.bf16.msra.mxu1 %v14271_v20  ;;  %v14321_v19 = vld [vmem:[%s15770_s8 + $0xec] ss:$500 sps:$4 sm:$0xff]  }
 0x233   : > { %7368 = vmatprep.subr.bf16.mxu0 %v14276_v21  ;;  %7409 = vmatprep.subr.bf16.mxu1 %v14279_v22  ;;  %v14316_v20 = vld [vmem:[%s15770_s8 + $0xe0] ss:$500 sps:$4 sm:$0xff]   ;;  %v14319_v21 = vld [vmem:[%s15770_s8 + $0xe8] ss:$500 sps:$4 sm:$0xff]  }
 0x234   : > { %7398 = vmatprep.mubr.bf16.mxu0 %v17605_v3  ;;  %7439 = vmatprep.mubr.bf16.mxu1 %v17605_v3  ;;  %v14324_v22 = vld [vmem:[%s15770_s8 + $0x4cc] ss:$500 sps:$4 sm:$0xff]  }
 0x236   : > { %7369 = vmatpush1.bf16.msra.mxu0 %v14274_v23  ;;  %7410 = vmatpush1.bf16.msra.mxu1 %v14277_v24  ;;  %v14327_v23 = vld [vmem:[%s15770_s8 + $0x4d4] ss:$500 sps:$4 sm:$0xff]   ;;  %v16354_v24 = vld [vmem:[#allocation2] sm:$0xf] }
 0x237   : > { %7370 = vmatprep.subr.bf16.mxu0 %v14282_v27  ;;  %7411 = vmatprep.subr.bf16.mxu1 %v14285_v28  ;;  %v14322_v27 = vld [vmem:[%s15770_s8 + $0x4c8] ss:$500 sps:$4 sm:$0xff]   ;;  %v14325_v28 = vld [vmem:[%s15770_s8 + $0x4d0] ss:$500 sps:$4 sm:$0xff]  }
 0x23a   : > { %7371 = vmatpush1.bf16.msra.mxu0 %v14280_v48  ;;  %7412 = vmatpush1.bf16.msra.mxu1 %v14283_v31  ;;  %v14330_v48 = vld [vmem:[%s15770_s8 + $0x8b4] ss:$500 sps:$4 sm:$0xff]   ;;  %v14333_v31 = vld [vmem:[%s15770_s8 + $0x8bc] ss:$500 sps:$4 sm:$0xff]  }
 0x23b   : > { %7372 = vmatprep.subr.bf16.mxu0 %v14288_v32  ;;  %7413 = vmatprep.subr.bf16.mxu1 %v14291_v33  ;;  %v14328_v32 = vld [vmem:[%s15770_s8 + $0x8b0] ss:$500 sps:$4 sm:$0xff]   ;;  %v14331_v33 = vld [vmem:[%s15770_s8 + $0x8b8] ss:$500 sps:$4 sm:$0xff]  }
 0x23e   : > { %7373 = vmatpush1.bf16.msra.mxu0 %v14286_v34  ;;  %7414 = vmatpush1.bf16.msra.mxu1 %v14289_v35  ;;  %v14336_v34 = vld [vmem:[%s15770_s8 + $0xc9c] ss:$500 sps:$4 sm:$0xff]   ;;  %v14339_v35 = vld [vmem:[%s15770_s8 + $0xca4] ss:$500 sps:$4 sm:$0xff]  }
 0x23f   : > { %7374 = vmatprep.subr.bf16.mxu0 %v14294_v37  ;;  %7415 = vmatprep.subr.bf16.mxu1 %v14297_v38  ;;  %v14334_v37 = vld [vmem:[%s15770_s8 + $0xc98] ss:$500 sps:$4 sm:$0xff]   ;;  %v14337_v38 = vld [vmem:[%s15770_s8 + $0xca0] ss:$500 sps:$4 sm:$0xff]  }
 0x242   : > { %7375 = vmatpush1.bf16.msra.mxu0 %v14292_v39  ;;  %7416 = vmatpush1.bf16.msra.mxu1 %v14295_v40  ;;  %v14342_v39 = vld [vmem:[%s15770_s8 + $0x1084] ss:$500 sps:$4 sm:$0xff]   ;;  %v14345_v40 = vld [vmem:[%s15770_s8 + $0x108c] ss:$500 sps:$4 sm:$0xff]  }
 0x243   : > { %7376 = vmatprep.subr.bf16.mxu0 %v14300_v41  ;;  %7417 = vmatprep.subr.bf16.mxu1 %v14303_v42  ;;  %v14340_v41 = vld [vmem:[%s15770_s8 + $0x1080] ss:$500 sps:$4 sm:$0xff]   ;;  %v14343_v42 = vld [vmem:[%s15770_s8 + $0x1088] ss:$500 sps:$4 sm:$0xff]  }
 0x244   : > { %v16334_v51 = vpop.f32.mrb[24].mxu0  ;;  %v16336_v52 = vpop.f32.mrb[24].mxu1 }
 0x245   : > { %v16340_v57 = vpop.f32.mrb[25].mxu0  ;;  %v16342_v62 = vpop.f32.mrb[25].mxu1 }
 0x246   : > { %v6830_v63 = vpop.f32.mrb[26].mxu0  ;;  %7377 = vmatpush1.bf16.msra.mxu0 %v14298_v43  ;;  %7418 = vmatpush1.bf16.msra.mxu1 %v14301_v44  ;;  %v6871_v7 = vpop.f32.mrb[26].mxu1  ;;  %v14348_v43 = vld [vmem:[%s15770_s8 + $0x146c] ss:$500 sps:$4 sm:$0xff]   ;;  %v14351_v44 = vld [vmem:[%s15770_s8 + $0x1474] ss:$500 sps:$4 sm:$0xff]  }
 0x247   : > { %v6831_v8 = vpop.f32.mrb[27].mxu0  ;;  %7378 = vmatprep.subr.bf16.mxu0 %v14306_v47  ;;  %7419 = vmatprep.subr.bf16.mxu1 %v14309_v50  ;;  %v6872_v13 = vpop.f32.mrb[27].mxu1  ;;  %v14346_v47 = vld [vmem:[%s15770_s8 + $0x1468] ss:$500 sps:$4 sm:$0xff]   ;;  %v14349_v50 = vld [vmem:[%s15770_s8 + $0x1470] ss:$500 sps:$4 sm:$0xff]  }
 0x248   : > { %v14352_v8 = vld [vmem:[%s15770_s8 + $0x1850] ss:$500 sps:$4 sm:$0xff]   ;;  %v14355_v13 = vld [vmem:[%s15770_s8 + $0x1858] ss:$500 sps:$4 sm:$0xff]  }
 0x24a   : > { %7379 = vmatpush1.bf16.msra.mxu0 %v14304_v53  ;;  %7420 = vmatpush1.bf16.msra.mxu1 %v14307_v56  ;;  %v14354_v53 = vld [vmem:[%s15770_s8 + $0x1854] ss:$500 sps:$4 sm:$0xff]   ;;  %v14357_v56 = vld [vmem:[%s15770_s8 + $0x185c] ss:$500 sps:$4 sm:$0xff]  }
 0x24b   : > { %7380 = vmatprep.subr.bf16.mxu0 %v14312_v9  ;;  %7421 = vmatprep.subr.bf16.mxu1 %v14315_v12 }
 0x24e   : > { %7381 = vmatpush1.bf16.msra.mxu0 %v14310_v14  ;;  %7422 = vmatpush1.bf16.msra.mxu1 %v14313_v17 }
 0x24f   : > { %7448 = vmatprep.subr.bf16.mxu0 %v14318_v18  ;;  %7489 = vmatprep.subr.bf16.mxu1 %v14321_v19 }
 0x251   : > { %7399 = vmatmul.mubr.bf16.vlgmr.msra.gmra.mrb[52].mxu0 %v16354_v24  ;;  %7440 = vmatmul.mubr.bf16.vlgmr.msra.gmra.mrb[52].mxu1 %v16354_v24 }
 0x252   : > { %7449 = vmatpush1.bf16.msra.mxu0 %v14316_v20  ;;  %7490 = vmatpush1.bf16.msra.mxu1 %v14319_v21  ;;  %v14360_v20 = vld [vmem:[%s15770_s8 + $0x1c3c] ss:$500 sps:$4 sm:$0xff]   ;;  %v14363_v21 = vld [vmem:[%s15770_s8 + $0x1c44] ss:$500 sps:$4 sm:$0xff]  }
 0x253   : > { %7450 = vmatprep.subr.bf16.mxu0 %v14324_v22  ;;  %7491 = vmatprep.subr.bf16.mxu1 %v14327_v23  ;;  %v14358_v22 = vld [vmem:[%s15770_s8 + $0x1c38] ss:$500 sps:$4 sm:$0xff]   ;;  %v14361_v23 = vld [vmem:[%s15770_s8 + $0x1c40] ss:$500 sps:$4 sm:$0xff]  }
 0x254   : > { %7480 = vmatprep.mubr.bf16.mxu0 %v17605_v3  ;;  %7521 = vmatprep.mubr.bf16.mxu1 %v17605_v3 }
 0x256   : > { %7451 = vmatpush1.bf16.msra.mxu0 %v14322_v27  ;;  %7492 = vmatpush1.bf16.msra.mxu1 %v14325_v28  ;;  %v14366_v27 = vld [vmem:[%s15770_s8 + $0xf4] ss:$500 sps:$4 sm:$0xff]   ;;  %v14369_v28 = vld [vmem:[%s15770_s8 + $0xfc] ss:$500 sps:$4 sm:$0xff]  }
 0x257   : > { %7452 = vmatprep.subr.bf16.mxu0 %v14330_v48  ;;  %7493 = vmatprep.subr.bf16.mxu1 %v14333_v31  ;;  %v14364_v48 = vld [vmem:[%s15770_s8 + $0xf0] ss:$500 sps:$4 sm:$0xff]   ;;  %v14367_v31 = vld [vmem:[%s15770_s8 + $0xf8] ss:$500 sps:$4 sm:$0xff]  }
 0x25a   : > { %7453 = vmatpush1.bf16.msra.mxu0 %v14328_v32  ;;  %7494 = vmatpush1.bf16.msra.mxu1 %v14331_v33  ;;  %v14372_v32 = vld [vmem:[%s15770_s8 + $0x4dc] ss:$500 sps:$4 sm:$0xff]   ;;  %v14375_v33 = vld [vmem:[%s15770_s8 + $0x4e4] ss:$500 sps:$4 sm:$0xff]  }
 0x25b   : > { %7454 = vmatprep.subr.bf16.mxu0 %v14336_v34  ;;  %7495 = vmatprep.subr.bf16.mxu1 %v14339_v35  ;;  %v14370_v34 = vld [vmem:[%s15770_s8 + $0x4d8] ss:$500 sps:$4 sm:$0xff]   ;;  %v14373_v35 = vld [vmem:[%s15770_s8 + $0x4e0] ss:$500 sps:$4 sm:$0xff]  }
 0x25e   : > { %7455 = vmatpush1.bf16.msra.mxu0 %v14334_v37  ;;  %7496 = vmatpush1.bf16.msra.mxu1 %v14337_v38  ;;  %v14378_v37 = vld [vmem:[%s15770_s8 + $0x8c4] ss:$500 sps:$4 sm:$0xff]   ;;  %v14381_v38 = vld [vmem:[%s15770_s8 + $0x8cc] ss:$500 sps:$4 sm:$0xff]  }
 0x25f   : > { %7456 = vmatprep.subr.bf16.mxu0 %v14342_v39  ;;  %7497 = vmatprep.subr.bf16.mxu1 %v14345_v40  ;;  %v14376_v39 = vld [vmem:[%s15770_s8 + $0x8c0] ss:$500 sps:$4 sm:$0xff]   ;;  %v14379_v40 = vld [vmem:[%s15770_s8 + $0x8c8] ss:$500 sps:$4 sm:$0xff]  }
 0x262   : > { %7457 = vmatpush1.bf16.msra.mxu0 %v14340_v41  ;;  %7498 = vmatpush1.bf16.msra.mxu1 %v14343_v42  ;;  %v14384_v41 = vld [vmem:[%s15770_s8 + $0xcac] ss:$500 sps:$4 sm:$0xff]   ;;  %v14387_v42 = vld [vmem:[%s15770_s8 + $0xcb4] ss:$500 sps:$4 sm:$0xff]  }
 0x263   : > { %7458 = vmatprep.subr.bf16.mxu0 %v14348_v43  ;;  %7499 = vmatprep.subr.bf16.mxu1 %v14351_v44  ;;  %v14382_v43 = vld [vmem:[%s15770_s8 + $0xca8] ss:$500 sps:$4 sm:$0xff]   ;;  %v14385_v44 = vld [vmem:[%s15770_s8 + $0xcb0] ss:$500 sps:$4 sm:$0xff]  }
 0x264   : > { %v16380_v63 = vpop.f32.mrb[28].mxu0  ;;  %v16382_v7 = vpop.f32.mrb[28].mxu1 }
 0x265   : > { %v16386_v9 = vpop.f32.mrb[29].mxu0  ;;  %v16388_v12 = vpop.f32.mrb[29].mxu1 }
 0x266   : > { %v6912_v14 = vpop.f32.mrb[30].mxu0  ;;  %7459 = vmatpush1.bf16.msra.mxu0 %v14346_v47  ;;  %7500 = vmatpush1.bf16.msra.mxu1 %v14349_v50  ;;  %v6953_v17 = vpop.f32.mrb[30].mxu1  ;;  %v14390_v47 = vld [vmem:[%s15770_s8 + $0x1094] ss:$500 sps:$4 sm:$0xff]   ;;  %v14393_v50 = vld [vmem:[%s15770_s8 + $0x109c] ss:$500 sps:$4 sm:$0xff]  }
 0x267   : > { %v6913_v18 = vpop.f32.mrb[31].mxu0  ;;  %7460 = vmatprep.subr.bf16.mxu0 %v14354_v53  ;;  %7501 = vmatprep.subr.bf16.mxu1 %v14357_v56  ;;  %v6954_v19 = vpop.f32.mrb[31].mxu1  ;;  %v14388_v53 = vld [vmem:[%s15770_s8 + $0x1090] ss:$500 sps:$4 sm:$0xff]   ;;  %v14391_v56 = vld [vmem:[%s15770_s8 + $0x1098] ss:$500 sps:$4 sm:$0xff]  }
 0x268   : > { %v14394_v14 = vld [vmem:[%s15770_s8 + $0x1478] ss:$500 sps:$4 sm:$0xff]   ;;  %v14397_v17 = vld [vmem:[%s15770_s8 + $0x1480] ss:$500 sps:$4 sm:$0xff]  }
 0x269   : > { %v14402_v18 = vld [vmem:[%s15770_s8 + $0x1864] ss:$500 sps:$4 sm:$0xff]   ;;  %v14405_v19 = vld [vmem:[%s15770_s8 + $0x186c] ss:$500 sps:$4 sm:$0xff]  }
 0x26a   : > { %7461 = vmatpush1.bf16.msra.mxu0 %v14352_v8  ;;  %7502 = vmatpush1.bf16.msra.mxu1 %v14355_v13  ;;  %v14396_v8 = vld [vmem:[%s15770_s8 + $0x147c] ss:$500 sps:$4 sm:$0xff]   ;;  %v14399_v13 = vld [vmem:[%s15770_s8 + $0x1484] ss:$500 sps:$4 sm:$0xff]  }
 0x26b   : > { %7462 = vmatprep.subr.bf16.mxu0 %v14360_v20  ;;  %7503 = vmatprep.subr.bf16.mxu1 %v14363_v21 }
 0x26e   : > { %7463 = vmatpush1.bf16.msra.mxu0 %v14358_v22  ;;  %7504 = vmatpush1.bf16.msra.mxu1 %v14361_v23  ;;  %v14400_v22 = vld [vmem:[%s15770_s8 + $0x1860] ss:$500 sps:$4 sm:$0xff]   ;;  %v14403_v23 = vld [vmem:[%s15770_s8 + $0x1868] ss:$500 sps:$4 sm:$0xff]  }
 0x26f   : > { %7530 = vmatprep.subr.bf16.mxu0 %v14366_v27  ;;  %7571 = vmatprep.subr.bf16.mxu1 %v14369_v28 }
 0x271   : > { %7481 = vmatmul.mubr.bf16.vlgmr.msra.gmra.mrb[56].mxu0 %v16354_v24  ;;  %7522 = vmatmul.mubr.bf16.vlgmr.msra.gmra.mrb[56].mxu1 %v16354_v24 }
 0x272   : > { %7531 = vmatpush1.bf16.msra.mxu0 %v14364_v48  ;;  %7572 = vmatpush1.bf16.msra.mxu1 %v14367_v31 }
 0x273   : > { %7532 = vmatprep.subr.bf16.mxu0 %v14372_v32  ;;  %7573 = vmatprep.subr.bf16.mxu1 %v14375_v33 }
 0x274   : > { %7562 = vmatprep.mubr.bf16.mxu0 %v17605_v3  ;;  %7603 = vmatprep.mubr.bf16.mxu1 %v17605_v3 }
 0x276   : > { %7533 = vmatpush1.bf16.msra.mxu0 %v14370_v34  ;;  %7574 = vmatpush1.bf16.msra.mxu1 %v14373_v35  ;;  %v14408_v34 = vld [vmem:[%s15770_s8 + $0x1c4c] ss:$500 sps:$4 sm:$0xff]   ;;  %v14411_v35 = vld [vmem:[%s15770_s8 + $0x1c54] ss:$500 sps:$4 sm:$0xff]  }
 0x277   : > { %7534 = vmatprep.subr.bf16.mxu0 %v14378_v37  ;;  %7575 = vmatprep.subr.bf16.mxu1 %v14381_v38  ;;  %v14406_v37 = vld [vmem:[%s15770_s8 + $0x1c48] ss:$500 sps:$4 sm:$0xff]   ;;  %v14409_v38 = vld [vmem:[%s15770_s8 + $0x1c50] ss:$500 sps:$4 sm:$0xff]  }
 0x27a   : > { %7535 = vmatpush1.bf16.msra.mxu0 %v14376_v39  ;;  %7576 = vmatpush1.bf16.msra.mxu1 %v14379_v40  ;;  %v14414_v39 = vld [vmem:[%s15770_s8 + $0x104] ss:$500 sps:$4 sm:$0xff]   ;;  %v14417_v40 = vld [vmem:[%s15770_s8 + $0x10c] ss:$500 sps:$4 sm:$0xff]  }
 0x27b   : > { %7536 = vmatprep.subr.bf16.mxu0 %v14384_v41  ;;  %7577 = vmatprep.subr.bf16.mxu1 %v14387_v42  ;;  %v14412_v41 = vld [vmem:[%s15770_s8 + $0x100] ss:$500 sps:$4 sm:$0xff]   ;;  %v14415_v42 = vld [vmem:[%s15770_s8 + $0x108] ss:$500 sps:$4 sm:$0xff]  }
 0x27e   : > { %7537 = vmatpush1.bf16.msra.mxu0 %v14382_v43  ;;  %7578 = vmatpush1.bf16.msra.mxu1 %v14385_v44  ;;  %v14420_v43 = vld [vmem:[%s15770_s8 + $0x4ec] ss:$500 sps:$4 sm:$0xff]   ;;  %v14423_v44 = vld [vmem:[%s15770_s8 + $0x4f4] ss:$500 sps:$4 sm:$0xff]  }
 0x27f   : > { %7538 = vmatprep.subr.bf16.mxu0 %v14390_v47  ;;  %7579 = vmatprep.subr.bf16.mxu1 %v14393_v50  ;;  %v14418_v47 = vld [vmem:[%s15770_s8 + $0x4e8] ss:$500 sps:$4 sm:$0xff]   ;;  %v14421_v50 = vld [vmem:[%s15770_s8 + $0x4f0] ss:$500 sps:$4 sm:$0xff]  }
 0x282   : > { %7539 = vmatpush1.bf16.msra.mxu0 %v14388_v53  ;;  %7580 = vmatpush1.bf16.msra.mxu1 %v14391_v56  ;;  %v14426_v53 = vld [vmem:[%s15770_s8 + $0x8d4] ss:$500 sps:$4 sm:$0xff]   ;;  %v14429_v56 = vld [vmem:[%s15770_s8 + $0x8dc] ss:$500 sps:$4 sm:$0xff]  }
 0x283   : > { %7540 = vmatprep.subr.bf16.mxu0 %v14396_v8  ;;  %7581 = vmatprep.subr.bf16.mxu1 %v14399_v13  ;;  %v14424_v8 = vld [vmem:[%s15770_s8 + $0x8d0] ss:$500 sps:$4 sm:$0xff]   ;;  %v14427_v13 = vld [vmem:[%s15770_s8 + $0x8d8] ss:$500 sps:$4 sm:$0xff]  }
 0x284   : > { %v16424_v20 = vpop.f32.mrb[32].mxu0  ;;  %v16426_v21 = vpop.f32.mrb[32].mxu1 }
 0x285   : > { %v16430_v27 = vpop.f32.mrb[33].mxu0  ;;  %v16432_v28 = vpop.f32.mrb[33].mxu1 }
 0x286   : > { %v6994_v48 = vpop.f32.mrb[34].mxu0  ;;  %7541 = vmatpush1.bf16.msra.mxu0 %v14394_v14  ;;  %7582 = vmatpush1.bf16.msra.mxu1 %v14397_v17  ;;  %v7035_v31 = vpop.f32.mrb[34].mxu1  ;;  %v14432_v14 = vld [vmem:[%s15770_s8 + $0xcbc] ss:$500 sps:$4 sm:$0xff]   ;;  %v14435_v17 = vld [vmem:[%s15770_s8 + $0xcc4] ss:$500 sps:$4 sm:$0xff]  }
 0x287   : > { %v6995_v32 = vpop.f32.mrb[35].mxu0  ;;  %7542 = vmatprep.subr.bf16.mxu0 %v14402_v18  ;;  %7583 = vmatprep.subr.bf16.mxu1 %v14405_v19  ;;  %v7036_v33 = vpop.f32.mrb[35].mxu1  ;;  %v14430_v18 = vld [vmem:[%s15770_s8 + $0xcb8] ss:$500 sps:$4 sm:$0xff]   ;;  %v14433_v19 = vld [vmem:[%s15770_s8 + $0xcc0] ss:$500 sps:$4 sm:$0xff]  }
 0x288   : > { %v14436_v48 = vld [vmem:[%s15770_s8 + $0x10a0] ss:$500 sps:$4 sm:$0xff]   ;;  %v14439_v31 = vld [vmem:[%s15770_s8 + $0x10a8] ss:$500 sps:$4 sm:$0xff]  }
 0x289   : > { %v14444_v32 = vld [vmem:[%s15770_s8 + $0x148c] ss:$500 sps:$4 sm:$0xff]   ;;  %v14447_v33 = vld [vmem:[%s15770_s8 + $0x1494] ss:$500 sps:$4 sm:$0xff]  }
 0x28a   : > { %7543 = vmatpush1.bf16.msra.mxu0 %v14400_v22  ;;  %7584 = vmatpush1.bf16.msra.mxu1 %v14403_v23  ;;  %v14438_v22 = vld [vmem:[%s15770_s8 + $0x10a4] ss:$500 sps:$4 sm:$0xff]   ;;  %v14441_v23 = vld [vmem:[%s15770_s8 + $0x10ac] ss:$500 sps:$4 sm:$0xff]  }
 0x28b   : > { %7544 = vmatprep.subr.bf16.mxu0 %v14408_v34  ;;  %7585 = vmatprep.subr.bf16.mxu1 %v14411_v35  ;;  %v14442_v34 = vld [vmem:[%s15770_s8 + $0x1488] ss:$500 sps:$4 sm:$0xff]   ;;  %v14445_v35 = vld [vmem:[%s15770_s8 + $0x1490] ss:$500 sps:$4 sm:$0xff]  }
 0x28e   : > { %7545 = vmatpush1.bf16.msra.mxu0 %v14406_v37  ;;  %7586 = vmatpush1.bf16.msra.mxu1 %v14409_v38  ;;  %v14450_v37 = vld [vmem:[%s15770_s8 + $0x1874] ss:$500 sps:$4 sm:$0xff]   ;;  %v14453_v38 = vld [vmem:[%s15770_s8 + $0x187c] ss:$500 sps:$4 sm:$0xff]  }
 0x28f   : > { %7612 = vmatprep.subr.bf16.mxu0 %v14414_v39  ;;  %7653 = vmatprep.subr.bf16.mxu1 %v14417_v40 }
 0x291   : > { %7563 = vmatmul.mubr.bf16.vlgmr.msra.gmra.mrb[60].mxu0 %v16354_v24  ;;  %7604 = vmatmul.mubr.bf16.vlgmr.msra.gmra.mrb[60].mxu1 %v16354_v24 }
 0x292   : > { %7613 = vmatpush1.bf16.msra.mxu0 %v14412_v41  ;;  %7654 = vmatpush1.bf16.msra.mxu1 %v14415_v42  ;;  %v14448_v41 = vld [vmem:[%s15770_s8 + $0x1870] ss:$500 sps:$4 sm:$0xff]   ;;  %v14451_v42 = vld [vmem:[%s15770_s8 + $0x1878] ss:$500 sps:$4 sm:$0xff]  }
 0x293   : > { %7614 = vmatprep.subr.bf16.mxu0 %v14420_v43  ;;  %7655 = vmatprep.subr.bf16.mxu1 %v14423_v44 }
 0x294   : > { %7644 = vmatprep.mubr.bf16.mxu0 %v17605_v3  ;;  %7685 = vmatprep.mubr.bf16.mxu1 %v17605_v3 }
 0x296   : > { %7615 = vmatpush1.bf16.msra.mxu0 %v14418_v47  ;;  %7656 = vmatpush1.bf16.msra.mxu1 %v14421_v50 }
 0x297   : > { %7616 = vmatprep.subr.bf16.mxu0 %v14426_v53  ;;  %7657 = vmatprep.subr.bf16.mxu1 %v14429_v56 }
 0x29a   : > { %7617 = vmatpush1.bf16.msra.mxu0 %v14424_v8  ;;  %7658 = vmatpush1.bf16.msra.mxu1 %v14427_v13  ;;  %v14456_v8 = vld [vmem:[%s15770_s8 + $0x1c5c] ss:$500 sps:$4 sm:$0xff]   ;;  %v14459_v13 = vld [vmem:[%s15770_s8 + $0x1c64] ss:$500 sps:$4 sm:$0xff]  }
 0x29b   : > { %7618 = vmatprep.subr.bf16.mxu0 %v14432_v14  ;;  %7659 = vmatprep.subr.bf16.mxu1 %v14435_v17  ;;  %v14454_v14 = vld [vmem:[%s15770_s8 + $0x1c58] ss:$500 sps:$4 sm:$0xff]   ;;  %v14457_v17 = vld [vmem:[%s15770_s8 + $0x1c60] ss:$500 sps:$4 sm:$0xff]  }
 0x29e   : > { %7619 = vmatpush1.bf16.msra.mxu0 %v14430_v18  ;;  %7660 = vmatpush1.bf16.msra.mxu1 %v14433_v19  ;;  %v14462_v18 = vld [vmem:[%s15770_s8 + $0x114] ss:$500 sps:$4 sm:$0xff]   ;;  %v14465_v19 = vld [vmem:[%s15770_s8 + $0x11c] ss:$500 sps:$4 sm:$0xff]  }
 0x29f   : > { %7620 = vmatprep.subr.bf16.mxu0 %v14438_v22  ;;  %7661 = vmatprep.subr.bf16.mxu1 %v14441_v23  ;;  %v14460_v22 = vld [vmem:[%s15770_s8 + $0x110] ss:$500 sps:$4 sm:$0xff]   ;;  %v14463_v23 = vld [vmem:[%s15770_s8 + $0x118] ss:$500 sps:$4 sm:$0xff]  }
 0x2a2   : > { %7621 = vmatpush1.bf16.msra.mxu0 %v14436_v48  ;;  %7662 = vmatpush1.bf16.msra.mxu1 %v14439_v31  ;;  %v14468_v48 = vld [vmem:[%s15770_s8 + $0x4fc] ss:$500 sps:$4 sm:$0xff]   ;;  %v14471_v31 = vld [vmem:[%s15770_s8 + $0x504] ss:$500 sps:$4 sm:$0xff]  }
 0x2a3   : > { %7622 = vmatprep.subr.bf16.mxu0 %v14444_v32  ;;  %7663 = vmatprep.subr.bf16.mxu1 %v14447_v33  ;;  %v14466_v32 = vld [vmem:[%s15770_s8 + $0x4f8] ss:$500 sps:$4 sm:$0xff]   ;;  %v14469_v33 = vld [vmem:[%s15770_s8 + $0x500] ss:$500 sps:$4 sm:$0xff]  }
 0x2a4   : > { %v16468_v39 = vpop.f32.mrb[36].mxu0  ;;  %v16470_v40 = vpop.f32.mrb[36].mxu1 }
 0x2a5   : > { %v16474_v43 = vpop.f32.mrb[37].mxu0  ;;  %v16476_v44 = vpop.f32.mrb[37].mxu1 }
 0x2a6   : > { %v7076_v47 = vpop.f32.mrb[38].mxu0  ;;  %7623 = vmatpush1.bf16.msra.mxu0 %v14442_v34  ;;  %7664 = vmatpush1.bf16.msra.mxu1 %v14445_v35  ;;  %v7117_v50 = vpop.f32.mrb[38].mxu1  ;;  %v14474_v34 = vld [vmem:[%s15770_s8 + $0x8e4] ss:$500 sps:$4 sm:$0xff]   ;;  %v14477_v35 = vld [vmem:[%s15770_s8 + $0x8ec] ss:$500 sps:$4 sm:$0xff]  }
 0x2a7   : > { %v7077_v53 = vpop.f32.mrb[39].mxu0  ;;  %7624 = vmatprep.subr.bf16.mxu0 %v14450_v37  ;;  %7665 = vmatprep.subr.bf16.mxu1 %v14453_v38  ;;  %v7118_v56 = vpop.f32.mrb[39].mxu1  ;;  %v14475_v37 = vld [vmem:[%s15770_s8 + $0x8e8] ss:$500 sps:$4 sm:$0xff]   ;;  %v14480_v38 = vld [vmem:[%s15770_s8 + $0xccc] ss:$500 sps:$4 sm:$0xff]  }
 0x2a8   : > { %v14481_v47 = vld [vmem:[%s15770_s8 + $0xcd0] ss:$500 sps:$4 sm:$0xff]   ;;  %v14486_v50 = vld [vmem:[%s15770_s8 + $0x10b4] ss:$500 sps:$4 sm:$0xff]  }
 0x2a9   : > { %v14489_v53 = vld [vmem:[%s15770_s8 + $0x10bc] ss:$500 sps:$4 sm:$0xff]  }
 0x2aa   : > { %7625 = vmatpush1.bf16.msra.mxu0 %v14448_v41  ;;  %7666 = vmatpush1.bf16.msra.mxu1 %v14451_v42  ;;  %v14483_v41 = vld [vmem:[%s15770_s8 + $0xcd4] ss:$500 sps:$4 sm:$0xff]   ;;  %v14484_v56 = vld [vmem:[%s15770_s8 + $0x10b0] ss:$500 sps:$4 sm:$0xff]  }
 0x2ab   : > { %7626 = vmatprep.subr.bf16.mxu0 %v14456_v8  ;;  %7667 = vmatprep.subr.bf16.mxu1 %v14459_v13  ;;  %v14478_v42 = vld [vmem:[%s15770_s8 + $0xcc8] ss:$500 sps:$4 sm:$0xff]   ;;  %v14487_v8 = vld [vmem:[%s15770_s8 + $0x10b8] ss:$500 sps:$4 sm:$0xff]  }
 0x2ac   : > { %v14492_v13 = vld [vmem:[%s15770_s8 + $0x149c] ss:$500 sps:$4 sm:$0xff]  }
 0x2ae   : > { %7627 = vmatpush1.bf16.msra.mxu0 %v14454_v14  ;;  %7668 = vmatpush1.bf16.msra.mxu1 %v14457_v17  ;;  %v14495_v14 = vld [vmem:[%s15770_s8 + $0x14a4] ss:$500 sps:$4 sm:$0xff]  }
 0x2af   : > { %7694 = vmatprep.subr.bf16.mxu0 %v14462_v18  ;;  %7735 = vmatprep.subr.bf16.mxu1 %v14465_v19  ;;  %v14490_v17 = vld [vmem:[%s15770_s8 + $0x1498] ss:$500 sps:$4 sm:$0xff]   ;;  %v14493_v18 = vld [vmem:[%s15770_s8 + $0x14a0] ss:$500 sps:$4 sm:$0xff]  }
 0x2b0   : > { %v14498_v19 = vld [vmem:[%s15770_s8 + $0x1884] ss:$500 sps:$4 sm:$0xff]  }
 0x2b1   : > { %7645 = vmatmul.mubr.bf16.vlgmr.msra.gmra.mrb[64].mxu0 %v16354_v24  ;;  %7686 = vmatmul.mubr.bf16.vlgmr.msra.gmra.mrb[64].mxu1 %v16354_v24  ;;  %v14472_v24 = vld [vmem:[%s15770_s8 + $0x8e0] ss:$500 sps:$4 sm:$0xff]  }
 0x2b2   : > { %7695 = vmatpush1.bf16.msra.mxu0 %v14460_v22  ;;  %7736 = vmatpush1.bf16.msra.mxu1 %v14463_v23  ;;  %v14501_v22 = vld [vmem:[%s15770_s8 + $0x188c] ss:$500 sps:$4 sm:$0xff]  }
 0x2b3   : > { %7696 = vmatprep.subr.bf16.mxu0 %v14468_v48  ;;  %7737 = vmatprep.subr.bf16.mxu1 %v14471_v31  ;;  %v14496_v31 = vld [vmem:[%s15770_s8 + $0x1880] ss:$500 sps:$4 sm:$0xff]  }
 0x2b4   : > { %7726 = vmatprep.mubr.bf16.mxu0 %v17605_v3  ;;  %7767 = vmatprep.mubr.bf16.mxu1 %v17605_v3 }
 0x2b6   : > { %7697 = vmatpush1.bf16.msra.mxu0 %v14466_v32  ;;  %7738 = vmatpush1.bf16.msra.mxu1 %v14469_v33  ;;  %v14499_v32 = vld [vmem:[%s15770_s8 + $0x1888] ss:$500 sps:$4 sm:$0xff]  }
 0x2b7   : > { %7698 = vmatprep.subr.bf16.mxu0 %v14474_v34  ;;  %7739 = vmatprep.subr.bf16.mxu1 %v14477_v35 }
 0x2ba   : > { %7699 = vmatpush1.bf16.msra.mxu0 %v14472_v24  ;;  %7740 = vmatpush1.bf16.msra.mxu1 %v14475_v37 }
 0x2bb   : > { %7700 = vmatprep.subr.bf16.mxu0 %v14480_v38  ;;  %7741 = vmatprep.subr.bf16.mxu1 %v14483_v41  ;;  %v14504_v41 = vld [vmem:[%s15770_s8 + $0x1c6c] ss:$500 sps:$4 sm:$0xff]  }
 0x2be   : > { %7701 = vmatpush1.bf16.msra.mxu0 %v14478_v42  ;;  %7742 = vmatpush1.bf16.msra.mxu1 %v14481_v47  ;;  %v14507_v42 = vld [vmem:[%s15770_s8 + $0x1c74] ss:$500 sps:$4 sm:$0xff]  }
 0x2bf   : > { %7702 = vmatprep.subr.bf16.mxu0 %v14486_v50  ;;  %7743 = vmatprep.subr.bf16.mxu1 %v14489_v53  ;;  %v14502_v47 = vld [vmem:[%s15770_s8 + $0x1c68] ss:$500 sps:$4 sm:$0xff]   ;;  %v14505_v50 = vld [vmem:[%s15770_s8 + $0x1c70] ss:$500 sps:$4 sm:$0xff]  }
 0x2c0   : > { %v14510_v53 = vld [vmem:[%s15770_s8 + $0x124] ss:$500 sps:$4 sm:$0xff]  }
 0x2c2   : > { %7703 = vmatpush1.bf16.msra.mxu0 %v14484_v56  ;;  %7744 = vmatpush1.bf16.msra.mxu1 %v14487_v8  ;;  %v14513_v56 = vld [vmem:[%s15770_s8 + $0x12c] ss:$500 sps:$4 sm:$0xff]  }
 0x2c3   : > { %7704 = vmatprep.subr.bf16.mxu0 %v14492_v13  ;;  %7745 = vmatprep.subr.bf16.mxu1 %v14495_v14  ;;  %v14508_v8 = vld [vmem:[%s15770_s8 + $0x120] ss:$500 sps:$4 sm:$0xff]   ;;  %v14511_v13 = vld [vmem:[%s15770_s8 + $0x128] ss:$500 sps:$4 sm:$0xff]  }
 0x2c4   : > { %v16512_v23 = vpop.f32.mrb[40].mxu0  ;;  %v16514_v48 = vpop.f32.mrb[40].mxu1  ;;  %v14516_v14 = vld [vmem:[%s15770_s8 + $0x50c] ss:$500 sps:$4 sm:$0xff]  }
 0x2c5   : > { %v16518_v33 = vpop.f32.mrb[41].mxu0  ;;  %v16520_v34 = vpop.f32.mrb[41].mxu1 }
 0x2c6   : > { %v7158_v35 = vpop.f32.mrb[42].mxu0  ;;  %7705 = vmatpush1.bf16.msra.mxu0 %v14490_v17  ;;  %7746 = vmatpush1.bf16.msra.mxu1 %v14493_v18  ;;  %v7199_v24 = vpop.f32.mrb[42].mxu1  ;;  %v14519_v17 = vld [vmem:[%s15770_s8 + $0x514] ss:$500 sps:$4 sm:$0xff]   ;;  %v16532_v18 = vld [vmem:[#allocation2] sm:$0xf] }
 0x2c7   : > { %v7159_v37 = vpop.f32.mrb[43].mxu0  ;;  %7706 = vmatprep.subr.bf16.mxu0 %v14498_v19  ;;  %7747 = vmatprep.subr.bf16.mxu1 %v14501_v22  ;;  %v7200_v38 = vpop.f32.mrb[43].mxu1  ;;  %v14514_v19 = vld [vmem:[%s15770_s8 + $0x508] ss:$500 sps:$4 sm:$0xff]   ;;  %v14517_v22 = vld [vmem:[%s15770_s8 + $0x510] ss:$500 sps:$4 sm:$0xff]  }
 0x2c8   : > { %v14520_v35 = vld [vmem:[%s15770_s8 + $0x8f0] ss:$500 sps:$4 sm:$0xff]   ;;  %v14523_v24 = vld [vmem:[%s15770_s8 + $0x8f8] ss:$500 sps:$4 sm:$0xff]  }
 0x2c9   : > { %v14528_v37 = vld [vmem:[%s15770_s8 + $0xcdc] ss:$500 sps:$4 sm:$0xff]   ;;  %v14531_v38 = vld [vmem:[%s15770_s8 + $0xce4] ss:$500 sps:$4 sm:$0xff]  }
 0x2ca   : > { %7707 = vmatpush1.bf16.msra.mxu0 %v14496_v31  ;;  %7748 = vmatpush1.bf16.msra.mxu1 %v14499_v32  ;;  %v14522_v31 = vld [vmem:[%s15770_s8 + $0x8f4] ss:$500 sps:$4 sm:$0xff]   ;;  %v14525_v32 = vld [vmem:[%s15770_s8 + $0x8fc] ss:$500 sps:$4 sm:$0xff]  }
 0x2cb   : > { %7708 = vmatprep.subr.bf16.mxu0 %v14504_v41  ;;  %7749 = vmatprep.subr.bf16.mxu1 %v14507_v42  ;;  %v14526_v41 = vld [vmem:[%s15770_s8 + $0xcd8] ss:$500 sps:$4 sm:$0xff]   ;;  %v14529_v42 = vld [vmem:[%s15770_s8 + $0xce0] ss:$500 sps:$4 sm:$0xff]  }
 0x2ce   : > { %7709 = vmatpush1.bf16.msra.mxu0 %v14502_v47  ;;  %7750 = vmatpush1.bf16.msra.mxu1 %v14505_v50  ;;  %v14534_v47 = vld [vmem:[%s15770_s8 + $0x10c4] ss:$500 sps:$4 sm:$0xff]   ;;  %v14537_v50 = vld [vmem:[%s15770_s8 + $0x10cc] ss:$500 sps:$4 sm:$0xff]  }
 0x2cf   : > { %7776 = vmatprep.subr.bf16.mxu0 %v14510_v53  ;;  %7817 = vmatprep.subr.bf16.mxu1 %v14513_v56  ;;  %v14532_v53 = vld [vmem:[%s15770_s8 + $0x10c0] ss:$500 sps:$4 sm:$0xff]   ;;  %v14535_v56 = vld [vmem:[%s15770_s8 + $0x10c8] ss:$500 sps:$4 sm:$0xff]  }
 0x2d1   : > { %7727 = vmatmul.mubr.bf16.vlgmr.msra.gmra.mrb[68].mxu0 %v16532_v18  ;;  %7768 = vmatmul.mubr.bf16.vlgmr.msra.gmra.mrb[68].mxu1 %v16532_v18 }
 0x2d2   : > { %7777 = vmatpush1.bf16.msra.mxu0 %v14508_v8  ;;  %7818 = vmatpush1.bf16.msra.mxu1 %v14511_v13  ;;  %v14540_v8 = vld [vmem:[%s15770_s8 + $0x14ac] ss:$500 sps:$4 sm:$0xff]   ;;  %v14543_v13 = vld [vmem:[%s15770_s8 + $0x14b4] ss:$500 sps:$4 sm:$0xff]  }
 0x2d3   : > { %7778 = vmatprep.subr.bf16.mxu0 %v14516_v14  ;;  %7819 = vmatprep.subr.bf16.mxu1 %v14519_v17  ;;  %v14538_v14 = vld [vmem:[%s15770_s8 + $0x14a8] ss:$500 sps:$4 sm:$0xff]   ;;  %v14541_v17 = vld [vmem:[%s15770_s8 + $0x14b0] ss:$500 sps:$4 sm:$0xff]  }
 0x2d4   : > { %7808 = vmatprep.mubr.bf16.mxu0 %v17605_v3  ;;  %7849 = vmatprep.mubr.bf16.mxu1 %v17605_v3 }
 0x2d6   : > { %7779 = vmatpush1.bf16.msra.mxu0 %v14514_v19  ;;  %7820 = vmatpush1.bf16.msra.mxu1 %v14517_v22  ;;  %v14546_v19 = vld [vmem:[%s15770_s8 + $0x1894] ss:$500 sps:$4 sm:$0xff]   ;;  %v14549_v22 = vld [vmem:[%s15770_s8 + $0x189c] ss:$500 sps:$4 sm:$0xff]  }
 0x2d7   : > { %7780 = vmatprep.subr.bf16.mxu0 %v14522_v31  ;;  %7821 = vmatprep.subr.bf16.mxu1 %v14525_v32 }
 0x2da   : > { %7781 = vmatpush1.bf16.msra.mxu0 %v14520_v35  ;;  %7822 = vmatpush1.bf16.msra.mxu1 %v14523_v24  ;;  %v14544_v35 = vld [vmem:[%s15770_s8 + $0x1890] ss:$500 sps:$4 sm:$0xff]   ;;  %v14547_v24 = vld [vmem:[%s15770_s8 + $0x1898] ss:$500 sps:$4 sm:$0xff]  }
 0x2db   : > { %7782 = vmatprep.subr.bf16.mxu0 %v14528_v37  ;;  %7823 = vmatprep.subr.bf16.mxu1 %v14531_v38 }
 0x2de   : > { %7783 = vmatpush1.bf16.msra.mxu0 %v14526_v41  ;;  %7824 = vmatpush1.bf16.msra.mxu1 %v14529_v42 }
 0x2df   : > { %7784 = vmatprep.subr.bf16.mxu0 %v14534_v47  ;;  %7825 = vmatprep.subr.bf16.mxu1 %v14537_v50 }
 0x2e2   : > { %7785 = vmatpush1.bf16.msra.mxu0 %v14532_v53  ;;  %7826 = vmatpush1.bf16.msra.mxu1 %v14535_v56  ;;  %v14552_v53 = vld [vmem:[%s15770_s8 + $0x1c7c] ss:$500 sps:$4 sm:$0xff]   ;;  %v14555_v56 = vld [vmem:[%s15770_s8 + $0x1c84] ss:$500 sps:$4 sm:$0xff]  }
 0x2e3   : > { %7786 = vmatprep.subr.bf16.mxu0 %v14540_v8  ;;  %7827 = vmatprep.subr.bf16.mxu1 %v14543_v13  ;;  %v14550_v8 = vld [vmem:[%s15770_s8 + $0x1c78] ss:$500 sps:$4 sm:$0xff]   ;;  %v14553_v13 = vld [vmem:[%s15770_s8 + $0x1c80] ss:$500 sps:$4 sm:$0xff]  }
 0x2e4   : > { %v16558_v31 = vpop.f32.mrb[44].mxu0  ;;  %v16560_v32 = vpop.f32.mrb[44].mxu1 }
 0x2e5   : > { %v16564_v37 = vpop.f32.mrb[45].mxu0  ;;  %v16566_v38 = vpop.f32.mrb[45].mxu1 }
 0x2e6   : > { %v7240_v41 = vpop.f32.mrb[46].mxu0  ;;  %7787 = vmatpush1.bf16.msra.mxu0 %v14538_v14  ;;  %7828 = vmatpush1.bf16.msra.mxu1 %v14541_v17  ;;  %v7281_v42 = vpop.f32.mrb[46].mxu1  ;;  %v14558_v14 = vld [vmem:[%s15770_s8 + $0x134] ss:$500 sps:$4 sm:$0xff]   ;;  %v14561_v17 = vld [vmem:[%s15770_s8 + $0x13c] ss:$500 sps:$4 sm:$0xff]  }
 0x2e7   : > { %v7241_v47 = vpop.f32.mrb[47].mxu0  ;;  %7788 = vmatprep.subr.bf16.mxu0 %v14546_v19  ;;  %7829 = vmatprep.subr.bf16.mxu1 %v14549_v22  ;;  %v7282_v50 = vpop.f32.mrb[47].mxu1  ;;  %v14556_v41 = vld [vmem:[%s15770_s8 + $0x130] ss:$500 sps:$4 sm:$0xff]   ;;  %v14559_v42 = vld [vmem:[%s15770_s8 + $0x138] ss:$500 sps:$4 sm:$0xff]  }
 0x2e8   : > { %v14564_v19 = vld [vmem:[%s15770_s8 + $0x51c] ss:$500 sps:$4 sm:$0xff]   ;;  %v14567_v22 = vld [vmem:[%s15770_s8 + $0x524] ss:$500 sps:$4 sm:$0xff]   ;;  %v14573_v50 = vld [vmem:[%s15770_s8 + $0x90c] ss:$500 sps:$4 sm:$0xff]  }
 0x2e9   : > { %v14570_v47 = vld [vmem:[%s15770_s8 + $0x904] ss:$500 sps:$4 sm:$0xff]  }
 0x2ea   : > { %7789 = vmatpush1.bf16.msra.mxu0 %v14544_v35  ;;  %7830 = vmatpush1.bf16.msra.mxu1 %v14547_v24  ;;  %v14562_v35 = vld [vmem:[%s15770_s8 + $0x518] ss:$500 sps:$4 sm:$0xff]   ;;  %v14565_v24 = vld [vmem:[%s15770_s8 + $0x520] ss:$500 sps:$4 sm:$0xff]  }
 0x2eb   : > { %7790 = vmatprep.subr.bf16.mxu0 %v14552_v53  ;;  %7831 = vmatprep.subr.bf16.mxu1 %v14555_v56  ;;  %v14568_v53 = vld [vmem:[%s15770_s8 + $0x900] ss:$500 sps:$4 sm:$0xff]   ;;  %v14571_v56 = vld [vmem:[%s15770_s8 + $0x908] ss:$500 sps:$4 sm:$0xff]  }
 0x2ee   : > { %7791 = vmatpush1.bf16.msra.mxu0 %v14550_v8  ;;  %7832 = vmatpush1.bf16.msra.mxu1 %v14553_v13  ;;  %v14576_v8 = vld [vmem:[%s15770_s8 + $0xcec] ss:$500 sps:$4 sm:$0xff]   ;;  %v14579_v13 = vld [vmem:[%s15770_s8 + $0xcf4] ss:$500 sps:$4 sm:$0xff]  }
 0x2ef   : > { %7858 = vmatprep.subr.bf16.mxu0 %v14558_v14  ;;  %7899 = vmatprep.subr.bf16.mxu1 %v14561_v17  ;;  %v14574_v14 = vld [vmem:[%s15770_s8 + $0xce8] ss:$500 sps:$4 sm:$0xff]   ;;  %v14577_v17 = vld [vmem:[%s15770_s8 + $0xcf0] ss:$500 sps:$4 sm:$0xff]  }
 0x2f1   : > { %7809 = vmatmul.mubr.bf16.vlgmr.msra.gmra.mrb[72].mxu0 %v16532_v18  ;;  %7850 = vmatmul.mubr.bf16.vlgmr.msra.gmra.mrb[72].mxu1 %v16532_v18 }
 0x2f2   : > { %7859 = vmatpush1.bf16.msra.mxu0 %v14556_v41  ;;  %7900 = vmatpush1.bf16.msra.mxu1 %v14559_v42  ;;  %v14582_v41 = vld [vmem:[%s15770_s8 + $0x10d4] ss:$500 sps:$4 sm:$0xff]   ;;  %v14585_v42 = vld [vmem:[%s15770_s8 + $0x10dc] ss:$500 sps:$4 sm:$0xff]  }
 0x2f3   : > { %7860 = vmatprep.subr.bf16.mxu0 %v14564_v19  ;;  %7901 = vmatprep.subr.bf16.mxu1 %v14567_v22  ;;  %v14580_v19 = vld [vmem:[%s15770_s8 + $0x10d0] ss:$500 sps:$4 sm:$0xff]   ;;  %v14583_v22 = vld [vmem:[%s15770_s8 + $0x10d8] ss:$500 sps:$4 sm:$0xff]  }
 0x2f4   : > { %7890 = vmatprep.mubr.bf16.mxu0 %v17605_v3  ;;  %7931 = vmatprep.mubr.bf16.mxu1 %v17605_v3  ;;  %v14600_v3 = vld [vmem:[%s15770_s8 + $0x1c8c] ss:$500 sps:$4 sm:$0xff]  }
 0x2f6   : > { %7861 = vmatpush1.bf16.msra.mxu0 %v14562_v35  ;;  %7902 = vmatpush1.bf16.msra.mxu1 %v14565_v24  ;;  %v14588_v35 = vld [vmem:[%s15770_s8 + $0x14bc] ss:$500 sps:$4 sm:$0xff]   ;;  %v14591_v24 = vld [vmem:[%s15770_s8 + $0x14c4] ss:$500 sps:$4 sm:$0xff]  }
 0x2f7   : > { %7862 = vmatprep.subr.bf16.mxu0 %v14570_v47  ;;  %7903 = vmatprep.subr.bf16.mxu1 %v14573_v50  ;;  %v14586_v47 = vld [vmem:[%s15770_s8 + $0x14b8] ss:$500 sps:$4 sm:$0xff]   ;;  %v14589_v50 = vld [vmem:[%s15770_s8 + $0x14c0] ss:$500 sps:$4 sm:$0xff]  }
 0x2fa   : > { %7863 = vmatpush1.bf16.msra.mxu0 %v14568_v53  ;;  %7904 = vmatpush1.bf16.msra.mxu1 %v14571_v56  ;;  %v14594_v53 = vld [vmem:[%s15770_s8 + $0x18a4] ss:$500 sps:$4 sm:$0xff]   ;;  %v14597_v56 = vld [vmem:[%s15770_s8 + $0x18ac] ss:$500 sps:$4 sm:$0xff]  }
 0x2fb   : > { %7864 = vmatprep.subr.bf16.mxu0 %v14576_v8  ;;  %7905 = vmatprep.subr.bf16.mxu1 %v14579_v13 }
 0x2fe   : > { %7865 = vmatpush1.bf16.msra.mxu0 %v14574_v14  ;;  %7906 = vmatpush1.bf16.msra.mxu1 %v14577_v17  ;;  %v14592_v14 = vld [vmem:[%s15770_s8 + $0x18a0] ss:$500 sps:$4 sm:$0xff]   ;;  %v14595_v17 = vld [vmem:[%s15770_s8 + $0x18a8] ss:$500 sps:$4 sm:$0xff]  }
 0x2ff   : > { %7866 = vmatprep.subr.bf16.mxu0 %v14582_v41  ;;  %7907 = vmatprep.subr.bf16.mxu1 %v14585_v42 }
 0x302   : > { %7867 = vmatpush1.bf16.msra.mxu0 %v14580_v19  ;;  %7908 = vmatpush1.bf16.msra.mxu1 %v14583_v22 }
 0x303   : > { %7868 = vmatprep.subr.bf16.mxu0 %v14588_v35  ;;  %7909 = vmatprep.subr.bf16.mxu1 %v14591_v24 }
 0x304   : > { %v16602_v8 = vpop.f32.mrb[48].mxu0  ;;  %v16604_v13 = vpop.f32.mrb[48].mxu1 }
 0x305   : > { %17618 = vst [vmem:[#allocation15_spill] sm:$0xff] %v16602_v8  ;;  %17619 = vst [vmem:[#allocation16_spill] sm:$0xff] %v16604_v13  ;;  %v16608_v41 = vpop.f32.mrb[49].mxu0  ;;  %v16610_v42 = vpop.f32.mrb[49].mxu1  ;;  %v14603_v13 = vld [vmem:[%s15770_s8 + $0x1c94] ss:$500 sps:$4 sm:$0xff]  }
 0x306   : > { %17620 = vst [vmem:[#allocation17_spill] sm:$0xff] %v16610_v42  ;;  %v7322_v19 = vpop.f32.mrb[50].mxu0  ;;  %7869 = vmatpush1.bf16.msra.mxu0 %v14586_v47  ;;  %7910 = vmatpush1.bf16.msra.mxu1 %v14589_v50  ;;  %v7363_v22 = vpop.f32.mrb[50].mxu1  ;;  %v14598_v8 = vld [vmem:[%s15770_s8 + $0x1c88] ss:$500 sps:$4 sm:$0xff]  }
 0x307   : > { %v7323_v35 = vpop.f32.mrb[51].mxu0  ;;  %7870 = vmatprep.subr.bf16.mxu0 %v14594_v53  ;;  %7911 = vmatprep.subr.bf16.mxu1 %v14597_v56  ;;  %v7364_v24 = vpop.f32.mrb[51].mxu1  ;;  %v14601_v42 = vld [vmem:[%s15770_s8 + $0x1c90] ss:$500 sps:$4 sm:$0xff]   ;;  %v14609_v50 = vld [vmem:[%s15770_s8 + $0x14c] ss:$500 sps:$4 sm:$0xff]  }
 0x308   : > { %v14606_v47 = vld [vmem:[%s15770_s8 + $0x144] ss:$500 sps:$4 sm:$0xff]   ;;  %v14604_v19 = vld [vmem:[%s15770_s8 + $0x140] ss:$500 sps:$4 sm:$0xff]   ;;  %v14607_v22 = vld [vmem:[%s15770_s8 + $0x148] ss:$500 sps:$4 sm:$0xff]  }
 0x309   : > { %v14612_v53 = vld [vmem:[%s15770_s8 + $0x52c] ss:$500 sps:$4 sm:$0xff]   ;;  %v14615_v56 = vld [vmem:[%s15770_s8 + $0x534] ss:$500 sps:$4 sm:$0xff]   ;;  %v14624_v24 = vld [vmem:[%s15770_s8 + $0xcfc] ss:$500 sps:$4 sm:$0xff]  }
 0x30a   : > { %7871 = vmatpush1.bf16.msra.mxu0 %v14592_v14  ;;  %7912 = vmatpush1.bf16.msra.mxu1 %v14595_v17  ;;  %v14621_v14 = vld [vmem:[%s15770_s8 + $0x91c] ss:$500 sps:$4 sm:$0xff]   ;;  %v17621_v17 = vmov 0   ;;  %v14619_v35 = vld [vmem:[%s15770_s8 + $0x918] ss:$500 sps:$4 sm:$0xff]  }
 0x30b   : > { %7872 = vmatprep.subr.bf16.mxu0 %v14600_v3  ;;  %7913 = vmatprep.subr.bf16.mxu1 %v14603_v13  ;;  %v14610_v3 = vld [vmem:[%s15770_s8 + $0x528] ss:$500 sps:$4 sm:$0xff]   ;;  %v14613_v13 = vld [vmem:[%s15770_s8 + $0x530] ss:$500 sps:$4 sm:$0xff]  }
 0x30e   : > { %7873 = vmatpush1.bf16.msra.mxu0 %v14598_v8  ;;  %7914 = vmatpush1.bf16.msra.mxu1 %v14601_v42  ;;  %v14618_v8 = vld [vmem:[%s15770_s8 + $0x914] ss:$500 sps:$4 sm:$0xff]   ;;  %v14616_v42 = vld [vmem:[%s15770_s8 + $0x910] ss:$500 sps:$4 sm:$0xff]  }
 0x30f   : > { %7940 = vmatprep.subr.bf16.mxu0 %v14606_v47  ;;  %7981 = vmatprep.subr.bf16.mxu1 %v14609_v50  ;;  %v14627_v47 = vld [vmem:[%s15770_s8 + $0xd04] ss:$500 sps:$4 sm:$0xff]  }
 0x310   : > { %v14622_v50 = vld [vmem:[%s15770_s8 + $0xcf8] ss:$500 sps:$4 sm:$0xff]  }
 0x311   : > { %7891 = vmatmul.mubr.bf16.vlgmr.msra.gmra.mrb[76].mxu0 %v16532_v18  ;;  %7932 = vmatmul.mubr.bf16.vlgmr.msra.gmra.mrb[76].mxu1 %v16532_v18 }
 0x312   : > { %7941 = vmatpush1.bf16.msra.mxu0 %v14604_v19  ;;  %7982 = vmatpush1.bf16.msra.mxu1 %v14607_v22  ;;  %v14625_v19 = vld [vmem:[%s15770_s8 + $0xd00] ss:$500 sps:$4 sm:$0xff]   ;;  %v14630_v22 = vld [vmem:[%s15770_s8 + $0x10e4] ss:$500 sps:$4 sm:$0xff]  }
 0x313   : > { %7942 = vmatprep.subr.bf16.mxu0 %v14612_v53  ;;  %7983 = vmatprep.subr.bf16.mxu1 %v14615_v56  ;;  %v14633_v53 = vld [vmem:[%s15770_s8 + $0x10ec] ss:$500 sps:$4 sm:$0xff]  }
 0x314   : > { %7972 = vmatprep.mubr.bf16.mxu0 %v17621_v17  ;;  %8013 = vmatprep.mubr.bf16.mxu1 %v17621_v17  ;;  %v14628_v56 = vld [vmem:[%s15770_s8 + $0x10e0] ss:$500 sps:$4 sm:$0xff]  }
 0x316   : > { %7943 = vmatpush1.bf16.msra.mxu0 %v14610_v3  ;;  %7984 = vmatpush1.bf16.msra.mxu1 %v14613_v13  ;;  %v14631_v3 = vld [vmem:[%s15770_s8 + $0x10e8] ss:$500 sps:$4 sm:$0xff]   ;;  %v14636_v13 = vld [vmem:[%s15770_s8 + $0x14cc] ss:$500 sps:$4 sm:$0xff]  }
 0x317   : > { %7944 = vmatprep.subr.bf16.mxu0 %v14618_v8  ;;  %7985 = vmatprep.subr.bf16.mxu1 %v14621_v14  ;;  %v14639_v8 = vld [vmem:[%s15770_s8 + $0x14d4] ss:$500 sps:$4 sm:$0xff]  }
 0x318   : > { %v14634_v14 = vld [vmem:[%s15770_s8 + $0x14c8] ss:$500 sps:$4 sm:$0xff]  }
 0x31a   : > { %7945 = vmatpush1.bf16.msra.mxu0 %v14616_v42  ;;  %7986 = vmatpush1.bf16.msra.mxu1 %v14619_v35  ;;  %v14637_v42 = vld [vmem:[%s15770_s8 + $0x14d0] ss:$500 sps:$4 sm:$0xff]   ;;  %v14642_v35 = vld [vmem:[%s15770_s8 + $0x18b4] ss:$500 sps:$4 sm:$0xff]  }
 0x31b   : > { %7946 = vmatprep.subr.bf16.mxu0 %v14624_v24  ;;  %7987 = vmatprep.subr.bf16.mxu1 %v14627_v47  ;;  %v14645_v24 = vld [vmem:[%s15770_s8 + $0x18bc] ss:$500 sps:$4 sm:$0xff]  }
 0x31e   : > { %7947 = vmatpush1.bf16.msra.mxu0 %v14622_v50  ;;  %7988 = vmatpush1.bf16.msra.mxu1 %v14625_v19 }
 0x31f   : > { %7948 = vmatprep.subr.bf16.mxu0 %v14630_v22  ;;  %7989 = vmatprep.subr.bf16.mxu1 %v14633_v53 }
 0x322   : > { %7949 = vmatpush1.bf16.msra.mxu0 %v14628_v56  ;;  %7990 = vmatpush1.bf16.msra.mxu1 %v14631_v3  ;;  %v14640_v56 = vld [vmem:[%s15770_s8 + $0x18b0] ss:$500 sps:$4 sm:$0xff]   ;;  %v14643_v3 = vld [vmem:[%s15770_s8 + $0x18b8] ss:$500 sps:$4 sm:$0xff]  }
 0x323   : > { %7950 = vmatprep.subr.bf16.mxu0 %v14636_v13  ;;  %7991 = vmatprep.subr.bf16.mxu1 %v14639_v8 }
 0x324   : > { %v16646_v47 = vpop.f32.mrb[52].mxu0  ;;  %v16648_v50 = vpop.f32.mrb[52].mxu1 }
 0x325   : > { %17622 = vst [vmem:[#allocation18_spill] sm:$0xff] %v16646_v47  ;;  %17623 = vst [vmem:[#allocation19_spill] sm:$0xff] %v16648_v50  ;;  %v16650_v19 = vpop.f32.mrb[53].mxu0  ;;  %v16652_v22 = vpop.f32.mrb[53].mxu1  ;;  %v14648_v47 = vld [vmem:[%s15770_s8 + $0x1c9c] ss:$500 sps:$4 sm:$0xff]  }
 0x326   : > { %17624 = vst [vmem:[#allocation20_spill] sm:$0xff] %v16650_v19  ;;  %17625 = vst [vmem:[#allocation21_spill] sm:$0xff] %v16652_v22  ;;  %v7404_v53 = vpop.f32.mrb[54].mxu0  ;;  %7951 = vmatpush1.bf16.msra.mxu0 %v14634_v14  ;;  %7992 = vmatpush1.bf16.msra.mxu1 %v14637_v42  ;;  %v7445_v13 = vpop.f32.mrb[54].mxu1  ;;  %v14651_v19 = vld [vmem:[%s15770_s8 + $0x1ca4] ss:$500 sps:$4 sm:$0xff]  }
 0x327   : > { %v7405_v8 = vpop.f32.mrb[55].mxu0  ;;  %7952 = vmatprep.subr.bf16.mxu0 %v14642_v35  ;;  %7993 = vmatprep.subr.bf16.mxu1 %v14645_v24  ;;  %v7446_v50 = vpop.f32.mrb[55].mxu1  ;;  %v14646_v53 = vld [vmem:[%s15770_s8 + $0x1c98] ss:$500 sps:$4 sm:$0xff]   ;;  %v14649_v14 = vld [vmem:[%s15770_s8 + $0x1ca0] ss:$500 sps:$4 sm:$0xff]  }
 0x328   : > { %v14654_v42 = vld [vmem:[%s15770_s8 + $0x154] ss:$500 sps:$4 sm:$0xff]   ;;  %v14657_v13 = vld [vmem:[%s15770_s8 + $0x15c] ss:$500 sps:$4 sm:$0xff]   ;;  %v14655_v24 = vld [vmem:[%s15770_s8 + $0x158] ss:$500 sps:$4 sm:$0xff]  }
 0x329   : > { %v14652_v35 = vld [vmem:[%s15770_s8 + $0x150] ss:$500 sps:$4 sm:$0xff]   ;;  %v14669_v8 = vld [vmem:[%s15770_s8 + $0x92c] ss:$500 sps:$4 sm:$0xff]  }
 0x32a   : > { %7953 = vmatpush1.bf16.msra.mxu0 %v14640_v56  ;;  %7994 = vmatpush1.bf16.msra.mxu1 %v14643_v3  ;;  %v14660_v50 = vld [vmem:[%s15770_s8 + $0x53c] ss:$500 sps:$4 sm:$0xff]   ;;  %v14663_v56 = vld [vmem:[%s15770_s8 + $0x544] ss:$500 sps:$4 sm:$0xff]  }
 0x32b   : > { %7954 = vmatprep.subr.bf16.mxu0 %v14648_v47  ;;  %7995 = vmatprep.subr.bf16.mxu1 %v14651_v19  ;;  %v14658_v47 = vld [vmem:[%s15770_s8 + $0x538] ss:$500 sps:$4 sm:$0xff]   ;;  %v14661_v19 = vld [vmem:[%s15770_s8 + $0x540] ss:$500 sps:$4 sm:$0xff]  }
 0x32c   : > { %v14666_v3 = vld [vmem:[%s15770_s8 + $0x924] ss:$500 sps:$4 sm:$0xff]  }
 0x32e   : > { %7955 = vmatpush1.bf16.msra.mxu0 %v14646_v53  ;;  %7996 = vmatpush1.bf16.msra.mxu1 %v14649_v14  ;;  %v14664_v53 = vld [vmem:[%s15770_s8 + $0x920] ss:$500 sps:$4 sm:$0xff]   ;;  %v14667_v14 = vld [vmem:[%s15770_s8 + $0x928] ss:$500 sps:$4 sm:$0xff]  }
 0x32f   : > { %8022 = vmatprep.subr.bf16.mxu0 %v14654_v42  ;;  %8063 = vmatprep.subr.bf16.mxu1 %v14657_v13  ;;  %v14672_v42 = vld [vmem:[%s15770_s8 + $0xd0c] ss:$500 sps:$4 sm:$0xff]   ;;  %v14675_v13 = vld [vmem:[%s15770_s8 + $0xd14] ss:$500 sps:$4 sm:$0xff]  }
 0x331   : > { %7973 = vmatmul.mubr.bf16.vlgmr.msra.gmra.mrb[80].mxu0 %v16532_v18  ;;  %8014 = vmatmul.mubr.bf16.vlgmr.msra.gmra.mrb[80].mxu1 %v16532_v18 }
 0x332   : > { %8023 = vmatpush1.bf16.msra.mxu0 %v14652_v35  ;;  %8064 = vmatpush1.bf16.msra.mxu1 %v14655_v24  ;;  %v14670_v35 = vld [vmem:[%s15770_s8 + $0xd08] ss:$500 sps:$4 sm:$0xff]   ;;  %v14673_v24 = vld [vmem:[%s15770_s8 + $0xd10] ss:$500 sps:$4 sm:$0xff]  }
 0x333   : > { %8024 = vmatprep.subr.bf16.mxu0 %v14660_v50  ;;  %8065 = vmatprep.subr.bf16.mxu1 %v14663_v56  ;;  %v14678_v50 = vld [vmem:[%s15770_s8 + $0x10f4] ss:$500 sps:$4 sm:$0xff]   ;;  %v14681_v56 = vld [vmem:[%s15770_s8 + $0x10fc] ss:$500 sps:$4 sm:$0xff]  }
 0x334   : > { %8054 = vmatprep.mubr.bf16.mxu0 %v17621_v17  ;;  %8095 = vmatprep.mubr.bf16.mxu1 %v17621_v17 }
 0x336   : > { %8025 = vmatpush1.bf16.msra.mxu0 %v14658_v47  ;;  %8066 = vmatpush1.bf16.msra.mxu1 %v14661_v19  ;;  %v14676_v47 = vld [vmem:[%s15770_s8 + $0x10f0] ss:$500 sps:$4 sm:$0xff]   ;;  %v14679_v19 = vld [vmem:[%s15770_s8 + $0x10f8] ss:$500 sps:$4 sm:$0xff]  }
 0x337   : > { %8026 = vmatprep.subr.bf16.mxu0 %v14666_v3  ;;  %8067 = vmatprep.subr.bf16.mxu1 %v14669_v8  ;;  %v14684_v3 = vld [vmem:[%s15770_s8 + $0x14dc] ss:$500 sps:$4 sm:$0xff]   ;;  %v14687_v8 = vld [vmem:[%s15770_s8 + $0x14e4] ss:$500 sps:$4 sm:$0xff]  }
 0x33a   : > { %8027 = vmatpush1.bf16.msra.mxu0 %v14664_v53  ;;  %8068 = vmatpush1.bf16.msra.mxu1 %v14667_v14  ;;  %v14682_v53 = vld [vmem:[%s15770_s8 + $0x14d8] ss:$500 sps:$4 sm:$0xff]   ;;  %v14685_v14 = vld [vmem:[%s15770_s8 + $0x14e0] ss:$500 sps:$4 sm:$0xff]  }
 0x33b   : > { %8028 = vmatprep.subr.bf16.mxu0 %v14672_v42  ;;  %8069 = vmatprep.subr.bf16.mxu1 %v14675_v13  ;;  %v14690_v42 = vld [vmem:[%s15770_s8 + $0x18c4] ss:$500 sps:$4 sm:$0xff]   ;;  %v14693_v13 = vld [vmem:[%s15770_s8 + $0x18cc] ss:$500 sps:$4 sm:$0xff]  }
 0x33e   : > { %8029 = vmatpush1.bf16.msra.mxu0 %v14670_v35  ;;  %8070 = vmatpush1.bf16.msra.mxu1 %v14673_v24 }
 0x33f   : > { %8030 = vmatprep.subr.bf16.mxu0 %v14678_v50  ;;  %8071 = vmatprep.subr.bf16.mxu1 %v14681_v56 }
 0x342   : > { %8031 = vmatpush1.bf16.msra.mxu0 %v14676_v47  ;;  %8072 = vmatpush1.bf16.msra.mxu1 %v14679_v19  ;;  %v14688_v19 = vld [vmem:[%s15770_s8 + $0x18c0] ss:$500 sps:$4 sm:$0xff]  }
 0x343   : > { %8032 = vmatprep.subr.bf16.mxu0 %v14684_v3  ;;  %8073 = vmatprep.subr.bf16.mxu1 %v14687_v8  ;;  %v14691_v3 = vld [vmem:[%s15770_s8 + $0x18c8] ss:$500 sps:$4 sm:$0xff]  }
 0x344   : > { %v16690_v35 = vpop.f32.mrb[56].mxu0  ;;  %v16692_v24 = vpop.f32.mrb[56].mxu1 }
 0x345   : > { %17626 = vst [vmem:[#allocation22_spill] sm:$0xff] %v16690_v35  ;;  %17627 = vst [vmem:[#allocation23_spill] sm:$0xff] %v16692_v24  ;;  %v16694_v50 = vpop.f32.mrb[57].mxu0  ;;  %v16696_v56 = vpop.f32.mrb[57].mxu1  ;;  %v14696_v35 = vld [vmem:[%s15770_s8 + $0x1cac] ss:$500 sps:$4 sm:$0xff]  }
 0x346   : > { %17628 = vst [vmem:[#allocation24_spill] sm:$0xff] %v16694_v50  ;;  %17629 = vst [vmem:[#allocation25_spill] sm:$0xff] %v16696_v56  ;;  %v7486_v47 = vpop.f32.mrb[58].mxu0  ;;  %8033 = vmatpush1.bf16.msra.mxu0 %v14682_v53  ;;  %8074 = vmatpush1.bf16.msra.mxu1 %v14685_v14  ;;  %v7527_v8 = vpop.f32.mrb[58].mxu1  ;;  %v14699_v50 = vld [vmem:[%s15770_s8 + $0x1cb4] ss:$500 sps:$4 sm:$0xff]  }
 0x347   : > { %v7487_v22 = vpop.f32.mrb[59].mxu0  ;;  %8034 = vmatprep.subr.bf16.mxu0 %v14690_v42  ;;  %8075 = vmatprep.subr.bf16.mxu1 %v14693_v13  ;;  %v7528_v24 = vpop.f32.mrb[59].mxu1  ;;  %v14694_v47 = vld [vmem:[%s15770_s8 + $0x1ca8] ss:$500 sps:$4 sm:$0xff]   ;;  %v14697_v53 = vld [vmem:[%s15770_s8 + $0x1cb0] ss:$500 sps:$4 sm:$0xff]  }
 0x348   : > { %v14702_v14 = vld [vmem:[%s15770_s8 + $0x164] ss:$500 sps:$4 sm:$0xff]   ;;  %v14705_v8 = vld [vmem:[%s15770_s8 + $0x16c] ss:$500 sps:$4 sm:$0xff]   ;;  %v14703_v42 = vld [vmem:[%s15770_s8 + $0x168] ss:$500 sps:$4 sm:$0xff]  }
 0x349   : > { %v14700_v22 = vld [vmem:[%s15770_s8 + $0x160] ss:$500 sps:$4 sm:$0xff]  }
 0x34a   : > { %8035 = vmatpush1.bf16.msra.mxu0 %v14688_v19  ;;  %8076 = vmatpush1.bf16.msra.mxu1 %v14691_v3  ;;  %v14708_v13 = vld [vmem:[%s15770_s8 + $0x54c] ss:$500 sps:$4 sm:$0xff]   ;;  %v14711_v24 = vld [vmem:[%s15770_s8 + $0x554] ss:$500 sps:$4 sm:$0xff]   ;;  %v14717_v3 = vld [vmem:[%s15770_s8 + $0x93c] ss:$500 sps:$4 sm:$0xff]  }
 0x34b   : > { %8036 = vmatprep.subr.bf16.mxu0 %v14696_v35  ;;  %8077 = vmatprep.subr.bf16.mxu1 %v14699_v50  ;;  %v14706_v35 = vld [vmem:[%s15770_s8 + $0x548] ss:$500 sps:$4 sm:$0xff]   ;;  %v14709_v50 = vld [vmem:[%s15770_s8 + $0x550] ss:$500 sps:$4 sm:$0xff]  }
 0x34c   : > { %v14714_v19 = vld [vmem:[%s15770_s8 + $0x934] ss:$500 sps:$4 sm:$0xff]  }
 0x34e   : > { %8037 = vmatpush1.bf16.msra.mxu0 %v14694_v47  ;;  %8078 = vmatpush1.bf16.msra.mxu1 %v14697_v53  ;;  %v14712_v47 = vld [vmem:[%s15770_s8 + $0x930] ss:$500 sps:$4 sm:$0xff]   ;;  %v14715_v53 = vld [vmem:[%s15770_s8 + $0x938] ss:$500 sps:$4 sm:$0xff]  }
 0x34f   : > { %8104 = vmatprep.subr.bf16.mxu0 %v14702_v14  ;;  %8145 = vmatprep.subr.bf16.mxu1 %v14705_v8  ;;  %v14720_v14 = vld [vmem:[%s15770_s8 + $0xd1c] ss:$500 sps:$4 sm:$0xff]   ;;  %v14723_v8 = vld [vmem:[%s15770_s8 + $0xd24] ss:$500 sps:$4 sm:$0xff]  }
 0x351   : > { %8055 = vmatmul.mubr.bf16.vlgmr.msra.gmra.mrb[84].mxu0 %v16532_v18  ;;  %8096 = vmatmul.mubr.bf16.vlgmr.msra.gmra.mrb[84].mxu1 %v16532_v18 }
 0x352   : > { %8105 = vmatpush1.bf16.msra.mxu0 %v14700_v22  ;;  %8146 = vmatpush1.bf16.msra.mxu1 %v14703_v42  ;;  %v14718_v22 = vld [vmem:[%s15770_s8 + $0xd18] ss:$500 sps:$4 sm:$0xff]   ;;  %v14721_v42 = vld [vmem:[%s15770_s8 + $0xd20] ss:$500 sps:$4 sm:$0xff]  }
 0x353   : > { %8106 = vmatprep.subr.bf16.mxu0 %v14708_v13  ;;  %8147 = vmatprep.subr.bf16.mxu1 %v14711_v24  ;;  %v14726_v13 = vld [vmem:[%s15770_s8 + $0x1104] ss:$500 sps:$4 sm:$0xff]   ;;  %v14729_v24 = vld [vmem:[%s15770_s8 + $0x110c] ss:$500 sps:$4 sm:$0xff]  }
 0x354   : > { %8136 = vmatprep.mubr.bf16.mxu0 %v17621_v17  ;;  %8177 = vmatprep.mubr.bf16.mxu1 %v17621_v17 }
 0x356   : > { %8107 = vmatpush1.bf16.msra.mxu0 %v14706_v35  ;;  %8148 = vmatpush1.bf16.msra.mxu1 %v14709_v50  ;;  %v14724_v35 = vld [vmem:[%s15770_s8 + $0x1100] ss:$500 sps:$4 sm:$0xff]   ;;  %v14727_v50 = vld [vmem:[%s15770_s8 + $0x1108] ss:$500 sps:$4 sm:$0xff]  }
 0x357   : > { %8108 = vmatprep.subr.bf16.mxu0 %v14714_v19  ;;  %8149 = vmatprep.subr.bf16.mxu1 %v14717_v3  ;;  %v14732_v19 = vld [vmem:[%s15770_s8 + $0x14ec] ss:$500 sps:$4 sm:$0xff]   ;;  %v14735_v3 = vld [vmem:[%s15770_s8 + $0x14f4] ss:$500 sps:$4 sm:$0xff]  }
 0x35a   : > { %8109 = vmatpush1.bf16.msra.mxu0 %v14712_v47  ;;  %8150 = vmatpush1.bf16.msra.mxu1 %v14715_v53  ;;  %v14730_v47 = vld [vmem:[%s15770_s8 + $0x14e8] ss:$500 sps:$4 sm:$0xff]   ;;  %v14733_v53 = vld [vmem:[%s15770_s8 + $0x14f0] ss:$500 sps:$4 sm:$0xff]  }
 0x35b   : > { %8110 = vmatprep.subr.bf16.mxu0 %v14720_v14  ;;  %8151 = vmatprep.subr.bf16.mxu1 %v14723_v8  ;;  %v14738_v14 = vld [vmem:[%s15770_s8 + $0x18d4] ss:$500 sps:$4 sm:$0xff]   ;;  %v14741_v8 = vld [vmem:[%s15770_s8 + $0x18dc] ss:$500 sps:$4 sm:$0xff]  }
 0x35e   : > { %8111 = vmatpush1.bf16.msra.mxu0 %v14718_v22  ;;  %8152 = vmatpush1.bf16.msra.mxu1 %v14721_v42 }
 0x35f   : > { %8112 = vmatprep.subr.bf16.mxu0 %v14726_v13  ;;  %8153 = vmatprep.subr.bf16.mxu1 %v14729_v24 }
 0x362   : > { %8113 = vmatpush1.bf16.msra.mxu0 %v14724_v35  ;;  %8154 = vmatpush1.bf16.msra.mxu1 %v14727_v50  ;;  %v14736_v50 = vld [vmem:[%s15770_s8 + $0x18d0] ss:$500 sps:$4 sm:$0xff]  }
 0x363   : > { %8114 = vmatprep.subr.bf16.mxu0 %v14732_v19  ;;  %8155 = vmatprep.subr.bf16.mxu1 %v14735_v3  ;;  %v14739_v19 = vld [vmem:[%s15770_s8 + $0x18d8] ss:$500 sps:$4 sm:$0xff]  }
 0x364   : > { %v16734_v22 = vpop.f32.mrb[60].mxu0  ;;  %v16736_v42 = vpop.f32.mrb[60].mxu1 }
 0x365   : > { %17630 = vst [vmem:[#allocation26_spill] sm:$0xff] %v16734_v22  ;;  %17631 = vst [vmem:[#allocation27_spill] sm:$0xff] %v16736_v42  ;;  %v16738_v13 = vpop.f32.mrb[61].mxu0  ;;  %v16740_v24 = vpop.f32.mrb[61].mxu1  ;;  %v14744_v22 = vld [vmem:[%s15770_s8 + $0x1cbc] ss:$500 sps:$4 sm:$0xff]  }
 0x366   : > { %17632 = vst [vmem:[#allocation28_spill] sm:$0xff] %v16738_v13  ;;  %17633 = vst [vmem:[#allocation29_spill] sm:$0xff] %v16740_v24  ;;  %v7568_v35 = vpop.f32.mrb[62].mxu0  ;;  %8115 = vmatpush1.bf16.msra.mxu0 %v14730_v47  ;;  %8156 = vmatpush1.bf16.msra.mxu1 %v14733_v53  ;;  %v7609_v3 = vpop.f32.mrb[62].mxu1  ;;  %v14747_v13 = vld [vmem:[%s15770_s8 + $0x1cc4] ss:$500 sps:$4 sm:$0xff]  }
 0x367   : > { %v7569_v56 = vpop.f32.mrb[63].mxu0  ;;  %8116 = vmatprep.subr.bf16.mxu0 %v14738_v14  ;;  %8157 = vmatprep.subr.bf16.mxu1 %v14741_v8  ;;  %v7610_v42 = vpop.f32.mrb[63].mxu1  ;;  %v14742_v35 = vld [vmem:[%s15770_s8 + $0x1cb8] ss:$500 sps:$4 sm:$0xff]   ;;  %v14745_v47 = vld [vmem:[%s15770_s8 + $0x1cc0] ss:$500 sps:$4 sm:$0xff]  }
 0x368   : > { %v14750_v53 = vld [vmem:[%s15770_s8 + $0x174] ss:$500 sps:$4 sm:$0xff]   ;;  %v14753_v3 = vld [vmem:[%s15770_s8 + $0x17c] ss:$500 sps:$4 sm:$0xff]   ;;  %v14751_v14 = vld [vmem:[%s15770_s8 + $0x178] ss:$500 sps:$4 sm:$0xff]  }
 0x369   : > { %v14748_v56 = vld [vmem:[%s15770_s8 + $0x170] ss:$500 sps:$4 sm:$0xff]  }
 0x36a   : > { %8117 = vmatpush1.bf16.msra.mxu0 %v14736_v50  ;;  %8158 = vmatpush1.bf16.msra.mxu1 %v14739_v19  ;;  %v14756_v8 = vld [vmem:[%s15770_s8 + $0x55c] ss:$500 sps:$4 sm:$0xff]   ;;  %v14759_v42 = vld [vmem:[%s15770_s8 + $0x564] ss:$500 sps:$4 sm:$0xff]   ;;  %v14765_v19 = vld [vmem:[%s15770_s8 + $0x94c] ss:$500 sps:$4 sm:$0xff]  }
 0x36b   : > { %8118 = vmatprep.subr.bf16.mxu0 %v14744_v22  ;;  %8159 = vmatprep.subr.bf16.mxu1 %v14747_v13  ;;  %v14754_v22 = vld [vmem:[%s15770_s8 + $0x558] ss:$500 sps:$4 sm:$0xff]   ;;  %v14757_v13 = vld [vmem:[%s15770_s8 + $0x560] ss:$500 sps:$4 sm:$0xff]  }
 0x36c   : > { %v14762_v50 = vld [vmem:[%s15770_s8 + $0x944] ss:$500 sps:$4 sm:$0xff]  }
 0x36e   : > { %8119 = vmatpush1.bf16.msra.mxu0 %v14742_v35  ;;  %8160 = vmatpush1.bf16.msra.mxu1 %v14745_v47  ;;  %v14763_v35 = vld [vmem:[%s15770_s8 + $0x948] ss:$500 sps:$4 sm:$0xff]   ;;  %v14768_v47 = vld [vmem:[%s15770_s8 + $0xd2c] ss:$500 sps:$4 sm:$0xff]  }
 0x36f   : > { %8186 = vmatprep.subr.bf16.mxu0 %v14750_v53  ;;  %8227 = vmatprep.subr.bf16.mxu1 %v14753_v3  ;;  %v14771_v53 = vld [vmem:[%s15770_s8 + $0xd34] ss:$500 sps:$4 sm:$0xff]  }
 0x370   : > { %v14766_v3 = vld [vmem:[%s15770_s8 + $0xd28] ss:$500 sps:$4 sm:$0xff]  }
 0x371   : > { %8137 = vmatmul.mubr.bf16.vlgmr.msra.gmra.mrb[88].mxu0 %v16532_v18  ;;  %8178 = vmatmul.mubr.bf16.vlgmr.msra.gmra.mrb[88].mxu1 %v16532_v18  ;;  %v14760_v18 = vld [vmem:[%s15770_s8 + $0x940] ss:$500 sps:$4 sm:$0xff]  }
 0x372   : > { %8187 = vmatpush1.bf16.msra.mxu0 %v14748_v56  ;;  %8228 = vmatpush1.bf16.msra.mxu1 %v14751_v14  ;;  %v14769_v56 = vld [vmem:[%s15770_s8 + $0xd30] ss:$500 sps:$4 sm:$0xff]   ;;  %v14774_v14 = vld [vmem:[%s15770_s8 + $0x1114] ss:$500 sps:$4 sm:$0xff]  }
 0x373   : > { %8188 = vmatprep.subr.bf16.mxu0 %v14756_v8  ;;  %8229 = vmatprep.subr.bf16.mxu1 %v14759_v42  ;;  %v14777_v8 = vld [vmem:[%s15770_s8 + $0x111c] ss:$500 sps:$4 sm:$0xff]  }
 0x374   : > { %8218 = vmatprep.mubr.bf16.mxu0 %v17621_v17  ;;  %8259 = vmatprep.mubr.bf16.mxu1 %v17621_v17  ;;  %v14772_v42 = vld [vmem:[%s15770_s8 + $0x1110] ss:$500 sps:$4 sm:$0xff]  }
 0x376   : > { %8189 = vmatpush1.bf16.msra.mxu0 %v14754_v22  ;;  %8230 = vmatpush1.bf16.msra.mxu1 %v14757_v13  ;;  %v14775_v22 = vld [vmem:[%s15770_s8 + $0x1118] ss:$500 sps:$4 sm:$0xff]   ;;  %v14780_v13 = vld [vmem:[%s15770_s8 + $0x14fc] ss:$500 sps:$4 sm:$0xff]  }
 0x377   : > { %8190 = vmatprep.subr.bf16.mxu0 %v14762_v50  ;;  %8231 = vmatprep.subr.bf16.mxu1 %v14765_v19  ;;  %v14783_v50 = vld [vmem:[%s15770_s8 + $0x1504] ss:$500 sps:$4 sm:$0xff]  }
 0x378   : > { %v14778_v19 = vld [vmem:[%s15770_s8 + $0x14f8] ss:$500 sps:$4 sm:$0xff]  }
 0x37a   : > { %8191 = vmatpush1.bf16.msra.mxu0 %v14760_v18  ;;  %8232 = vmatpush1.bf16.msra.mxu1 %v14763_v35  ;;  %v14781_v18 = vld [vmem:[%s15770_s8 + $0x1500] ss:$500 sps:$4 sm:$0xff]   ;;  %v14786_v35 = vld [vmem:[%s15770_s8 + $0x18e4] ss:$500 sps:$4 sm:$0xff]  }
 0x37b   : > { %8192 = vmatprep.subr.bf16.mxu0 %v14768_v47  ;;  %8233 = vmatprep.subr.bf16.mxu1 %v14771_v53  ;;  %v14789_v47 = vld [vmem:[%s15770_s8 + $0x18ec] ss:$500 sps:$4 sm:$0xff]  }
 0x37e   : > { %8193 = vmatpush1.bf16.msra.mxu0 %v14766_v3  ;;  %8234 = vmatpush1.bf16.msra.mxu1 %v14769_v56 }
 0x37f   : > { %8194 = vmatprep.subr.bf16.mxu0 %v14774_v14  ;;  %8235 = vmatprep.subr.bf16.mxu1 %v14777_v8 }
 0x382   : > { %8195 = vmatpush1.bf16.msra.mxu0 %v14772_v42  ;;  %8236 = vmatpush1.bf16.msra.mxu1 %v14775_v22  ;;  %v14784_v42 = vld [vmem:[%s15770_s8 + $0x18e0] ss:$500 sps:$4 sm:$0xff]   ;;  %v14787_v22 = vld [vmem:[%s15770_s8 + $0x18e8] ss:$500 sps:$4 sm:$0xff]  }
 0x383   : > { %8196 = vmatprep.subr.bf16.mxu0 %v14780_v13  ;;  %8237 = vmatprep.subr.bf16.mxu1 %v14783_v50 }
 0x384   : > { %v16778_v53 = vpop.f32.mrb[64].mxu0  ;;  %v16780_v3 = vpop.f32.mrb[64].mxu1 }
 0x385   : > { %17634 = vst [vmem:[#allocation30_spill] sm:$0xff] %v16778_v53  ;;  %17635 = vst [vmem:[#allocation31_spill] sm:$0xff] %v16780_v3  ;;  %v16782_v56 = vpop.f32.mrb[65].mxu0  ;;  %v16784_v14 = vpop.f32.mrb[65].mxu1  ;;  %v14792_v53 = vld [vmem:[%s15770_s8 + $0x1ccc] ss:$500 sps:$4 sm:$0xff]  }
 0x386   : > { %17636 = vst [vmem:[#allocation32_spill] sm:$0xff] %v16782_v56  ;;  %17637 = vst [vmem:[#allocation33_spill] sm:$0xff] %v16784_v14  ;;  %v7650_v8 = vpop.f32.mrb[66].mxu0  ;;  %8197 = vmatpush1.bf16.msra.mxu0 %v14778_v19  ;;  %8238 = vmatpush1.bf16.msra.mxu1 %v14781_v18  ;;  %v7691_v13 = vpop.f32.mrb[66].mxu1  ;;  %v14795_v56 = vld [vmem:[%s15770_s8 + $0x1cd4] ss:$500 sps:$4 sm:$0xff]  }
 0x387   : > { %v7651_v50 = vpop.f32.mrb[67].mxu0  ;;  %8198 = vmatprep.subr.bf16.mxu0 %v14786_v35  ;;  %8239 = vmatprep.subr.bf16.mxu1 %v14789_v47  ;;  %v7692_v3 = vpop.f32.mrb[67].mxu1  ;;  %v14790_v8 = vld [vmem:[%s15770_s8 + $0x1cc8] ss:$500 sps:$4 sm:$0xff]   ;;  %v14793_v19 = vld [vmem:[%s15770_s8 + $0x1cd0] ss:$500 sps:$4 sm:$0xff]  }
 0x388   : > { %v14798_v18 = vld [vmem:[%s15770_s8 + $0x184] ss:$500 sps:$4 sm:$0xff]   ;;  %v14801_v13 = vld [vmem:[%s15770_s8 + $0x18c] ss:$500 sps:$4 sm:$0xff]   ;;  %v14799_v47 = vld [vmem:[%s15770_s8 + $0x188] ss:$500 sps:$4 sm:$0xff]  }
 0x389   : > { %v14796_v35 = vld [vmem:[%s15770_s8 + $0x180] ss:$500 sps:$4 sm:$0xff]  }
 0x38a   : > { %8199 = vmatpush1.bf16.msra.mxu0 %v14784_v42  ;;  %8240 = vmatpush1.bf16.msra.mxu1 %v14787_v22  ;;  %v14804_v3 = vld [vmem:[%s15770_s8 + $0x56c] ss:$500 sps:$4 sm:$0xff]   ;;  %v14807_v50 = vld [vmem:[%s15770_s8 + $0x574] ss:$500 sps:$4 sm:$0xff]   ;;  %v16798_v42 = vld [vmem:[#allocation2] sm:$0xf] }
 0x38b   : > { %8200 = vmatprep.subr.bf16.mxu0 %v14792_v53  ;;  %8241 = vmatprep.subr.bf16.mxu1 %v14795_v56  ;;  %v14802_v53 = vld [vmem:[%s15770_s8 + $0x568] ss:$500 sps:$4 sm:$0xff]   ;;  %v14805_v56 = vld [vmem:[%s15770_s8 + $0x570] ss:$500 sps:$4 sm:$0xff]  }
 0x38c   : > { %v14810_v22 = vld [vmem:[%s15770_s8 + $0x954] ss:$500 sps:$4 sm:$0xff]  }
 0x38d   : > { %v14831_v14 = vld [vmem:[%s15770_s8 + $0x1514] ss:$500 sps:$4 sm:$0xff]  }
 0x38e   : > { %8201 = vmatpush1.bf16.msra.mxu0 %v14790_v8  ;;  %8242 = vmatpush1.bf16.msra.mxu1 %v14793_v19  ;;  %v14813_v8 = vld [vmem:[%s15770_s8 + $0x95c] ss:$500 sps:$4 sm:$0xff]  }
 0x38f   : > { %8268 = vmatprep.subr.bf16.mxu0 %v14798_v18  ;;  %8309 = vmatprep.subr.bf16.mxu1 %v14801_v13  ;;  %v14808_v19 = vld [vmem:[%s15770_s8 + $0x950] ss:$500 sps:$4 sm:$0xff]   ;;  %v14811_v18 = vld [vmem:[%s15770_s8 + $0x958] ss:$500 sps:$4 sm:$0xff]  }
 0x390   : > { %v14816_v13 = vld [vmem:[%s15770_s8 + $0xd3c] ss:$500 sps:$4 sm:$0xff]  }
 0x391   : > { %8219 = vmatmul.mubr.bf16.vlgmr.msra.gmra.mrb[92].mxu0 %v16798_v42  ;;  %8260 = vmatmul.mubr.bf16.vlgmr.msra.gmra.mrb[92].mxu1 %v16798_v42 }
 0x392   : > { %8269 = vmatpush1.bf16.msra.mxu0 %v14796_v35  ;;  %8310 = vmatpush1.bf16.msra.mxu1 %v14799_v47  ;;  %v14819_v35 = vld [vmem:[%s15770_s8 + $0xd44] ss:$500 sps:$4 sm:$0xff]  }
 0x393   : > { %8270 = vmatprep.subr.bf16.mxu0 %v14804_v3  ;;  %8311 = vmatprep.subr.bf16.mxu1 %v14807_v50  ;;  %v14814_v47 = vld [vmem:[%s15770_s8 + $0xd38] ss:$500 sps:$4 sm:$0xff]   ;;  %v14817_v3 = vld [vmem:[%s15770_s8 + $0xd40] ss:$500 sps:$4 sm:$0xff]  }
 0x394   : > { %8300 = vmatprep.mubr.bf16.mxu0 %v17621_v17  ;;  %8341 = vmatprep.mubr.bf16.mxu1 %v17621_v17  ;;  %v14822_v50 = vld [vmem:[%s15770_s8 + $0x1124] ss:$500 sps:$4 sm:$0xff]  }
 0x396   : > { %8271 = vmatpush1.bf16.msra.mxu0 %v14802_v53  ;;  %8312 = vmatpush1.bf16.msra.mxu1 %v14805_v56  ;;  %v14825_v53 = vld [vmem:[%s15770_s8 + $0x112c] ss:$500 sps:$4 sm:$0xff]  }
 0x397   : > { %8272 = vmatprep.subr.bf16.mxu0 %v14810_v22  ;;  %8313 = vmatprep.subr.bf16.mxu1 %v14813_v8  ;;  %v14820_v56 = vld [vmem:[%s15770_s8 + $0x1120] ss:$500 sps:$4 sm:$0xff]   ;;  %v14823_v22 = vld [vmem:[%s15770_s8 + $0x1128] ss:$500 sps:$4 sm:$0xff]  }
 0x398   : > { %v14828_v8 = vld [vmem:[%s15770_s8 + $0x150c] ss:$500 sps:$4 sm:$0xff]  }
 0x39a   : > { %8273 = vmatpush1.bf16.msra.mxu0 %v14808_v19  ;;  %8314 = vmatpush1.bf16.msra.mxu1 %v14811_v18  ;;  %v14826_v19 = vld [vmem:[%s15770_s8 + $0x1508] ss:$500 sps:$4 sm:$0xff]   ;;  %v14829_v18 = vld [vmem:[%s15770_s8 + $0x1510] ss:$500 sps:$4 sm:$0xff]  }
 0x39b   : > { %8274 = vmatprep.subr.bf16.mxu0 %v14816_v13  ;;  %8315 = vmatprep.subr.bf16.mxu1 %v14819_v35  ;;  %v14834_v13 = vld [vmem:[%s15770_s8 + $0x18f4] ss:$500 sps:$4 sm:$0xff]   ;;  %v14837_v35 = vld [vmem:[%s15770_s8 + $0x18fc] ss:$500 sps:$4 sm:$0xff]  }
 0x39e   : > { %8275 = vmatpush1.bf16.msra.mxu0 %v14814_v47  ;;  %8316 = vmatpush1.bf16.msra.mxu1 %v14817_v3 }
 0x39f   : > { %8276 = vmatprep.subr.bf16.mxu0 %v14822_v50  ;;  %8317 = vmatprep.subr.bf16.mxu1 %v14825_v53 }
 0x3a2   : > { %8277 = vmatpush1.bf16.msra.mxu0 %v14820_v56  ;;  %8318 = vmatpush1.bf16.msra.mxu1 %v14823_v22  ;;  %v14832_v22 = vld [vmem:[%s15770_s8 + $0x18f0] ss:$500 sps:$4 sm:$0xff]  }
 0x3a3   : > { %8278 = vmatprep.subr.bf16.mxu0 %v14828_v8  ;;  %8319 = vmatprep.subr.bf16.mxu1 %v14831_v14  ;;  %v14835_v14 = vld [vmem:[%s15770_s8 + $0x18f8] ss:$500 sps:$4 sm:$0xff]  }
 0x3a4   : > { %v16824_v47 = vpop.f32.mrb[68].mxu0  ;;  %v16826_v3 = vpop.f32.mrb[68].mxu1 }
 0x3a5   : > { %17638 = vst [vmem:[#allocation34_spill] sm:$0xff] %v16824_v47  ;;  %17639 = vst [vmem:[#allocation35_spill] sm:$0xff] %v16826_v3  ;;  %v16828_v50 = vpop.f32.mrb[69].mxu0  ;;  %v16830_v53 = vpop.f32.mrb[69].mxu1  ;;  %v14840_v47 = vld [vmem:[%s15770_s8 + $0x1cdc] ss:$500 sps:$4 sm:$0xff]  }
 0x3a6   : > { %17640 = vst [vmem:[#allocation36_spill] sm:$0xff] %v16828_v50  ;;  %17641 = vst [vmem:[#allocation37_spill] sm:$0xff] %v16830_v53  ;;  %v7732_v56 = vpop.f32.mrb[70].mxu0  ;;  %8279 = vmatpush1.bf16.msra.mxu0 %v14826_v19  ;;  %8320 = vmatpush1.bf16.msra.mxu1 %v14829_v18  ;;  %v7773_v8 = vpop.f32.mrb[70].mxu1  ;;  %v14843_v50 = vld [vmem:[%s15770_s8 + $0x1ce4] ss:$500 sps:$4 sm:$0xff]  }
 0x3a7   : > { %v7733_v24 = vpop.f32.mrb[71].mxu0  ;;  %8280 = vmatprep.subr.bf16.mxu0 %v14834_v13  ;;  %8321 = vmatprep.subr.bf16.mxu1 %v14837_v35  ;;  %v7774_v3 = vpop.f32.mrb[71].mxu1  ;;  %v14838_v56 = vld [vmem:[%s15770_s8 + $0x1cd8] ss:$500 sps:$4 sm:$0xff]   ;;  %v14841_v19 = vld [vmem:[%s15770_s8 + $0x1ce0] ss:$500 sps:$4 sm:$0xff]  }
 0x3a8   : > { %v14846_v18 = vld [vmem:[%s15770_s8 + $0x194] ss:$500 sps:$4 sm:$0xff]   ;;  %v14849_v8 = vld [vmem:[%s15770_s8 + $0x19c] ss:$500 sps:$4 sm:$0xff]   ;;  %v14847_v13 = vld [vmem:[%s15770_s8 + $0x198] ss:$500 sps:$4 sm:$0xff]  }
 0x3a9   : > { %v14844_v24 = vld [vmem:[%s15770_s8 + $0x190] ss:$500 sps:$4 sm:$0xff]  }
 0x3aa   : > { %8281 = vmatpush1.bf16.msra.mxu0 %v14832_v22  ;;  %8322 = vmatpush1.bf16.msra.mxu1 %v14835_v14  ;;  %v14852_v35 = vld [vmem:[%s15770_s8 + $0x57c] ss:$500 sps:$4 sm:$0xff]   ;;  %v14855_v3 = vld [vmem:[%s15770_s8 + $0x584] ss:$500 sps:$4 sm:$0xff]   ;;  %v14861_v14 = vld [vmem:[%s15770_s8 + $0x96c] ss:$500 sps:$4 sm:$0xff]  }
 0x3ab   : > { %8282 = vmatprep.subr.bf16.mxu0 %v14840_v47  ;;  %8323 = vmatprep.subr.bf16.mxu1 %v14843_v50  ;;  %v14850_v47 = vld [vmem:[%s15770_s8 + $0x578] ss:$500 sps:$4 sm:$0xff]   ;;  %v14853_v50 = vld [vmem:[%s15770_s8 + $0x580] ss:$500 sps:$4 sm:$0xff]  }
 0x3ac   : > { %v14858_v22 = vld [vmem:[%s15770_s8 + $0x964] ss:$500 sps:$4 sm:$0xff]  }
 0x3ae   : > { %8283 = vmatpush1.bf16.msra.mxu0 %v14838_v56  ;;  %8324 = vmatpush1.bf16.msra.mxu1 %v14841_v19  ;;  %v14856_v56 = vld [vmem:[%s15770_s8 + $0x960] ss:$500 sps:$4 sm:$0xff]   ;;  %v14859_v19 = vld [vmem:[%s15770_s8 + $0x968] ss:$500 sps:$4 sm:$0xff]  }
 0x3af   : > { %8350 = vmatprep.subr.bf16.mxu0 %v14846_v18  ;;  %8391 = vmatprep.subr.bf16.mxu1 %v14849_v8  ;;  %v14864_v18 = vld [vmem:[%s15770_s8 + $0xd4c] ss:$500 sps:$4 sm:$0xff]   ;;  %v14867_v8 = vld [vmem:[%s15770_s8 + $0xd54] ss:$500 sps:$4 sm:$0xff]  }
 0x3b1   : > { %8301 = vmatmul.mubr.bf16.vlgmr.msra.gmra.mrb[96].mxu0 %v16798_v42  ;;  %8342 = vmatmul.mubr.bf16.vlgmr.msra.gmra.mrb[96].mxu1 %v16798_v42 }
 0x3b2   : > { %8351 = vmatpush1.bf16.msra.mxu0 %v14844_v24  ;;  %8392 = vmatpush1.bf16.msra.mxu1 %v14847_v13  ;;  %v14862_v24 = vld [vmem:[%s15770_s8 + $0xd48] ss:$500 sps:$4 sm:$0xff]   ;;  %v14865_v13 = vld [vmem:[%s15770_s8 + $0xd50] ss:$500 sps:$4 sm:$0xff]  }
 0x3b3   : > { %8352 = vmatprep.subr.bf16.mxu0 %v14852_v35  ;;  %8393 = vmatprep.subr.bf16.mxu1 %v14855_v3  ;;  %v14870_v35 = vld [vmem:[%s15770_s8 + $0x1134] ss:$500 sps:$4 sm:$0xff]   ;;  %v14873_v3 = vld [vmem:[%s15770_s8 + $0x113c] ss:$500 sps:$4 sm:$0xff]  }
 0x3b4   : > { %8382 = vmatprep.mubr.bf16.mxu0 %v17621_v17  ;;  %8423 = vmatprep.mubr.bf16.mxu1 %v17621_v17 }
 0x3b6   : > { %8353 = vmatpush1.bf16.msra.mxu0 %v14850_v47  ;;  %8394 = vmatpush1.bf16.msra.mxu1 %v14853_v50  ;;  %v14868_v47 = vld [vmem:[%s15770_s8 + $0x1130] ss:$500 sps:$4 sm:$0xff]   ;;  %v14871_v50 = vld [vmem:[%s15770_s8 + $0x1138] ss:$500 sps:$4 sm:$0xff]  }
 0x3b7   : > { %8354 = vmatprep.subr.bf16.mxu0 %v14858_v22  ;;  %8395 = vmatprep.subr.bf16.mxu1 %v14861_v14  ;;  %v14876_v22 = vld [vmem:[%s15770_s8 + $0x151c] ss:$500 sps:$4 sm:$0xff]   ;;  %v14879_v14 = vld [vmem:[%s15770_s8 + $0x1524] ss:$500 sps:$4 sm:$0xff]  }
 0x3ba   : > { %8355 = vmatpush1.bf16.msra.mxu0 %v14856_v56  ;;  %8396 = vmatpush1.bf16.msra.mxu1 %v14859_v19  ;;  %v14874_v56 = vld [vmem:[%s15770_s8 + $0x1518] ss:$500 sps:$4 sm:$0xff]   ;;  %v14877_v19 = vld [vmem:[%s15770_s8 + $0x1520] ss:$500 sps:$4 sm:$0xff]  }
 0x3bb   : > { %8356 = vmatprep.subr.bf16.mxu0 %v14864_v18  ;;  %8397 = vmatprep.subr.bf16.mxu1 %v14867_v8  ;;  %v14882_v18 = vld [vmem:[%s15770_s8 + $0x1904] ss:$500 sps:$4 sm:$0xff]   ;;  %v14885_v8 = vld [vmem:[%s15770_s8 + $0x190c] ss:$500 sps:$4 sm:$0xff]  }
 0x3be   : > { %8357 = vmatpush1.bf16.msra.mxu0 %v14862_v24  ;;  %8398 = vmatpush1.bf16.msra.mxu1 %v14865_v13 }
 0x3bf   : > { %8358 = vmatprep.subr.bf16.mxu0 %v14870_v35  ;;  %8399 = vmatprep.subr.bf16.mxu1 %v14873_v3 }
 0x3c2   : > { %8359 = vmatpush1.bf16.msra.mxu0 %v14868_v47  ;;  %8400 = vmatpush1.bf16.msra.mxu1 %v14871_v50  ;;  %v14880_v50 = vld [vmem:[%s15770_s8 + $0x1900] ss:$500 sps:$4 sm:$0xff]  }
 0x3c3   : > { %8360 = vmatprep.subr.bf16.mxu0 %v14876_v22  ;;  %8401 = vmatprep.subr.bf16.mxu1 %v14879_v14  ;;  %v14883_v22 = vld [vmem:[%s15770_s8 + $0x1908] ss:$500 sps:$4 sm:$0xff]  }
 0x3c4   : > { %v16868_v24 = vpop.f32.mrb[72].mxu0  ;;  %v16870_v13 = vpop.f32.mrb[72].mxu1 }
 0x3c5   : > { %17642 = vst [vmem:[#allocation38_spill] sm:$0xff] %v16868_v24  ;;  %17643 = vst [vmem:[#allocation39_spill] sm:$0xff] %v16870_v13  ;;  %v16872_v35 = vpop.f32.mrb[73].mxu0  ;;  %v16874_v3 = vpop.f32.mrb[73].mxu1  ;;  %v14888_v24 = vld [vmem:[%s15770_s8 + $0x1cec] ss:$500 sps:$4 sm:$0xff]  }
 0x3c6   : > { %17644 = vst [vmem:[#allocation40_spill] sm:$0xff] %v16872_v35  ;;  %17645 = vst [vmem:[#allocation41_spill] sm:$0xff] %v16874_v3  ;;  %v7814_v47 = vpop.f32.mrb[74].mxu0  ;;  %8361 = vmatpush1.bf16.msra.mxu0 %v14874_v56  ;;  %8402 = vmatpush1.bf16.msra.mxu1 %v14877_v19  ;;  %v7855_v14 = vpop.f32.mrb[74].mxu1  ;;  %v14891_v35 = vld [vmem:[%s15770_s8 + $0x1cf4] ss:$500 sps:$4 sm:$0xff]  }
 0x3c7   : > { %v7815_v53 = vpop.f32.mrb[75].mxu0  ;;  %8362 = vmatprep.subr.bf16.mxu0 %v14882_v18  ;;  %8403 = vmatprep.subr.bf16.mxu1 %v14885_v8  ;;  %v7856_v13 = vpop.f32.mrb[75].mxu1  ;;  %v14886_v47 = vld [vmem:[%s15770_s8 + $0x1ce8] ss:$500 sps:$4 sm:$0xff]   ;;  %v14889_v56 = vld [vmem:[%s15770_s8 + $0x1cf0] ss:$500 sps:$4 sm:$0xff]  }
 0x3c8   : > { %v14894_v19 = vld [vmem:[%s15770_s8 + $0x1a4] ss:$500 sps:$4 sm:$0xff]   ;;  %v14897_v14 = vld [vmem:[%s15770_s8 + $0x1ac] ss:$500 sps:$4 sm:$0xff]   ;;  %v14895_v18 = vld [vmem:[%s15770_s8 + $0x1a8] ss:$500 sps:$4 sm:$0xff]  }
 0x3c9   : > { %v14892_v53 = vld [vmem:[%s15770_s8 + $0x1a0] ss:$500 sps:$4 sm:$0xff]  }
 0x3ca   : > { %8363 = vmatpush1.bf16.msra.mxu0 %v14880_v50  ;;  %8404 = vmatpush1.bf16.msra.mxu1 %v14883_v22  ;;  %v14900_v8 = vld [vmem:[%s15770_s8 + $0x58c] ss:$500 sps:$4 sm:$0xff]   ;;  %v14903_v13 = vld [vmem:[%s15770_s8 + $0x594] ss:$500 sps:$4 sm:$0xff]   ;;  %v14909_v22 = vld [vmem:[%s15770_s8 + $0x97c] ss:$500 sps:$4 sm:$0xff]  }
 0x3cb   : > { %8364 = vmatprep.subr.bf16.mxu0 %v14888_v24  ;;  %8405 = vmatprep.subr.bf16.mxu1 %v14891_v35  ;;  %v14898_v24 = vld [vmem:[%s15770_s8 + $0x588] ss:$500 sps:$4 sm:$0xff]   ;;  %v14901_v35 = vld [vmem:[%s15770_s8 + $0x590] ss:$500 sps:$4 sm:$0xff]  }
 0x3cc   : > { %v14906_v50 = vld [vmem:[%s15770_s8 + $0x974] ss:$500 sps:$4 sm:$0xff]  }
 0x3ce   : > { %8365 = vmatpush1.bf16.msra.mxu0 %v14886_v47  ;;  %8406 = vmatpush1.bf16.msra.mxu1 %v14889_v56  ;;  %v14904_v47 = vld [vmem:[%s15770_s8 + $0x970] ss:$500 sps:$4 sm:$0xff]   ;;  %v14907_v56 = vld [vmem:[%s15770_s8 + $0x978] ss:$500 sps:$4 sm:$0xff]  }
 0x3cf   : > { %8432 = vmatprep.subr.bf16.mxu0 %v14894_v19  ;;  %8473 = vmatprep.subr.bf16.mxu1 %v14897_v14  ;;  %v14912_v19 = vld [vmem:[%s15770_s8 + $0xd5c] ss:$500 sps:$4 sm:$0xff]   ;;  %v14915_v14 = vld [vmem:[%s15770_s8 + $0xd64] ss:$500 sps:$4 sm:$0xff]  }
 0x3d1   : > { %8383 = vmatmul.mubr.bf16.vlgmr.msra.gmra.mrb[100].mxu0 %v16798_v42  ;;  %8424 = vmatmul.mubr.bf16.vlgmr.msra.gmra.mrb[100].mxu1 %v16798_v42 }
 0x3d2   : > { %8433 = vmatpush1.bf16.msra.mxu0 %v14892_v53  ;;  %8474 = vmatpush1.bf16.msra.mxu1 %v14895_v18  ;;  %v14910_v53 = vld [vmem:[%s15770_s8 + $0xd58] ss:$500 sps:$4 sm:$0xff]   ;;  %v14913_v18 = vld [vmem:[%s15770_s8 + $0xd60] ss:$500 sps:$4 sm:$0xff]  }
 0x3d3   : > { %8434 = vmatprep.subr.bf16.mxu0 %v14900_v8  ;;  %8475 = vmatprep.subr.bf16.mxu1 %v14903_v13  ;;  %v14918_v8 = vld [vmem:[%s15770_s8 + $0x1144] ss:$500 sps:$4 sm:$0xff]   ;;  %v14921_v13 = vld [vmem:[%s15770_s8 + $0x114c] ss:$500 sps:$4 sm:$0xff]  }
 0x3d4   : > { %8464 = vmatprep.mubr.bf16.mxu0 %v17621_v17  ;;  %8505 = vmatprep.mubr.bf16.mxu1 %v17621_v17 }
 0x3d6   : > { %8435 = vmatpush1.bf16.msra.mxu0 %v14898_v24  ;;  %8476 = vmatpush1.bf16.msra.mxu1 %v14901_v35  ;;  %v14916_v24 = vld [vmem:[%s15770_s8 + $0x1140] ss:$500 sps:$4 sm:$0xff]   ;;  %v14919_v35 = vld [vmem:[%s15770_s8 + $0x1148] ss:$500 sps:$4 sm:$0xff]  }
 0x3d7   : > { %8436 = vmatprep.subr.bf16.mxu0 %v14906_v50  ;;  %8477 = vmatprep.subr.bf16.mxu1 %v14909_v22  ;;  %v14924_v50 = vld [vmem:[%s15770_s8 + $0x152c] ss:$500 sps:$4 sm:$0xff]   ;;  %v14927_v22 = vld [vmem:[%s15770_s8 + $0x1534] ss:$500 sps:$4 sm:$0xff]  }
 0x3da   : > { %8437 = vmatpush1.bf16.msra.mxu0 %v14904_v47  ;;  %8478 = vmatpush1.bf16.msra.mxu1 %v14907_v56  ;;  %v14922_v47 = vld [vmem:[%s15770_s8 + $0x1528] ss:$500 sps:$4 sm:$0xff]   ;;  %v14925_v56 = vld [vmem:[%s15770_s8 + $0x1530] ss:$500 sps:$4 sm:$0xff]  }
 0x3db   : > { %8438 = vmatprep.subr.bf16.mxu0 %v14912_v19  ;;  %8479 = vmatprep.subr.bf16.mxu1 %v14915_v14  ;;  %v14930_v19 = vld [vmem:[%s15770_s8 + $0x1914] ss:$500 sps:$4 sm:$0xff]   ;;  %v14933_v14 = vld [vmem:[%s15770_s8 + $0x191c] ss:$500 sps:$4 sm:$0xff]  }
 0x3de   : > { %8439 = vmatpush1.bf16.msra.mxu0 %v14910_v53  ;;  %8480 = vmatpush1.bf16.msra.mxu1 %v14913_v18 }
 0x3df   : > { %8440 = vmatprep.subr.bf16.mxu0 %v14918_v8  ;;  %8481 = vmatprep.subr.bf16.mxu1 %v14921_v13 }
 0x3e2   : > { %8441 = vmatpush1.bf16.msra.mxu0 %v14916_v24  ;;  %8482 = vmatpush1.bf16.msra.mxu1 %v14919_v35  ;;  %v14928_v35 = vld [vmem:[%s15770_s8 + $0x1910] ss:$500 sps:$4 sm:$0xff]  }
 0x3e3   : > { %8442 = vmatprep.subr.bf16.mxu0 %v14924_v50  ;;  %8483 = vmatprep.subr.bf16.mxu1 %v14927_v22  ;;  %v14931_v50 = vld [vmem:[%s15770_s8 + $0x1918] ss:$500 sps:$4 sm:$0xff]  }
 0x3e4   : > { %v16912_v53 = vpop.f32.mrb[76].mxu0  ;;  %v16914_v18 = vpop.f32.mrb[76].mxu1 }
 0x3e5   : > { %17646 = vst [vmem:[#allocation42_spill] sm:$0xff] %v16912_v53  ;;  %17647 = vst [vmem:[#allocation43_spill] sm:$0xff] %v16914_v18  ;;  %v16916_v8 = vpop.f32.mrb[77].mxu0  ;;  %v16918_v13 = vpop.f32.mrb[77].mxu1  ;;  %v14936_v53 = vld [vmem:[%s15770_s8 + $0x1cfc] ss:$500 sps:$4 sm:$0xff]  }
 0x3e6   : > { %17648 = vst [vmem:[#allocation44_spill] sm:$0xff] %v16916_v8  ;;  %17649 = vst [vmem:[#allocation45_spill] sm:$0xff] %v16918_v13  ;;  %v7896_v24 = vpop.f32.mrb[78].mxu0  ;;  %8443 = vmatpush1.bf16.msra.mxu0 %v14922_v47  ;;  %8484 = vmatpush1.bf16.msra.mxu1 %v14925_v56  ;;  %v7937_v22 = vpop.f32.mrb[78].mxu1  ;;  %v14939_v8 = vld [vmem:[%s15770_s8 + $0x1d04] ss:$500 sps:$4 sm:$0xff]  }
 0x3e7   : > { %v7897_v3 = vpop.f32.mrb[79].mxu0  ;;  %8444 = vmatprep.subr.bf16.mxu0 %v14930_v19  ;;  %8485 = vmatprep.subr.bf16.mxu1 %v14933_v14  ;;  %v7938_v18 = vpop.f32.mrb[79].mxu1  ;;  %v14934_v24 = vld [vmem:[%s15770_s8 + $0x1cf8] ss:$500 sps:$4 sm:$0xff]   ;;  %v14937_v47 = vld [vmem:[%s15770_s8 + $0x1d00] ss:$500 sps:$4 sm:$0xff]  }
 0x3e8   : > { %v14942_v56 = vld [vmem:[%s15770_s8 + $0x1b4] ss:$500 sps:$4 sm:$0xff]   ;;  %v14945_v22 = vld [vmem:[%s15770_s8 + $0x1bc] ss:$500 sps:$4 sm:$0xff]   ;;  %v14943_v19 = vld [vmem:[%s15770_s8 + $0x1b8] ss:$500 sps:$4 sm:$0xff]  }
 0x3e9   : > { %v14940_v3 = vld [vmem:[%s15770_s8 + $0x1b0] ss:$500 sps:$4 sm:$0xff]  }
 0x3ea   : > { %8445 = vmatpush1.bf16.msra.mxu0 %v14928_v35  ;;  %8486 = vmatpush1.bf16.msra.mxu1 %v14931_v50  ;;  %v14948_v14 = vld [vmem:[%s15770_s8 + $0x59c] ss:$500 sps:$4 sm:$0xff]   ;;  %v14951_v18 = vld [vmem:[%s15770_s8 + $0x5a4] ss:$500 sps:$4 sm:$0xff]   ;;  %v14957_v50 = vld [vmem:[%s15770_s8 + $0x98c] ss:$500 sps:$4 sm:$0xff]  }
 0x3eb   : > { %8446 = vmatprep.subr.bf16.mxu0 %v14936_v53  ;;  %8487 = vmatprep.subr.bf16.mxu1 %v14939_v8  ;;  %v14946_v53 = vld [vmem:[%s15770_s8 + $0x598] ss:$500 sps:$4 sm:$0xff]   ;;  %v14949_v8 = vld [vmem:[%s15770_s8 + $0x5a0] ss:$500 sps:$4 sm:$0xff]  }
 0x3ec   : > { %v14954_v35 = vld [vmem:[%s15770_s8 + $0x984] ss:$500 sps:$4 sm:$0xff]  }
 0x3ee   : > { %8447 = vmatpush1.bf16.msra.mxu0 %v14934_v24  ;;  %8488 = vmatpush1.bf16.msra.mxu1 %v14937_v47  ;;  %v14952_v24 = vld [vmem:[%s15770_s8 + $0x980] ss:$500 sps:$4 sm:$0xff]   ;;  %v14955_v47 = vld [vmem:[%s15770_s8 + $0x988] ss:$500 sps:$4 sm:$0xff]  }
 0x3ef   : > { %8514 = vmatprep.subr.bf16.mxu0 %v14942_v56  ;;  %8555 = vmatprep.subr.bf16.mxu1 %v14945_v22  ;;  %v14960_v56 = vld [vmem:[%s15770_s8 + $0xd6c] ss:$500 sps:$4 sm:$0xff]   ;;  %v14963_v22 = vld [vmem:[%s15770_s8 + $0xd74] ss:$500 sps:$4 sm:$0xff]  }
 0x3f1   : > { %8465 = vmatmul.mubr.bf16.vlgmr.msra.gmra.mrb[104].mxu0 %v16798_v42  ;;  %8506 = vmatmul.mubr.bf16.vlgmr.msra.gmra.mrb[104].mxu1 %v16798_v42 }
 0x3f2   : > { %8515 = vmatpush1.bf16.msra.mxu0 %v14940_v3  ;;  %8556 = vmatpush1.bf16.msra.mxu1 %v14943_v19  ;;  %v14958_v3 = vld [vmem:[%s15770_s8 + $0xd68] ss:$500 sps:$4 sm:$0xff]   ;;  %v14961_v19 = vld [vmem:[%s15770_s8 + $0xd70] ss:$500 sps:$4 sm:$0xff]  }
 0x3f3   : > { %8516 = vmatprep.subr.bf16.mxu0 %v14948_v14  ;;  %8557 = vmatprep.subr.bf16.mxu1 %v14951_v18  ;;  %v14966_v14 = vld [vmem:[%s15770_s8 + $0x1154] ss:$500 sps:$4 sm:$0xff]   ;;  %v14969_v18 = vld [vmem:[%s15770_s8 + $0x115c] ss:$500 sps:$4 sm:$0xff]  }
 0x3f4   : > { %8546 = vmatprep.mubr.bf16.mxu0 %v17621_v17  ;;  %8587 = vmatprep.mubr.bf16.mxu1 %v17621_v17 }
 0x3f6   : > { %8517 = vmatpush1.bf16.msra.mxu0 %v14946_v53  ;;  %8558 = vmatpush1.bf16.msra.mxu1 %v14949_v8  ;;  %v14964_v53 = vld [vmem:[%s15770_s8 + $0x1150] ss:$500 sps:$4 sm:$0xff]   ;;  %v14967_v8 = vld [vmem:[%s15770_s8 + $0x1158] ss:$500 sps:$4 sm:$0xff]  }
 0x3f7   : > { %8518 = vmatprep.subr.bf16.mxu0 %v14954_v35  ;;  %8559 = vmatprep.subr.bf16.mxu1 %v14957_v50  ;;  %v14972_v35 = vld [vmem:[%s15770_s8 + $0x153c] ss:$500 sps:$4 sm:$0xff]   ;;  %v14975_v50 = vld [vmem:[%s15770_s8 + $0x1544] ss:$500 sps:$4 sm:$0xff]  }
 0x3fa   : > { %8519 = vmatpush1.bf16.msra.mxu0 %v14952_v24  ;;  %8560 = vmatpush1.bf16.msra.mxu1 %v14955_v47  ;;  %v14970_v24 = vld [vmem:[%s15770_s8 + $0x1538] ss:$500 sps:$4 sm:$0xff]   ;;  %v14973_v47 = vld [vmem:[%s15770_s8 + $0x1540] ss:$500 sps:$4 sm:$0xff]  }
 0x3fb   : > { %8520 = vmatprep.subr.bf16.mxu0 %v14960_v56  ;;  %8561 = vmatprep.subr.bf16.mxu1 %v14963_v22  ;;  %v14978_v56 = vld [vmem:[%s15770_s8 + $0x1924] ss:$500 sps:$4 sm:$0xff]   ;;  %v14981_v22 = vld [vmem:[%s15770_s8 + $0x192c] ss:$500 sps:$4 sm:$0xff]  }
 0x3fe   : > { %8521 = vmatpush1.bf16.msra.mxu0 %v14958_v3  ;;  %8562 = vmatpush1.bf16.msra.mxu1 %v14961_v19 }
 0x3ff   : > { %8522 = vmatprep.subr.bf16.mxu0 %v14966_v14  ;;  %8563 = vmatprep.subr.bf16.mxu1 %v14969_v18 }
 0x402   : > { %8523 = vmatpush1.bf16.msra.mxu0 %v14964_v53  ;;  %8564 = vmatpush1.bf16.msra.mxu1 %v14967_v8  ;;  %v14976_v8 = vld [vmem:[%s15770_s8 + $0x1920] ss:$500 sps:$4 sm:$0xff]  }
 0x403   : > { %8524 = vmatprep.subr.bf16.mxu0 %v14972_v35  ;;  %8565 = vmatprep.subr.bf16.mxu1 %v14975_v50  ;;  %v14979_v35 = vld [vmem:[%s15770_s8 + $0x1928] ss:$500 sps:$4 sm:$0xff]  }
 0x404   : > { %v16956_v3 = vpop.f32.mrb[80].mxu0  ;;  %v16958_v19 = vpop.f32.mrb[80].mxu1 }
 0x405   : > { %17650 = vst [vmem:[#allocation46_spill] sm:$0xff] %v16956_v3  ;;  %17651 = vst [vmem:[#allocation47_spill] sm:$0xff] %v16958_v19  ;;  %v16960_v14 = vpop.f32.mrb[81].mxu0  ;;  %v16962_v18 = vpop.f32.mrb[81].mxu1  ;;  %v14984_v3 = vld [vmem:[%s15770_s8 + $0x1d0c] ss:$500 sps:$4 sm:$0xff]  }
 0x406   : > { %17652 = vst [vmem:[#allocation48_spill] sm:$0xff] %v16960_v14  ;;  %17653 = vst [vmem:[#allocation49_spill] sm:$0xff] %v16962_v18  ;;  %v7978_v53 = vpop.f32.mrb[82].mxu0  ;;  %8525 = vmatpush1.bf16.msra.mxu0 %v14970_v24  ;;  %8566 = vmatpush1.bf16.msra.mxu1 %v14973_v47  ;;  %v8019_v50 = vpop.f32.mrb[82].mxu1  ;;  %v14987_v14 = vld [vmem:[%s15770_s8 + $0x1d14] ss:$500 sps:$4 sm:$0xff]  }
 0x407   : > { %v7979_v13 = vpop.f32.mrb[83].mxu0  ;;  %8526 = vmatprep.subr.bf16.mxu0 %v14978_v56  ;;  %8567 = vmatprep.subr.bf16.mxu1 %v14981_v22  ;;  %v8020_v19 = vpop.f32.mrb[83].mxu1  ;;  %v14982_v53 = vld [vmem:[%s15770_s8 + $0x1d08] ss:$500 sps:$4 sm:$0xff]   ;;  %v14985_v24 = vld [vmem:[%s15770_s8 + $0x1d10] ss:$500 sps:$4 sm:$0xff]  }
 0x408   : > { %v14990_v47 = vld [vmem:[%s15770_s8 + $0x1c4] ss:$500 sps:$4 sm:$0xff]   ;;  %v14993_v50 = vld [vmem:[%s15770_s8 + $0x1cc] ss:$500 sps:$4 sm:$0xff]   ;;  %v14991_v56 = vld [vmem:[%s15770_s8 + $0x1c8] ss:$500 sps:$4 sm:$0xff]  }
 0x409   : > { %v14988_v13 = vld [vmem:[%s15770_s8 + $0x1c0] ss:$500 sps:$4 sm:$0xff]  }
 0x40a   : > { %8527 = vmatpush1.bf16.msra.mxu0 %v14976_v8  ;;  %8568 = vmatpush1.bf16.msra.mxu1 %v14979_v35  ;;  %v14996_v22 = vld [vmem:[%s15770_s8 + $0x5ac] ss:$500 sps:$4 sm:$0xff]   ;;  %v14999_v19 = vld [vmem:[%s15770_s8 + $0x5b4] ss:$500 sps:$4 sm:$0xff]   ;;  %v15005_v35 = vld [vmem:[%s15770_s8 + $0x99c] ss:$500 sps:$4 sm:$0xff]  }
 0x40b   : > { %8528 = vmatprep.subr.bf16.mxu0 %v14984_v3  ;;  %8569 = vmatprep.subr.bf16.mxu1 %v14987_v14  ;;  %v14994_v3 = vld [vmem:[%s15770_s8 + $0x5a8] ss:$500 sps:$4 sm:$0xff]   ;;  %v14997_v14 = vld [vmem:[%s15770_s8 + $0x5b0] ss:$500 sps:$4 sm:$0xff]  }
 0x40c   : > { %v15002_v8 = vld [vmem:[%s15770_s8 + $0x994] ss:$500 sps:$4 sm:$0xff]  }
 0x40e   : > { %8529 = vmatpush1.bf16.msra.mxu0 %v14982_v53  ;;  %8570 = vmatpush1.bf16.msra.mxu1 %v14985_v24  ;;  %v15000_v53 = vld [vmem:[%s15770_s8 + $0x990] ss:$500 sps:$4 sm:$0xff]   ;;  %v15003_v24 = vld [vmem:[%s15770_s8 + $0x998] ss:$500 sps:$4 sm:$0xff]  }
 0x40f   : > { %8596 = vmatprep.subr.bf16.mxu0 %v14990_v47  ;;  %8637 = vmatprep.subr.bf16.mxu1 %v14993_v50  ;;  %v15008_v47 = vld [vmem:[%s15770_s8 + $0xd7c] ss:$500 sps:$4 sm:$0xff]   ;;  %v15011_v50 = vld [vmem:[%s15770_s8 + $0xd84] ss:$500 sps:$4 sm:$0xff]  }
 0x411   : > { %8547 = vmatmul.mubr.bf16.vlgmr.msra.gmra.mrb[108].mxu0 %v16798_v42  ;;  %8588 = vmatmul.mubr.bf16.vlgmr.msra.gmra.mrb[108].mxu1 %v16798_v42 }
 0x412   : > { %8597 = vmatpush1.bf16.msra.mxu0 %v14988_v13  ;;  %8638 = vmatpush1.bf16.msra.mxu1 %v14991_v56  ;;  %v15006_v13 = vld [vmem:[%s15770_s8 + $0xd78] ss:$500 sps:$4 sm:$0xff]   ;;  %v15009_v56 = vld [vmem:[%s15770_s8 + $0xd80] ss:$500 sps:$4 sm:$0xff]  }
 0x413   : > { %8598 = vmatprep.subr.bf16.mxu0 %v14996_v22  ;;  %8639 = vmatprep.subr.bf16.mxu1 %v14999_v19  ;;  %v15014_v22 = vld [vmem:[%s15770_s8 + $0x1164] ss:$500 sps:$4 sm:$0xff]   ;;  %v15017_v19 = vld [vmem:[%s15770_s8 + $0x116c] ss:$500 sps:$4 sm:$0xff]  }
 0x414   : > { %8628 = vmatprep.mubr.bf16.mxu0 %v17621_v17  ;;  %8669 = vmatprep.mubr.bf16.mxu1 %v17621_v17 }
 0x416   : > { %8599 = vmatpush1.bf16.msra.mxu0 %v14994_v3  ;;  %8640 = vmatpush1.bf16.msra.mxu1 %v14997_v14  ;;  %v15012_v3 = vld [vmem:[%s15770_s8 + $0x1160] ss:$500 sps:$4 sm:$0xff]   ;;  %v15015_v14 = vld [vmem:[%s15770_s8 + $0x1168] ss:$500 sps:$4 sm:$0xff]  }
 0x417   : > { %8600 = vmatprep.subr.bf16.mxu0 %v15002_v8  ;;  %8641 = vmatprep.subr.bf16.mxu1 %v15005_v35  ;;  %v15020_v8 = vld [vmem:[%s15770_s8 + $0x154c] ss:$500 sps:$4 sm:$0xff]   ;;  %v15023_v35 = vld [vmem:[%s15770_s8 + $0x1554] ss:$500 sps:$4 sm:$0xff]  }
 0x41a   : > { %8601 = vmatpush1.bf16.msra.mxu0 %v15000_v53  ;;  %8642 = vmatpush1.bf16.msra.mxu1 %v15003_v24  ;;  %v15018_v53 = vld [vmem:[%s15770_s8 + $0x1548] ss:$500 sps:$4 sm:$0xff]   ;;  %v15021_v24 = vld [vmem:[%s15770_s8 + $0x1550] ss:$500 sps:$4 sm:$0xff]  }
 0x41b   : > { %8602 = vmatprep.subr.bf16.mxu0 %v15008_v47  ;;  %8643 = vmatprep.subr.bf16.mxu1 %v15011_v50  ;;  %v15026_v47 = vld [vmem:[%s15770_s8 + $0x1934] ss:$500 sps:$4 sm:$0xff]   ;;  %v15029_v50 = vld [vmem:[%s15770_s8 + $0x193c] ss:$500 sps:$4 sm:$0xff]  }
 0x41e   : > { %8603 = vmatpush1.bf16.msra.mxu0 %v15006_v13  ;;  %8644 = vmatpush1.bf16.msra.mxu1 %v15009_v56 }
 0x41f   : > { %8604 = vmatprep.subr.bf16.mxu0 %v15014_v22  ;;  %8645 = vmatprep.subr.bf16.mxu1 %v15017_v19 }
 0x422   : > { %8605 = vmatpush1.bf16.msra.mxu0 %v15012_v3  ;;  %8646 = vmatpush1.bf16.msra.mxu1 %v15015_v14  ;;  %v15024_v14 = vld [vmem:[%s15770_s8 + $0x1930] ss:$500 sps:$4 sm:$0xff]  }
 0x423   : > { %8606 = vmatprep.subr.bf16.mxu0 %v15020_v8  ;;  %8647 = vmatprep.subr.bf16.mxu1 %v15023_v35  ;;  %v15027_v8 = vld [vmem:[%s15770_s8 + $0x1938] ss:$500 sps:$4 sm:$0xff]  }
 0x424   : > { %v17000_v13 = vpop.f32.mrb[84].mxu0  ;;  %v17002_v56 = vpop.f32.mrb[84].mxu1 }
 0x425   : > { %17654 = vst [vmem:[#allocation50_spill] sm:$0xff] %v17000_v13  ;;  %17655 = vst [vmem:[#allocation51_spill] sm:$0xff] %v17002_v56  ;;  %v17004_v22 = vpop.f32.mrb[85].mxu0  ;;  %v17006_v19 = vpop.f32.mrb[85].mxu1  ;;  %v15032_v13 = vld [vmem:[%s15770_s8 + $0x1d1c] ss:$500 sps:$4 sm:$0xff]  }
 0x426   : > { %17656 = vst [vmem:[#allocation52_spill] sm:$0xff] %v17004_v22  ;;  %17657 = vst [vmem:[#allocation53_spill] sm:$0xff] %v17006_v19  ;;  %v8060_v3 = vpop.f32.mrb[86].mxu0  ;;  %8607 = vmatpush1.bf16.msra.mxu0 %v15018_v53  ;;  %8648 = vmatpush1.bf16.msra.mxu1 %v15021_v24  ;;  %v8101_v35 = vpop.f32.mrb[86].mxu1  ;;  %v15035_v22 = vld [vmem:[%s15770_s8 + $0x1d24] ss:$500 sps:$4 sm:$0xff]  }
 0x427   : > { %v8061_v18 = vpop.f32.mrb[87].mxu0  ;;  %8608 = vmatprep.subr.bf16.mxu0 %v15026_v47  ;;  %8649 = vmatprep.subr.bf16.mxu1 %v15029_v50  ;;  %v8102_v56 = vpop.f32.mrb[87].mxu1  ;;  %v15030_v3 = vld [vmem:[%s15770_s8 + $0x1d18] ss:$500 sps:$4 sm:$0xff]   ;;  %v15033_v53 = vld [vmem:[%s15770_s8 + $0x1d20] ss:$500 sps:$4 sm:$0xff]  }
 0x428   : > { %v15038_v24 = vld [vmem:[%s15770_s8 + $0x1d4] ss:$500 sps:$4 sm:$0xff]   ;;  %v15041_v35 = vld [vmem:[%s15770_s8 + $0x1dc] ss:$500 sps:$4 sm:$0xff]   ;;  %v15039_v47 = vld [vmem:[%s15770_s8 + $0x1d8] ss:$500 sps:$4 sm:$0xff]  }
 0x429   : > { %v15036_v18 = vld [vmem:[%s15770_s8 + $0x1d0] ss:$500 sps:$4 sm:$0xff]  }
 0x42a   : > { %8609 = vmatpush1.bf16.msra.mxu0 %v15024_v14  ;;  %8650 = vmatpush1.bf16.msra.mxu1 %v15027_v8  ;;  %v15044_v50 = vld [vmem:[%s15770_s8 + $0x5bc] ss:$500 sps:$4 sm:$0xff]   ;;  %v15047_v56 = vld [vmem:[%s15770_s8 + $0x5c4] ss:$500 sps:$4 sm:$0xff]   ;;  %v15053_v8 = vld [vmem:[%s15770_s8 + $0x9ac] ss:$500 sps:$4 sm:$0xff]  }
 0x42b   : > { %8610 = vmatprep.subr.bf16.mxu0 %v15032_v13  ;;  %8651 = vmatprep.subr.bf16.mxu1 %v15035_v22  ;;  %v15042_v13 = vld [vmem:[%s15770_s8 + $0x5b8] ss:$500 sps:$4 sm:$0xff]   ;;  %v15045_v22 = vld [vmem:[%s15770_s8 + $0x5c0] ss:$500 sps:$4 sm:$0xff]  }
 0x42c   : > { %v15050_v14 = vld [vmem:[%s15770_s8 + $0x9a4] ss:$500 sps:$4 sm:$0xff]  }
 0x42e   : > { %8611 = vmatpush1.bf16.msra.mxu0 %v15030_v3  ;;  %8652 = vmatpush1.bf16.msra.mxu1 %v15033_v53  ;;  %v15048_v3 = vld [vmem:[%s15770_s8 + $0x9a0] ss:$500 sps:$4 sm:$0xff]   ;;  %v15051_v53 = vld [vmem:[%s15770_s8 + $0x9a8] ss:$500 sps:$4 sm:$0xff]  }
 0x42f   : > { %8678 = vmatprep.subr.bf16.mxu0 %v15038_v24  ;;  %8719 = vmatprep.subr.bf16.mxu1 %v15041_v35  ;;  %v15056_v24 = vld [vmem:[%s15770_s8 + $0xd8c] ss:$500 sps:$4 sm:$0xff]   ;;  %v15059_v35 = vld [vmem:[%s15770_s8 + $0xd94] ss:$500 sps:$4 sm:$0xff]  }
 0x431   : > { %8629 = vmatmul.mubr.bf16.vlgmr.msra.gmra.mrb[112].mxu0 %v16798_v42  ;;  %8670 = vmatmul.mubr.bf16.vlgmr.msra.gmra.mrb[112].mxu1 %v16798_v42 }
 0x432   : > { %8679 = vmatpush1.bf16.msra.mxu0 %v15036_v18  ;;  %8720 = vmatpush1.bf16.msra.mxu1 %v15039_v47  ;;  %v15054_v18 = vld [vmem:[%s15770_s8 + $0xd88] ss:$500 sps:$4 sm:$0xff]   ;;  %v15057_v47 = vld [vmem:[%s15770_s8 + $0xd90] ss:$500 sps:$4 sm:$0xff]  }
 0x433   : > { %8680 = vmatprep.subr.bf16.mxu0 %v15044_v50  ;;  %8721 = vmatprep.subr.bf16.mxu1 %v15047_v56  ;;  %v15062_v50 = vld [vmem:[%s15770_s8 + $0x1174] ss:$500 sps:$4 sm:$0xff]   ;;  %v15065_v56 = vld [vmem:[%s15770_s8 + $0x117c] ss:$500 sps:$4 sm:$0xff]  }
 0x434   : > { %8710 = vmatprep.mubr.bf16.mxu0 %v17621_v17  ;;  %8751 = vmatprep.mubr.bf16.mxu1 %v17621_v17 }
 0x436   : > { %8681 = vmatpush1.bf16.msra.mxu0 %v15042_v13  ;;  %8722 = vmatpush1.bf16.msra.mxu1 %v15045_v22  ;;  %v15060_v13 = vld [vmem:[%s15770_s8 + $0x1170] ss:$500 sps:$4 sm:$0xff]   ;;  %v15063_v22 = vld [vmem:[%s15770_s8 + $0x1178] ss:$500 sps:$4 sm:$0xff]  }
 0x437   : > { %8682 = vmatprep.subr.bf16.mxu0 %v15050_v14  ;;  %8723 = vmatprep.subr.bf16.mxu1 %v15053_v8  ;;  %v15068_v14 = vld [vmem:[%s15770_s8 + $0x155c] ss:$500 sps:$4 sm:$0xff]   ;;  %v15071_v8 = vld [vmem:[%s15770_s8 + $0x1564] ss:$500 sps:$4 sm:$0xff]  }
 0x43a   : > { %8683 = vmatpush1.bf16.msra.mxu0 %v15048_v3  ;;  %8724 = vmatpush1.bf16.msra.mxu1 %v15051_v53  ;;  %v15066_v3 = vld [vmem:[%s15770_s8 + $0x1558] ss:$500 sps:$4 sm:$0xff]   ;;  %v15069_v53 = vld [vmem:[%s15770_s8 + $0x1560] ss:$500 sps:$4 sm:$0xff]  }
 0x43b   : > { %8684 = vmatprep.subr.bf16.mxu0 %v15056_v24  ;;  %8725 = vmatprep.subr.bf16.mxu1 %v15059_v35  ;;  %v15074_v24 = vld [vmem:[%s15770_s8 + $0x1944] ss:$500 sps:$4 sm:$0xff]   ;;  %v15077_v35 = vld [vmem:[%s15770_s8 + $0x194c] ss:$500 sps:$4 sm:$0xff]  }
 0x43e   : > { %8685 = vmatpush1.bf16.msra.mxu0 %v15054_v18  ;;  %8726 = vmatpush1.bf16.msra.mxu1 %v15057_v47 }
 0x43f   : > { %8686 = vmatprep.subr.bf16.mxu0 %v15062_v50  ;;  %8727 = vmatprep.subr.bf16.mxu1 %v15065_v56 }
 0x442   : > { %8687 = vmatpush1.bf16.msra.mxu0 %v15060_v13  ;;  %8728 = vmatpush1.bf16.msra.mxu1 %v15063_v22  ;;  %v15072_v22 = vld [vmem:[%s15770_s8 + $0x1940] ss:$500 sps:$4 sm:$0xff]  }
 0x443   : > { %8688 = vmatprep.subr.bf16.mxu0 %v15068_v14  ;;  %8729 = vmatprep.subr.bf16.mxu1 %v15071_v8  ;;  %v15075_v14 = vld [vmem:[%s15770_s8 + $0x1948] ss:$500 sps:$4 sm:$0xff]  }
 0x444   : > { %v17044_v18 = vpop.f32.mrb[88].mxu0  ;;  %v17046_v47 = vpop.f32.mrb[88].mxu1 }
 0x445   : > { %17658 = vst [vmem:[#allocation54_spill] sm:$0xff] %v17044_v18  ;;  %17659 = vst [vmem:[#allocation55_spill] sm:$0xff] %v17046_v47  ;;  %v17048_v50 = vpop.f32.mrb[89].mxu0  ;;  %v17050_v56 = vpop.f32.mrb[89].mxu1  ;;  %v15080_v18 = vld [vmem:[%s15770_s8 + $0x1d2c] ss:$500 sps:$4 sm:$0xff]  }
 0x446   : > { %17660 = vst [vmem:[#allocation56_spill] sm:$0xff] %v17048_v50  ;;  %17661 = vst [vmem:[#allocation57_spill] sm:$0xff] %v17050_v56  ;;  %v8142_v13 = vpop.f32.mrb[90].mxu0  ;;  %8689 = vmatpush1.bf16.msra.mxu0 %v15066_v3  ;;  %8730 = vmatpush1.bf16.msra.mxu1 %v15069_v53  ;;  %v8183_v8 = vpop.f32.mrb[90].mxu1  ;;  %v15083_v50 = vld [vmem:[%s15770_s8 + $0x1d34] ss:$500 sps:$4 sm:$0xff]  }
 0x447   : > { %v8143_v19 = vpop.f32.mrb[91].mxu0  ;;  %8690 = vmatprep.subr.bf16.mxu0 %v15074_v24  ;;  %8731 = vmatprep.subr.bf16.mxu1 %v15077_v35  ;;  %v8184_v47 = vpop.f32.mrb[91].mxu1  ;;  %v15078_v13 = vld [vmem:[%s15770_s8 + $0x1d28] ss:$500 sps:$4 sm:$0xff]   ;;  %v15081_v3 = vld [vmem:[%s15770_s8 + $0x1d30] ss:$500 sps:$4 sm:$0xff]  }
 0x448   : > { %v15086_v53 = vld [vmem:[%s15770_s8 + $0x1e4] ss:$500 sps:$4 sm:$0xff]   ;;  %v15089_v8 = vld [vmem:[%s15770_s8 + $0x1ec] ss:$500 sps:$4 sm:$0xff]   ;;  %v15087_v24 = vld [vmem:[%s15770_s8 + $0x1e8] ss:$500 sps:$4 sm:$0xff]  }
 0x449   : > { %v15084_v19 = vld [vmem:[%s15770_s8 + $0x1e0] ss:$500 sps:$4 sm:$0xff]  }
 0x44a   : > { %8691 = vmatpush1.bf16.msra.mxu0 %v15072_v22  ;;  %8732 = vmatpush1.bf16.msra.mxu1 %v15075_v14  ;;  %v15092_v35 = vld [vmem:[%s15770_s8 + $0x5cc] ss:$500 sps:$4 sm:$0xff]   ;;  %v15095_v47 = vld [vmem:[%s15770_s8 + $0x5d4] ss:$500 sps:$4 sm:$0xff]   ;;  %v15101_v14 = vld [vmem:[%s15770_s8 + $0x9bc] ss:$500 sps:$4 sm:$0xff]  }
 0x44b   : > { %8692 = vmatprep.subr.bf16.mxu0 %v15080_v18  ;;  %8733 = vmatprep.subr.bf16.mxu1 %v15083_v50  ;;  %v15090_v18 = vld [vmem:[%s15770_s8 + $0x5c8] ss:$500 sps:$4 sm:$0xff]   ;;  %v15093_v50 = vld [vmem:[%s15770_s8 + $0x5d0] ss:$500 sps:$4 sm:$0xff]   ;;  %v15129_v56 = vld [vmem:[%s15770_s8 + $0x1d40] ss:$500 sps:$4 sm:$0xff]  }
 0x44c   : > { %v15098_v22 = vld [vmem:[%s15770_s8 + $0x9b4] ss:$500 sps:$4 sm:$0xff]  }
 0x44e   : > { %8693 = vmatpush1.bf16.msra.mxu0 %v15078_v13  ;;  %8734 = vmatpush1.bf16.msra.mxu1 %v15081_v3  ;;  %v15099_v13 = vld [vmem:[%s15770_s8 + $0x9b8] ss:$500 sps:$4 sm:$0xff]   ;;  %v15104_v3 = vld [vmem:[%s15770_s8 + $0xd9c] ss:$500 sps:$4 sm:$0xff]  }
 0x44f   : > { %8760 = vmatprep.subr.bf16.mxu0 %v15086_v53  ;;  %8801 = vmatprep.subr.bf16.mxu1 %v15089_v8  ;;  %v15107_v53 = vld [vmem:[%s15770_s8 + $0xda4] ss:$500 sps:$4 sm:$0xff]  }
 0x450   : > { %v15102_v8 = vld [vmem:[%s15770_s8 + $0xd98] ss:$500 sps:$4 sm:$0xff]  }
 0x451   : > { %8711 = vmatmul.mubr.bf16.vlgmr.msra.gmra.mrb[116].mxu0 %v16798_v42  ;;  %8752 = vmatmul.mubr.bf16.vlgmr.msra.gmra.mrb[116].mxu1 %v16798_v42  ;;  %v15096_v42 = vld [vmem:[%s15770_s8 + $0x9b0] ss:$500 sps:$4 sm:$0xff]  }
 0x452   : > { %8761 = vmatpush1.bf16.msra.mxu0 %v15084_v19  ;;  %8802 = vmatpush1.bf16.msra.mxu1 %v15087_v24  ;;  %v15105_v19 = vld [vmem:[%s15770_s8 + $0xda0] ss:$500 sps:$4 sm:$0xff]  }
 0x453   : > { %8762 = vmatprep.subr.bf16.mxu0 %v15092_v35  ;;  %8803 = vmatprep.subr.bf16.mxu1 %v15095_v47  ;;  %v15113_v24 = vld [vmem:[%s15770_s8 + $0x118c] ss:$500 sps:$4 sm:$0xff]   ;;  %v15111_v47 = vld [vmem:[%s15770_s8 + $0x1188] ss:$500 sps:$4 sm:$0xff]  }
 0x454   : > { %8792 = vmatprep.mubr.bf16.mxu0 %v17621_v17  ;;  %8833 = vmatprep.mubr.bf16.mxu1 %v17621_v17  ;;  %v15110_v17 = vld [vmem:[%s15770_s8 + $0x1184] ss:$500 sps:$4 sm:$0xff]   ;;  %v15108_v35 = vld [vmem:[%s15770_s8 + $0x1180] ss:$500 sps:$4 sm:$0xff]  }
 0x456   : > { %8763 = vmatpush1.bf16.msra.mxu0 %v15090_v18  ;;  %8804 = vmatpush1.bf16.msra.mxu1 %v15093_v50  ;;  %v15116_v18 = vld [vmem:[%s15770_s8 + $0x156c] ss:$500 sps:$4 sm:$0xff]   ;;  %v15119_v50 = vld [vmem:[%s15770_s8 + $0x1574] ss:$500 sps:$4 sm:$0xff]  }
 0x457   : > { %8764 = vmatprep.subr.bf16.mxu0 %v15098_v22  ;;  %8805 = vmatprep.subr.bf16.mxu1 %v15101_v14  ;;  %v15114_v22 = vld [vmem:[%s15770_s8 + $0x1568] ss:$500 sps:$4 sm:$0xff]   ;;  %v15117_v14 = vld [vmem:[%s15770_s8 + $0x1570] ss:$500 sps:$4 sm:$0xff]  }
 0x45a   : > { %8765 = vmatpush1.bf16.msra.mxu0 %v15096_v42  ;;  %8806 = vmatpush1.bf16.msra.mxu1 %v15099_v13  ;;  %v15122_v42 = vld [vmem:[%s15770_s8 + $0x1954] ss:$500 sps:$4 sm:$0xff]   ;;  %v15125_v13 = vld [vmem:[%s15770_s8 + $0x195c] ss:$500 sps:$4 sm:$0xff]  }
 0x45b   : > { %8766 = vmatprep.subr.bf16.mxu0 %v15104_v3  ;;  %8807 = vmatprep.subr.bf16.mxu1 %v15107_v53 }
 0x45e   : > { %8767 = vmatpush1.bf16.msra.mxu0 %v15102_v8  ;;  %8808 = vmatpush1.bf16.msra.mxu1 %v15105_v19 }
 0x45f   : > { %8768 = vmatprep.subr.bf16.mxu0 %v15110_v17  ;;  %8809 = vmatprep.subr.bf16.mxu1 %v15113_v24  ;;  %v15120_v24 = vld [vmem:[%s15770_s8 + $0x1950] ss:$500 sps:$4 sm:$0xff]  }
 0x462   : > { %8769 = vmatpush1.bf16.msra.mxu0 %v15108_v35  ;;  %8810 = vmatpush1.bf16.msra.mxu1 %v15111_v47  ;;  %v15123_v35 = vld [vmem:[%s15770_s8 + $0x1958] ss:$500 sps:$4 sm:$0xff]  }
 0x463   : > { %8770 = vmatprep.subr.bf16.mxu0 %v15116_v18  ;;  %8811 = vmatprep.subr.bf16.mxu1 %v15119_v50 }
 0x464   : > { %v17088_v3 = vpop.f32.mrb[92].mxu0  ;;  %v17090_v53 = vpop.f32.mrb[92].mxu1 }
 0x465   : > { %17662 = vst [vmem:[#allocation58_spill] sm:$0xff] %v17088_v3  ;;  %17663 = vst [vmem:[#allocation59_spill] sm:$0xff] %v17090_v53  ;;  %v17092_v8 = vpop.f32.mrb[93].mxu0  ;;  %v17094_v19 = vpop.f32.mrb[93].mxu1  ;;  %v15128_v3 = vld [vmem:[%s15770_s8 + $0x1d3c] ss:$500 sps:$4 sm:$0xff]  }
 0x466   : > { %17664 = vst [vmem:[#allocation60_spill] sm:$0xff] %v17092_v8  ;;  %v8224_v17 = vpop.f32.mrb[94].mxu0  ;;  %8771 = vmatpush1.bf16.msra.mxu0 %v15114_v22  ;;  %8812 = vmatpush1.bf16.msra.mxu1 %v15117_v14  ;;  %v8265_v47 = vpop.f32.mrb[94].mxu1  ;;  %v15131_v53 = vld [vmem:[%s15770_s8 + $0x1d44] ss:$500 sps:$4 sm:$0xff]  }
 0x467   : > { %v8225_v18 = vpop.f32.mrb[95].mxu0  ;;  %8772 = vmatprep.subr.bf16.mxu0 %v15122_v42  ;;  %8813 = vmatprep.subr.bf16.mxu1 %v15125_v13  ;;  %v8266_v50 = vpop.f32.mrb[95].mxu1  ;;  %v15126_v8 = vld [vmem:[%s15770_s8 + $0x1d38] ss:$500 sps:$4 sm:$0xff]   ;;  %v15132_v14 = vld [vmem:[%s15770_s8 + $0x1f0] ss:$500 sps:$4 sm:$0xff]   ;;  %v8884_v42 = vpack.c.bf16 %v16072_v5, %v16072_v5 }
 0x468   : > { %v15136_v22 = vld [vmem:[%s15776_s12 + $0x4] ss:$500 sps:$4 sm:$0xff]   ;;  %v15531_v17 = vmov 0.0   ;;  %v17107_v13 = vld [vmem:[#allocation2] sm:$0xf]  ;;  %v8886_v18 = vpack.c.bf16 %v16074_v6, %v16074_v6 }
 0x469   : > { %v15141_v5 = vld [vmem:[%s15776_s12 + $0xc] ss:$500 sps:$4 sm:$0xff]   ;;  %v15146_v47 = vld [vmem:[%s15776_s12 + $0x14] ss:$500 sps:$4 sm:$0xff]  }
 0x46a   : > { %8773 = vmatpush1.bf16.msra.mxu0 %v15120_v24  ;;  %8814 = vmatpush1.bf16.msra.mxu1 %v15123_v35  ;;  %v15139_v24 = vld [vmem:[%s15776_s12 + $0x8] ss:$500 sps:$4 sm:$0xff]   ;;  %v8883_v35 = vpack.c.bf16 %v16068_v2, %v16068_v2  ;;  %v8885_v2 = vpack.c.bf16 %v16070_v4, %v16070_v4 }
 0x46b   : > { %8774 = vmatprep.subr.bf16.mxu0 %v15128_v3  ;;  %8815 = vmatprep.subr.bf16.mxu1 %v15131_v53  ;;  %v15134_v3 = vld [vmem:[%s15776_s12] ss:$500 sps:$4 sm:$0xff]   ;;  %v15142_v50 = vld [vmem:[%s15770_s8 + $0x1190] ss:$500 sps:$4 sm:$0xff]  }
 0x46c   : > { %v15137_v53 = vld [vmem:[%s15770_s8 + $0x9c0] ss:$500 sps:$4 sm:$0xff]  }
 0x46e   : > { %8775 = vmatpush1.bf16.msra.mxu0 %v15126_v8  ;;  %8816 = vmatpush1.bf16.msra.mxu1 %v15129_v56  ;;  %v15133_v56 = vld [vmem:[%s15770_s8 + $0x5d8] ss:$500 sps:$4 sm:$0xff]   ;;  %v15138_v8 = vld [vmem:[%s15770_s8 + $0xda8] ss:$500 sps:$4 sm:$0xff]  }
 0x46f   : > { %13536 = vmatprep.subr.bf16.mxu0 %v15531_v17  ;;  %9760 = vmatprep.subr.bf16.mxu1 %v15136_v22  ;;  %v15143_v22 = vld [vmem:[%s15770_s8 + $0x1578] ss:$500 sps:$4 sm:$0xff]  }
 0x471   : > { %8793 = vmatmul.mubr.bf16.vlgmr.msra.gmra.mrb[120].mxu0 %v17107_v13  ;;  %8834 = vmatmul.mubr.bf16.vlgmr.msra.gmra.mrb[120].mxu1 %v17107_v13 }
 0x472   : > { %13537 = vmatpush3.bf16.msra.mxu0 %v15132_v14  ;;  %9792 = vmatprep.mubr.bf16.mxu1 %v8884_v42  ;;  %v15144_v14 = vld [vmem:[%s15776_s12 + $0x10] ss:$500 sps:$4 sm:$0xff]  }
 0x473   : > { %13538 = vmatprep.subr.bf16.mxu0 %v15531_v17  ;;  %13552 = vmatprep.mubr.msk.bf16.mxu0 %vm15532_vm1, %v15531_v17 }
 0x476   : > { %13539 = vmatpush3.bf16.msra.mxu0 %v15133_v56  ;;  %v15151_v56 = vld [vmem:[%s15776_s12 + $0x1c] ss:$500 sps:$4 sm:$0xff]  }
 0x477   : > { %9761 = vmatpush1.bf16.xpose.msra.mxu1 %v15134_v3  ;;  %13540 = vmatprep.subr.bf16.mxu0 %v15531_v17  ;;  %v8888_v3 = vpack.c.bf16 %v16118_v49, %v16118_v49  ;;  %v15148_v49 = vld [vmem:[%s15770_s8 + $0x1d48] ss:$500 sps:$4 sm:$0xff]  }
 0x478   : > { %9800 = vmatprep.subr.bf16.mxu1 %v15141_v5 }
 0x47a   : > { %13541 = vmatpush3.bf16.msra.mxu0 %v15137_v53 }
 0x47b   : > { %13542 = vmatprep.subr.bf16.mxu0 %v15531_v17 }
 0x47e   : > { %13543 = vmatpush3.bf16.msra.mxu0 %v15138_v8  ;;  %9793 = vmatmul.mubr.bf16.vlgmr.msra.gmra.mrb[124].mxu1 %v8883_v35 }
 0x47f   : > { %9801 = vmatpush1.bf16.xpose.msra.mxu1 %v15139_v24  ;;  %9832 = vmatprep.mubr.bf16.mxu1 %v8886_v18  ;;  %v15147_v24 = vld [vmem:[%s15770_s8 + $0x1960] ss:$500 sps:$4 sm:$0xff]  }
 0x480   : > { %13544 = vmatprep.subr.bf16.mxu0 %v15531_v17  ;;  %9840 = vmatprep.subr.bf16.mxu1 %v15146_v47  ;;  %v15149_v18 = vld [vmem:[%s15776_s12 + $0x18] ss:$500 sps:$4 sm:$0xff]  }
 0x482   : > { %13545 = vmatpush3.bf16.msra.mxu0 %v15142_v50  ;;  %v8887_v50 = vpack.c.bf16 %v16112_v45, %v16112_v45  ;;  %v15152_v45 = vld [vmem:[%s15776_s12 + $0x20] ss:$500 sps:$4 sm:$0xff]  }
 0x483   : > { %13546 = vmatprep.subr.bf16.mxu0 %v15531_v17 }
 0x484   : > { %v17134_v42 = vpop.f32.mrb[96].mxu0  ;;  %v17136_v6 = vpop.f32.mrb[96].mxu1 }
 0x485   : > { %v17141_v5 = vpop.f32.mrb[97].mxu0  ;;  %v17143_v53 = vpop.f32.mrb[97].mxu1 }
 0x486   : > { %v8306_v8 = vpop.f32.mrb[98].mxu0  ;;  %13547 = vmatpush3.bf16.msra.mxu0 %v15143_v22  ;;  %9833 = vmatmul.mubr.bf16.vlgmr.msra.gmra.mrb[128].mxu1 %v8885_v2  ;;  %v8347_v4 = vpop.f32.mrb[98].mxu1  ;;  %v15154_v22 = vld [vmem:[%s15776_s12 + $0x24] ss:$500 sps:$4 sm:$0xff]   ;;  %v15157_v2 = vld [vmem:[%s15776_s12 + $0x2c] ss:$500 sps:$4 sm:$0xff]  }
 0x487   : > { %v8307_v35 = vpop.f32.mrb[99].mxu0  ;;  %9841 = vmatpush1.bf16.xpose.msra.mxu1 %v15144_v14  ;;  %9872 = vmatprep.mubr.bf16.mxu1 %v8888_v3  ;;  %v8348_v47 = vpop.f32.mrb[99].mxu1  ;;  %v8890_v14 = vpack.c.bf16 %v16120_v36, %v16120_v36  ;;  %v15155_v3 = vld [vmem:[%s15776_s12 + $0x28] ss:$500 sps:$4 sm:$0xff]   ;;  %v8889_v36 = vpack.c.bf16 %v16114_v46, %v16114_v46  ;;  %v8893_v46 = vpack.c.bf16 %v16158_v26, %v16158_v26 }
 0x488   : > { %13548 = vmatprep.subr.bf16.mxu0 %v15531_v17  ;;  %9880 = vmatprep.subr.bf16.mxu1 %v15151_v56  ;;  %v8892_v56 = vpack.c.bf16 %v16162_v29, %v16162_v29  ;;  %v15160_v8 = vld [vmem:[%s15776_s12 + $0x34] ss:$500 sps:$4 sm:$0xff]   ;;  %v15163_v4 = vld [vmem:[%s15776_s12 + $0x3c] ss:$500 sps:$4 sm:$0xff]   ;;  %v15161_v35 = vld [vmem:[%s15776_s12 + $0x38] ss:$500 sps:$4 sm:$0xff]   ;;  %v8896_v47 = vpack.c.bf16 %v16208_v15, %v16208_v15  ;;  %v8895_v26 = vpack.c.bf16 %v16202_v10, %v16202_v10 }
 0x489   : > { %v15158_v29 = vld [vmem:[%s15776_s12 + $0x30] ss:$500 sps:$4 sm:$0xff]  }
 0x48a   : > { %13549 = vmatpush3.bf16.msra.mxu0 %v15147_v24  ;;  %v8894_v24 = vpack.c.bf16 %v16164_v30, %v16164_v30  ;;  %v15166_v30 = vld [vmem:[%s15776_s12 + $0x44] ss:$500 sps:$4 sm:$0xff]  }
 0x48b   : > { %13550 = vmatprep.subr.bf16.mxu0 %v15531_v17 }
 0x48e   : > { %13551 = vmatpush3.bf16.msra.mxu0 %v15148_v49  ;;  %9873 = vmatmul.mubr.bf16.vlgmr.msra.gmra.mrb[132].mxu1 %v8887_v50  ;;  %v15169_v49 = vld [vmem:[%s15776_s12 + $0x4c] ss:$500 sps:$4 sm:$0xff]   ;;  %v15167_v50 = vld [vmem:[%s15776_s12 + $0x48] ss:$500 sps:$4 sm:$0xff]  }
 0x48f   : > { %9881 = vmatpush1.bf16.xpose.msra.mxu1 %v15149_v18  ;;  %9912 = vmatprep.mubr.bf16.mxu1 %v8890_v14  ;;  %v8898_v18 = vpack.c.bf16 %v16210_v16, %v16210_v16  ;;  %v8897_v16 = vpack.c.bf16 %v16204_v11, %v16204_v11 }
 0x490   : > { %9920 = vmatprep.subr.bf16.mxu0 %v15154_v22  ;;  %9960 = vmatprep.subr.bf16.mxu1 %v15157_v2 }
 0x491   : > { %13553 = vmatmul.mubr.bf16.vlgmr.msra.gmra.mrb[124].mxu0 %v17107_v13  ;;  %v8891_v13 = vpack.c.bf16 %v16156_v25, %v16156_v25  ;;  %v15164_v25 = vld [vmem:[%s15776_s12 + $0x40] ss:$500 sps:$4 sm:$0xff]  }
 0x492   : > { %9952 = vmatprep.mubr.bf16.mxu0 %v8892_v56  ;;  %v15172_v56 = vld [vmem:[%s15776_s12 + $0x54] ss:$500 sps:$4 sm:$0xff]  }
 0x496   : > { %9913 = vmatmul.mubr.bf16.vlgmr.msra.gmra.mrb[136].mxu1 %v8889_v36  ;;  %v15175_v36 = vld [vmem:[%s15776_s12 + $0x5c] ss:$500 sps:$4 sm:$0xff]  }
 0x497   : > { %9921 = vmatpush1.bf16.xpose.msra.mxu0 %v15152_v45  ;;  %9961 = vmatpush1.bf16.xpose.msra.mxu1 %v15155_v3  ;;  %v8900_v45 = vpack.c.bf16 %v16252_v0, %v16252_v0  ;;  %v15170_v0 = vld [vmem:[%s15776_s12 + $0x50] ss:$500 sps:$4 sm:$0xff]  }
 0x498   : > { %9992 = vmatprep.mubr.bf16.mxu1 %v8894_v24  ;;  %10000 = vmatprep.subr.bf16.mxu0 %v15160_v8  ;;  %v8902_v8 = vpack.c.bf16 %v16254_v1, %v16254_v1  ;;  %v8899_v24 = vpack.c.bf16 %v16246_v60, %v16246_v60  ;;  %v8901_v1 = vpack.c.bf16 %v16248_v61, %v16248_v61  ;;  %v15176_v60 = vld [vmem:[%s15776_s12 + $0x60] ss:$500 sps:$4 sm:$0xff]  }
 0x499   : > { %10040 = vmatprep.subr.bf16.mxu1 %v15163_v4  ;;  %v8903_v61 = vpack.c.bf16 %v16290_v54, %v16290_v54  ;;  %v15182_v54 = vld [vmem:[%s15776_s12 + $0x70] ss:$500 sps:$4 sm:$0xff]  }
 0x49e   : > { %9953 = vmatmul.mubr.bf16.vlgmr.msra.gmra.mrb[128].mxu0 %v8891_v13  ;;  %9993 = vmatmul.mubr.bf16.vlgmr.msra.gmra.mrb[140].mxu1 %v8893_v46  ;;  %v15178_v13 = vld [vmem:[%s15776_s12 + $0x64] ss:$500 sps:$4 sm:$0xff]   ;;  %v8904_v46 = vpack.c.bf16 %v16296_v58, %v16296_v58  ;;  %v8905_v58 = vpack.c.bf16 %v16292_v55, %v16292_v55  ;;  %v8907_v55 = vpack.c.bf16 %v16334_v51, %v16334_v51  ;;  %v15188_v51 = vld [vmem:[%s15776_s12 + $0x80] ss:$500 sps:$4 sm:$0xff]  }
 0x49f   : > { %10001 = vmatpush1.bf16.xpose.msra.mxu0 %v15158_v29  ;;  %10032 = vmatprep.mubr.bf16.mxu0 %v8896_v47  ;;  %v15173_v29 = vld [vmem:[%s15776_s12 + $0x58] ss:$500 sps:$4 sm:$0xff]   ;;  %v8906_v47 = vpack.c.bf16 %v16298_v59, %v16298_v59  ;;  %v8908_v59 = vpack.c.bf16 %v16340_v57, %v16340_v57  ;;  %v8909_v57 = vpack.c.bf16 %v16336_v52, %v16336_v52 }
 0x4a0   : > { %10041 = vmatpush1.bf16.xpose.msra.mxu1 %v15161_v35  ;;  %10072 = vmatprep.mubr.bf16.mxu1 %v8898_v18  ;;  %v15181_v35 = vld [vmem:[%s15776_s12 + $0x6c] ss:$500 sps:$4 sm:$0xff]   ;;  %v15187_v18 = vld [vmem:[%s15776_s12 + $0x7c] ss:$500 sps:$4 sm:$0xff]   ;;  %v8911_v52 = vpack.c.bf16 %v16380_v63, %v16380_v63 }
 0x4a1   : > { %10080 = vmatprep.subr.bf16.mxu0 %v15166_v30  ;;  %10120 = vmatprep.subr.bf16.mxu1 %v15169_v49  ;;  %v15179_v30 = vld [vmem:[%s15776_s12 + $0x68] ss:$500 sps:$4 sm:$0xff]  }
 0x4a2   : > { %v15184_v49 = vld [vmem:[%s15776_s12 + $0x74] ss:$500 sps:$4 sm:$0xff]  }
 0x4a4   : > { %v17182_v15 = vpop.f32.mrb[100].mxu0  ;;  %v17185_v22 = vpop.f32.mrb[100].mxu1 }
 0x4a5   : > { %v17189_v2 = vpop.f32.mrb[101].mxu0  ;;  %v17191_v14 = vpop.f32.mrb[101].mxu1 }
 0x4a6   : > { %v8388_v3 = vpop.f32.mrb[102].mxu0  ;;  %10033 = vmatmul.mubr.bf16.vlgmr.msra.gmra.mrb[132].mxu0 %v8895_v26  ;;  %v8429_v10 = vpop.f32.mrb[102].mxu1  ;;  %v15185_v26 = vld [vmem:[%s15776_s12 + $0x78] ss:$500 sps:$4 sm:$0xff]  }
 0x4a7   : > { %10073 = vmatmul.mubr.bf16.vlgmr.msra.gmra.mrb[144].mxu1 %v8897_v16  ;;  %v8389_v11 = vpop.f32.mrb[103].mxu0  ;;  %10081 = vmatpush1.bf16.xpose.msra.mxu0 %v15164_v25  ;;  %v8430_v4 = vpop.f32.mrb[103].mxu1  ;;  %v8910_v25 = vpack.c.bf16 %v16342_v62, %v16342_v62  ;;  %v8912_v62 = vpack.c.bf16 %v16386_v9, %v16386_v9  ;;  %v15193_v16 = vld [vmem:[%s15776_s12 + $0x8c] ss:$500 sps:$4 sm:$0xff]   ;;  %v15191_v9 = vld [vmem:[%s15776_s12 + $0x88] ss:$500 sps:$4 sm:$0xff]  }
 0x4a8   : > { %10112 = vmatprep.mubr.bf16.mxu0 %v8900_v45  ;;  %10121 = vmatpush1.bf16.xpose.msra.mxu1 %v15167_v50  ;;  %v15190_v50 = vld [vmem:[%s15776_s12 + $0x84] ss:$500 sps:$4 sm:$0xff]   ;;  %v8916_v11 = vpack.c.bf16 %v16430_v27, %v16430_v27 }
 0x4a9   : > { %10152 = vmatprep.mubr.bf16.mxu1 %v8902_v8  ;;  %10160 = vmatprep.subr.bf16.mxu0 %v15172_v56  ;;  %v8914_v56 = vpack.c.bf16 %v16388_v12, %v16388_v12  ;;  %v8913_v12 = vpack.c.bf16 %v16382_v7, %v16382_v7  ;;  %v15196_v8 = vld [vmem:[%s15776_s12 + $0x94] ss:$500 sps:$4 sm:$0xff]   ;;  %v15194_v27 = vld [vmem:[%s15776_s12 + $0x90] ss:$500 sps:$4 sm:$0xff]  }
 0x4aa   : > { %10200 = vmatprep.subr.bf16.mxu1 %v15175_v36 }
 0x4ae   : > { %10113 = vmatmul.mubr.bf16.vlgmr.msra.gmra.mrb[136].mxu0 %v8899_v24  ;;  %v8918_v24 = vpack.c.bf16 %v16432_v28, %v16432_v28  ;;  %v8917_v28 = vpack.c.bf16 %v16426_v21, %v16426_v21  ;;  %v8919_v21 = vpack.c.bf16 %v16468_v39, %v16468_v39  ;;  %v15206_v39 = vld [vmem:[%s15776_s12 + $0xb0] ss:$500 sps:$4 sm:$0xff]  }
 0x4af   : > { %10153 = vmatmul.mubr.bf16.vlgmr.msra.gmra.mrb[148].mxu1 %v8901_v1  ;;  %10161 = vmatpush1.bf16.xpose.msra.mxu0 %v15170_v0  ;;  %v15199_v0 = vld [vmem:[%s15776_s12 + $0x9c] ss:$500 sps:$4 sm:$0xff]   ;;  %v8915_v1 = vpack.c.bf16 %v16424_v20, %v16424_v20  ;;  %v15200_v20 = vld [vmem:[%s15776_s12 + $0xa0] ss:$500 sps:$4 sm:$0xff]  }
 0x4b0   : > { %10192 = vmatprep.mubr.bf16.mxu0 %v8904_v46  ;;  %10201 = vmatpush1.bf16.xpose.msra.mxu1 %v15173_v29  ;;  %v15202_v46 = vld [vmem:[%s15776_s12 + $0xa4] ss:$500 sps:$4 sm:$0xff]  }
 0x4b1   : > { %10232 = vmatprep.mubr.bf16.mxu1 %v8906_v47  ;;  %10240 = vmatprep.subr.bf16.mxu0 %v15178_v13  ;;  %v15197_v13 = vld [vmem:[%s15776_s12 + $0x98] ss:$500 sps:$4 sm:$0xff]  }
 0x4b2   : > { %10280 = vmatprep.subr.bf16.mxu1 %v15181_v35  ;;  %v8920_v35 = vpack.c.bf16 %v16474_v43, %v16474_v43  ;;  %v15205_v47 = vld [vmem:[%s15776_s12 + $0xac] ss:$500 sps:$4 sm:$0xff]   ;;  %v8921_v43 = vpack.c.bf16 %v16470_v40, %v16470_v40  ;;  %v8923_v40 = vpack.c.bf16 %v16512_v23, %v16512_v23 }
 0x4b3   : > { %v15212_v23 = vld [vmem:[%s15776_s12 + $0xc0] ss:$500 sps:$4 sm:$0xff]  }
 0x4b6   : > { %10193 = vmatmul.mubr.bf16.vlgmr.msra.gmra.mrb[140].mxu0 %v8903_v61  ;;  %v15203_v61 = vld [vmem:[%s15776_s12 + $0xa8] ss:$500 sps:$4 sm:$0xff]  }
 0x4b7   : > { %10233 = vmatmul.mubr.bf16.vlgmr.msra.gmra.mrb[152].mxu1 %v8905_v58  ;;  %10241 = vmatpush1.bf16.xpose.msra.mxu0 %v15176_v60  ;;  %v8922_v60 = vpack.c.bf16 %v16476_v44, %v16476_v44  ;;  %v8924_v44 = vpack.c.bf16 %v16518_v33, %v16518_v33  ;;  %v15211_v58 = vld [vmem:[%s15776_s12 + $0xbc] ss:$500 sps:$4 sm:$0xff]   ;;  %v8925_v33 = vpack.c.bf16 %v16514_v48, %v16514_v48 }
 0x4b8   : > { %10272 = vmatprep.mubr.bf16.mxu0 %v8908_v59  ;;  %10281 = vmatpush1.bf16.xpose.msra.mxu1 %v15179_v30  ;;  %v15208_v30 = vld [vmem:[%s15776_s12 + $0xb4] ss:$500 sps:$4 sm:$0xff]   ;;  %v15209_v59 = vld [vmem:[%s15776_s12 + $0xb8] ss:$500 sps:$4 sm:$0xff]   ;;  %v8927_v48 = vpack.c.bf16 %v16558_v31, %v16558_v31 }
 0x4b9   : > { %10312 = vmatprep.mubr.bf16.mxu1 %v8910_v25  ;;  %10320 = vmatprep.subr.bf16.mxu0 %v15184_v49  ;;  %v8926_v49 = vpack.c.bf16 %v16520_v34, %v16520_v34  ;;  %v8928_v34 = vpack.c.bf16 %v16564_v37, %v16564_v37  ;;  %v15217_v25 = vld [vmem:[%s15776_s12 + $0xcc] ss:$500 sps:$4 sm:$0xff]   ;;  %v15215_v37 = vld [vmem:[%s15776_s12 + $0xc8] ss:$500 sps:$4 sm:$0xff]  }
 0x4ba   : > { %10360 = vmatprep.subr.bf16.mxu1 %v15187_v18  ;;  %v15214_v18 = vld [vmem:[%s15776_s12 + $0xc4] ss:$500 sps:$4 sm:$0xff]  }
 0x4be   : > { %10273 = vmatmul.mubr.bf16.vlgmr.msra.gmra.mrb[144].mxu0 %v8907_v55 }
 0x4bf   : > { %10313 = vmatmul.mubr.bf16.vlgmr.msra.gmra.mrb[156].mxu1 %v8909_v57  ;;  %10321 = vmatpush1.bf16.xpose.msra.mxu0 %v15182_v54  ;;  %v8930_v54 = vpack.c.bf16 %v16566_v38, %v16566_v38  ;;  %v8929_v38 = vpack.c.bf16 %v16560_v32, %v16560_v32 }
 0x4c0   : > { %10352 = vmatprep.mubr.bf16.mxu0 %v8912_v62  ;;  %10361 = vmatpush1.bf16.xpose.msra.mxu1 %v15185_v26  ;;  %v15220_v62 = vld [vmem:[%s15776_s12 + $0xd4] ss:$500 sps:$4 sm:$0xff]  }
 0x4c1   : > { %10392 = vmatprep.mubr.bf16.mxu1 %v8914_v56  ;;  %10400 = vmatprep.subr.bf16.mxu0 %v15190_v50 }
 0x4c2   : > { %10440 = vmatprep.subr.bf16.mxu1 %v15193_v16  ;;  %v8932_v16 = vpack.c.bf16 %v16608_v41, %v16608_v41  ;;  %v15218_v41 = vld [vmem:[%s15776_s12 + $0xd0] ss:$500 sps:$4 sm:$0xff]  }
 0x4c4   : > { %v17238_v45 = vpop.f32.mrb[104].mxu0  ;;  %v17241_v3 = vpop.f32.mrb[104].mxu1 }
 0x4c5   : > { %v17245_v10 = vpop.f32.mrb[105].mxu0  ;;  %v17247_v36 = vpop.f32.mrb[105].mxu1 }
 0x4c6   : > { %v8470_v4 = vpop.f32.mrb[106].mxu0  ;;  %10353 = vmatmul.mubr.bf16.vlgmr.msra.gmra.mrb[148].mxu0 %v8911_v52  ;;  %v8511_v63 = vpop.f32.mrb[106].mxu1  ;;  %v17665_v52 = vld [vmem:[#allocation17_spill] sm:$0xff] }
 0x4c7   : > { %10393 = vmatmul.mubr.bf16.vlgmr.msra.gmra.mrb[160].mxu1 %v8913_v12  ;;  %v8471_v7 = vpop.f32.mrb[107].mxu0  ;;  %10401 = vmatpush1.bf16.xpose.msra.mxu0 %v15188_v51  ;;  %v8512_v29 = vpop.f32.mrb[107].mxu1  ;;  %v15223_v51 = vld [vmem:[%s15776_s12 + $0xdc] ss:$500 sps:$4 sm:$0xff]   ;;  %v15221_v4 = vld [vmem:[%s15776_s12 + $0xd8] ss:$500 sps:$4 sm:$0xff]  }
 0x4c8   : > { %10432 = vmatprep.mubr.bf16.mxu0 %v8916_v11  ;;  %10441 = vmatpush1.bf16.xpose.msra.mxu1 %v15191_v9  ;;  %v8934_v9 = vpack.c.bf16 %v17665_v52, %v17665_v52  ;;  %v17667_v63 = vld [vmem:[#allocation16_spill] sm:$0xff]  ;;  %v17679_v52 = vld [vmem:[#allocation27_spill] sm:$0xff] }
 0x4c9   : > { %10472 = vmatprep.mubr.bf16.mxu1 %v8918_v24  ;;  %10480 = vmatprep.subr.bf16.mxu0 %v15196_v8  ;;  %v17666_v8 = vld [vmem:[#allocation15_spill] sm:$0xff]  ;;  %v17668_v7 = vld [vmem:[#allocation20_spill] sm:$0xff] }
 0x4ca   : > { %10520 = vmatprep.subr.bf16.mxu1 %v15199_v0  ;;  %v8931_v11 = vpack.c.bf16 %v17666_v8, %v17666_v8  ;;  %v8933_v0 = vpack.c.bf16 %v17667_v63, %v17667_v63  ;;  %v15226_v24 = vld [vmem:[%s15776_s12 + $0xe4] ss:$500 sps:$4 sm:$0xff]   ;;  %v8936_v29 = vpack.c.bf16 %v17668_v7, %v17668_v7 }
 0x4cb   : > { %v17680_v8 = vld [vmem:[#allocation32_spill] sm:$0xff] }
 0x4ce   : > { %10433 = vmatmul.mubr.bf16.vlgmr.msra.gmra.mrb[152].mxu0 %v8915_v1  ;;  %v17669_v1 = vld [vmem:[#allocation21_spill] sm:$0xff] }
 0x4cf   : > { %10473 = vmatmul.mubr.bf16.vlgmr.msra.gmra.mrb[164].mxu1 %v8917_v28  ;;  %10481 = vmatpush1.bf16.xpose.msra.mxu0 %v15194_v27  ;;  %v15229_v27 = vld [vmem:[%s15776_s12 + $0xec] ss:$500 sps:$4 sm:$0xff]  }
 0x4d0   : > { %10512 = vmatprep.mubr.bf16.mxu0 %v8920_v35  ;;  %10521 = vmatpush1.bf16.xpose.msra.mxu1 %v15197_v13  ;;  %v8938_v13 = vpack.c.bf16 %v17669_v1, %v17669_v1  ;;  %v15224_v28 = vld [vmem:[%s15776_s12 + $0xe0] ss:$500 sps:$4 sm:$0xff]   ;;  %v15242_v1 = vld [vmem:[%s15776_s12 + $0x110] ss:$500 sps:$4 sm:$0xff]  }
 0x4d1   : > { %10552 = vmatprep.mubr.bf16.mxu1 %v8922_v60  ;;  %10560 = vmatprep.subr.bf16.mxu0 %v15202_v46  ;;  %v17670_v46 = vld [vmem:[#allocation18_spill] sm:$0xff]  ;;  %v17671_v60 = vld [vmem:[#allocation19_spill] sm:$0xff] }
 0x4d2   : > { %10600 = vmatprep.subr.bf16.mxu1 %v15205_v47  ;;  %v8935_v35 = vpack.c.bf16 %v17670_v46, %v17670_v46  ;;  %v15227_v47 = vld [vmem:[%s15776_s12 + $0xe8] ss:$500 sps:$4 sm:$0xff]   ;;  %v15245_v46 = vld [vmem:[%s15776_s12 + $0x118] ss:$500 sps:$4 sm:$0xff]  }
 0x4d6   : > { %10513 = vmatmul.mubr.bf16.vlgmr.msra.gmra.mrb[156].mxu0 %v8919_v21  ;;  %v15232_v21 = vld [vmem:[%s15776_s12 + $0xf4] ss:$500 sps:$4 sm:$0xff]  }
 0x4d7   : > { %10553 = vmatmul.mubr.bf16.vlgmr.msra.gmra.mrb[168].mxu1 %v8921_v43  ;;  %10561 = vmatpush1.bf16.xpose.msra.mxu0 %v15200_v20  ;;  %v8937_v20 = vpack.c.bf16 %v17671_v60, %v17671_v60  ;;  %v15250_v60 = vld [vmem:[%s15776_s12 + $0x124] ss:$500 sps:$4 sm:$0xff]  }
 0x4d8   : > { %10592 = vmatprep.mubr.bf16.mxu0 %v8924_v44  ;;  %10601 = vmatpush1.bf16.xpose.msra.mxu1 %v15203_v61  ;;  %v17672_v61 = vld [vmem:[#allocation24_spill] sm:$0xff]  ;;  %v17673_v44 = vld [vmem:[#allocation25_spill] sm:$0xff] }
 0x4d9   : > { %10632 = vmatprep.mubr.bf16.mxu1 %v8926_v49  ;;  %10640 = vmatprep.subr.bf16.mxu0 %v15208_v30  ;;  %v8940_v43 = vpack.c.bf16 %v17672_v61, %v17672_v61  ;;  %v15235_v30 = vld [vmem:[%s15776_s12 + $0xfc] ss:$500 sps:$4 sm:$0xff]   ;;  %v15253_v61 = vld [vmem:[%s15776_s12 + $0x12c] ss:$500 sps:$4 sm:$0xff]  }
 0x4da   : > { %10680 = vmatprep.subr.bf16.mxu1 %v15211_v58  ;;  %v8942_v58 = vpack.c.bf16 %v17673_v44, %v17673_v44  ;;  %v15230_v49 = vld [vmem:[%s15776_s12 + $0xf0] ss:$500 sps:$4 sm:$0xff]   ;;  %v15248_v44 = vld [vmem:[%s15776_s12 + $0x120] ss:$500 sps:$4 sm:$0xff]  }
 0x4de   : > { %10593 = vmatmul.mubr.bf16.vlgmr.msra.gmra.mrb[160].mxu0 %v8923_v40 }
 0x4df   : > { %10633 = vmatmul.mubr.bf16.vlgmr.msra.gmra.mrb[172].mxu1 %v8925_v33  ;;  %10641 = vmatpush1.bf16.xpose.msra.mxu0 %v15206_v39  ;;  %v17674_v39 = vld [vmem:[#allocation22_spill] sm:$0xff]  ;;  %v17675_v33 = vld [vmem:[#allocation23_spill] sm:$0xff] }
 0x4e0   : > { %10672 = vmatprep.mubr.bf16.mxu0 %v8928_v34  ;;  %10681 = vmatpush1.bf16.xpose.msra.mxu1 %v15209_v59  ;;  %v8939_v40 = vpack.c.bf16 %v17674_v39, %v17674_v39  ;;  %v15233_v59 = vld [vmem:[%s15776_s12 + $0xf8] ss:$500 sps:$4 sm:$0xff]   ;;  %v15251_v39 = vld [vmem:[%s15776_s12 + $0x128] ss:$500 sps:$4 sm:$0xff]  }
 0x4e1   : > { %10712 = vmatprep.mubr.bf16.mxu1 %v8930_v54  ;;  %10720 = vmatprep.subr.bf16.mxu0 %v15214_v18  ;;  %v8941_v18 = vpack.c.bf16 %v17675_v33, %v17675_v33  ;;  %v15238_v34 = vld [vmem:[%s15776_s12 + $0x104] ss:$500 sps:$4 sm:$0xff]   ;;  %v15256_v33 = vld [vmem:[%s15776_s12 + $0x134] ss:$500 sps:$4 sm:$0xff]  }
 0x4e2   : > { %10760 = vmatprep.subr.bf16.mxu1 %v15217_v25  ;;  %v17676_v25 = vld [vmem:[#allocation28_spill] sm:$0xff] }
 0x4e3   : > { %v8944_v54 = vpack.c.bf16 %v17676_v25, %v17676_v25  ;;  %v15259_v25 = vld [vmem:[%s15776_s12 + $0x13c] ss:$500 sps:$4 sm:$0xff]  }
 0x4e4   : > { %v17294_v55 = vpop.f32.mrb[108].mxu0  ;;  %v17297_v26 = vpop.f32.mrb[108].mxu1 }
 0x4e5   : > { %v17301_v57 = vpop.f32.mrb[109].mxu0  ;;  %v17303_v50 = vpop.f32.mrb[109].mxu1 }
 0x4e6   : > { %v8552_v56 = vpop.f32.mrb[110].mxu0  ;;  %10673 = vmatmul.mubr.bf16.vlgmr.msra.gmra.mrb[164].mxu0 %v8927_v48  ;;  %v8593_v31 = vpop.f32.mrb[110].mxu1  ;;  %v17677_v48 = vld [vmem:[#allocation29_spill] sm:$0xff] }
 0x4e7   : > { %10713 = vmatmul.mubr.bf16.vlgmr.msra.gmra.mrb[176].mxu1 %v8929_v38  ;;  %v8553_v32 = vpop.f32.mrb[111].mxu0  ;;  %10721 = vmatpush1.bf16.xpose.msra.mxu0 %v15212_v23  ;;  %v8594_v12 = vpop.f32.mrb[111].mxu1  ;;  %v15241_v23 = vld [vmem:[%s15776_s12 + $0x10c] ss:$500 sps:$4 sm:$0xff]   ;;  %v15239_v31 = vld [vmem:[%s15776_s12 + $0x108] ss:$500 sps:$4 sm:$0xff]  }
 0x4e8   : > { %10752 = vmatprep.mubr.bf16.mxu0 %v8932_v16  ;;  %10761 = vmatpush1.bf16.xpose.msra.mxu1 %v15215_v37  ;;  %v8946_v37 = vpack.c.bf16 %v17677_v48, %v17677_v48  ;;  %v15236_v38 = vld [vmem:[%s15776_s12 + $0x100] ss:$500 sps:$4 sm:$0xff]   ;;  %v15254_v48 = vld [vmem:[%s15776_s12 + $0x130] ss:$500 sps:$4 sm:$0xff]  }
 0x4e9   : > { %10792 = vmatprep.mubr.bf16.mxu1 %v8934_v9  ;;  %10800 = vmatprep.subr.bf16.mxu0 %v15220_v62  ;;  %v17678_v62 = vld [vmem:[#allocation26_spill] sm:$0xff]  ;;  %v8945_v9 = vpack.c.bf16 %v17679_v52, %v17679_v52 }
 0x4ea   : > { %10840 = vmatprep.subr.bf16.mxu1 %v15223_v51  ;;  %v8943_v16 = vpack.c.bf16 %v17678_v62, %v17678_v62  ;;  %v15257_v62 = vld [vmem:[%s15776_s12 + $0x138] ss:$500 sps:$4 sm:$0xff]  }
 0x4eb   : > { %v15262_v52 = vld [vmem:[%s15776_s12 + $0x144] ss:$500 sps:$4 sm:$0xff]  }
 0x4ee   : > { %10753 = vmatmul.mubr.bf16.vlgmr.msra.gmra.mrb[168].mxu0 %v8931_v11  ;;  %v8948_v11 = vpack.c.bf16 %v17680_v8, %v17680_v8  ;;  %v15265_v8 = vld [vmem:[%s15776_s12 + $0x14c] ss:$500 sps:$4 sm:$0xff]  }
 0x4ef   : > { %10793 = vmatmul.mubr.bf16.vlgmr.msra.gmra.mrb[180].mxu1 %v8933_v0  ;;  %10801 = vmatpush1.bf16.xpose.msra.mxu0 %v15218_v41  ;;  %v15244_v41 = vld [vmem:[%s15776_s12 + $0x114] ss:$500 sps:$4 sm:$0xff]   ;;  %v15247_v0 = vld [vmem:[%s15776_s12 + $0x11c] ss:$500 sps:$4 sm:$0xff]  }
 0x4f0   : > { %10832 = vmatprep.mubr.bf16.mxu0 %v8936_v29  ;;  %10841 = vmatpush1.bf16.xpose.msra.mxu1 %v15221_v4 }
 0x4f1   : > { %10872 = vmatprep.mubr.bf16.mxu1 %v8938_v13  ;;  %10880 = vmatprep.subr.bf16.mxu0 %v15226_v24  ;;  %v17681_v24 = vld [vmem:[#allocation33_spill] sm:$0xff]  ;;  %v17682_v13 = vld [vmem:[#allocation30_spill] sm:$0xff] }
 0x4f2   : > { %10920 = vmatprep.subr.bf16.mxu1 %v15229_v27  ;;  %v8950_v7 = vpack.c.bf16 %v17681_v24, %v17681_v24 }
 0x4f6   : > { %10833 = vmatmul.mubr.bf16.vlgmr.msra.gmra.mrb[172].mxu0 %v8935_v35  ;;  %v17683_v35 = vld [vmem:[#allocation31_spill] sm:$0xff] }
 0x4f7   : > { %10873 = vmatmul.mubr.bf16.vlgmr.msra.gmra.mrb[184].mxu1 %v8937_v20  ;;  %10881 = vmatpush1.bf16.xpose.msra.mxu0 %v15224_v28  ;;  %v8947_v28 = vpack.c.bf16 %v17682_v13, %v17682_v13  ;;  %v17684_v20 = vld [vmem:[#allocation36_spill] sm:$0xff] }
 0x4f8   : > { %10912 = vmatprep.mubr.bf16.mxu0 %v8940_v43  ;;  %10921 = vmatpush1.bf16.xpose.msra.mxu1 %v15227_v47  ;;  %v8949_v47 = vpack.c.bf16 %v17683_v35, %v17683_v35  ;;  %v17685_v43 = vld [vmem:[#allocation37_spill] sm:$0xff] }
 0x4f9   : > { %10952 = vmatprep.mubr.bf16.mxu1 %v8942_v58  ;;  %10960 = vmatprep.subr.bf16.mxu0 %v15232_v21  ;;  %v8952_v21 = vpack.c.bf16 %v17684_v20, %v17684_v20  ;;  %v17686_v58 = vld [vmem:[#allocation34_spill] sm:$0xff] }
 0x4fa   : > { %11000 = vmatprep.subr.bf16.mxu1 %v15235_v30  ;;  %v8954_v30 = vpack.c.bf16 %v17685_v43, %v17685_v43  ;;  %v15268_v35 = vld [vmem:[%s15776_s12 + $0x154] ss:$500 sps:$4 sm:$0xff]  }
 0x4fb   : > { %v17697_v43 = vld [vmem:[#allocation49_spill] sm:$0xff] }
 0x4fe   : > { %10913 = vmatmul.mubr.bf16.vlgmr.msra.gmra.mrb[176].mxu0 %v8939_v40  ;;  %v17687_v40 = vld [vmem:[#allocation35_spill] sm:$0xff] }
 0x4ff   : > { %10953 = vmatmul.mubr.bf16.vlgmr.msra.gmra.mrb[188].mxu1 %v8941_v18  ;;  %10961 = vmatpush1.bf16.xpose.msra.mxu0 %v15230_v49  ;;  %v8951_v49 = vpack.c.bf16 %v17686_v58, %v17686_v58  ;;  %v17688_v18 = vld [vmem:[#allocation40_spill] sm:$0xff] }
 0x500   : > { %10992 = vmatprep.mubr.bf16.mxu0 %v8944_v54  ;;  %11001 = vmatpush1.bf16.xpose.msra.mxu1 %v15233_v59  ;;  %v8953_v59 = vpack.c.bf16 %v17687_v40, %v17687_v40  ;;  %v17689_v54 = vld [vmem:[#allocation41_spill] sm:$0xff] }
 0x501   : > { %11032 = vmatprep.mubr.bf16.mxu1 %v8946_v37  ;;  %11040 = vmatprep.subr.bf16.mxu0 %v15238_v34  ;;  %v8956_v34 = vpack.c.bf16 %v17688_v18, %v17688_v18  ;;  %v17690_v37 = vld [vmem:[#allocation38_spill] sm:$0xff] }
 0x502   : > { %11080 = vmatprep.subr.bf16.mxu1 %v15241_v23  ;;  %v8958_v23 = vpack.c.bf16 %v17689_v54, %v17689_v54 }
 0x504   : > { %v17350_v56 = vpop.f32.mrb[112].mxu0  ;;  %v17353_v51 = vpop.f32.mrb[112].mxu1 }
 0x505   : > { %v17357_v32 = vpop.f32.mrb[113].mxu0  ;;  %v17359_v12 = vpop.f32.mrb[113].mxu1 }
 0x506   : > { %v8634_v4 = vpop.f32.mrb[114].mxu0  ;;  %10993 = vmatmul.mubr.bf16.vlgmr.msra.gmra.mrb[180].mxu0 %v8943_v16  ;;  %v8675_v63 = vpop.f32.mrb[114].mxu1  ;;  %v17691_v16 = vld [vmem:[#allocation39_spill] sm:$0xff] }
 0x507   : > { %11033 = vmatmul.mubr.bf16.vlgmr.msra.gmra.mrb[192].mxu1 %v8945_v9  ;;  %v8635_v29 = vpop.f32.mrb[115].mxu0  ;;  %11041 = vmatpush1.bf16.xpose.msra.mxu0 %v15236_v38  ;;  %v8676_v27 = vpop.f32.mrb[115].mxu1  ;;  %v8955_v38 = vpack.c.bf16 %v17690_v37, %v17690_v37  ;;  %v17692_v9 = vld [vmem:[#allocation44_spill] sm:$0xff] }
 0x508   : > { %11072 = vmatprep.mubr.bf16.mxu0 %v8948_v11  ;;  %11081 = vmatpush1.bf16.xpose.msra.mxu1 %v15239_v31  ;;  %v8957_v31 = vpack.c.bf16 %v17691_v16, %v17691_v16  ;;  %v17693_v11 = vld [vmem:[#allocation45_spill] sm:$0xff] }
 0x509   : > { %11112 = vmatprep.mubr.bf16.mxu1 %v8950_v7  ;;  %11120 = vmatprep.subr.bf16.mxu0 %v15244_v41  ;;  %v8960_v41 = vpack.c.bf16 %v17692_v9, %v17692_v9  ;;  %v8962_v4 = vpack.c.bf16 %v17693_v11, %v17693_v11  ;;  %v15260_v63 = vld [vmem:[%s15776_s12 + $0x140] ss:$500 sps:$4 sm:$0xff]   ;;  %v15263_v29 = vld [vmem:[%s15776_s12 + $0x148] ss:$500 sps:$4 sm:$0xff]  }
 0x50a   : > { %11160 = vmatprep.subr.bf16.mxu1 %v15247_v0  ;;  %v17694_v0 = vld [vmem:[#allocation42_spill] sm:$0xff] }
 0x50b   : > { %v8959_v24 = vpack.c.bf16 %v17694_v0, %v17694_v0 }
 0x50e   : > { %11073 = vmatmul.mubr.bf16.vlgmr.msra.gmra.mrb[184].mxu0 %v8947_v28 }
 0x50f   : > { %11113 = vmatmul.mubr.bf16.vlgmr.msra.gmra.mrb[196].mxu1 %v8949_v47  ;;  %11121 = vmatpush1.bf16.xpose.msra.mxu0 %v15242_v1  ;;  %v17695_v1 = vld [vmem:[#allocation43_spill] sm:$0xff]  ;;  %v17696_v47 = vld [vmem:[#allocation48_spill] sm:$0xff] }
 0x510   : > { %11152 = vmatprep.mubr.bf16.mxu0 %v8952_v21  ;;  %11161 = vmatpush1.bf16.xpose.msra.mxu1 %v15245_v46  ;;  %v8961_v13 = vpack.c.bf16 %v17695_v1, %v17695_v1 }
 0x511   : > { %11192 = vmatprep.mubr.bf16.mxu1 %v8954_v30  ;;  %11200 = vmatprep.subr.bf16.mxu0 %v15250_v60  ;;  %v8964_v60 = vpack.c.bf16 %v17696_v47, %v17696_v47  ;;  %v8966_v30 = vpack.c.bf16 %v17697_v43, %v17697_v43  ;;  %v8978_v43 = vpack.c.bf16 %v17094_v19, %v17094_v19 }
 0x512   : > { %11240 = vmatprep.subr.bf16.mxu1 %v15253_v61  ;;  %v15271_v61 = vld [vmem:[%s15776_s12 + $0x15c] ss:$500 sps:$4 sm:$0xff]  }
 0x516   : > { %11153 = vmatmul.mubr.bf16.vlgmr.msra.gmra.mrb[188].mxu0 %v8951_v49  ;;  %v15266_v49 = vld [vmem:[%s15776_s12 + $0x150] ss:$500 sps:$4 sm:$0xff]  }
 0x517   : > { %11193 = vmatmul.mubr.bf16.vlgmr.msra.gmra.mrb[200].mxu1 %v8953_v59  ;;  %11201 = vmatpush1.bf16.xpose.msra.mxu0 %v15248_v44  ;;  %v15269_v59 = vld [vmem:[%s15776_s12 + $0x158] ss:$500 sps:$4 sm:$0xff]  }
 0x518   : > { %11232 = vmatprep.mubr.bf16.mxu0 %v8956_v34  ;;  %11241 = vmatpush1.bf16.xpose.msra.mxu1 %v15251_v39  ;;  %v17698_v39 = vld [vmem:[#allocation46_spill] sm:$0xff] }
 0x519   : > { %11272 = vmatprep.mubr.bf16.mxu1 %v8958_v23  ;;  %11280 = vmatprep.subr.bf16.mxu0 %v15256_v33  ;;  %v8963_v40 = vpack.c.bf16 %v17698_v39, %v17698_v39  ;;  %v17699_v33 = vld [vmem:[#allocation47_spill] sm:$0xff] }
 0x51a   : > { %11320 = vmatprep.subr.bf16.mxu1 %v15259_v25  ;;  %v8965_v18 = vpack.c.bf16 %v17699_v33, %v17699_v33  ;;  %v15274_v34 = vld [vmem:[%s15776_s12 + $0x164] ss:$500 sps:$4 sm:$0xff]   ;;  %v15277_v23 = vld [vmem:[%s15776_s12 + $0x16c] ss:$500 sps:$4 sm:$0xff]   ;;  %v15287_v39 = vld [vmem:[%s15776_s12 + $0x188] ss:$500 sps:$4 sm:$0xff]  }
 0x51b   : > { %v17700_v25 = vld [vmem:[#allocation52_spill] sm:$0xff] }
 0x51c   : > { %v8968_v54 = vpack.c.bf16 %v17700_v25, %v17700_v25  ;;  %v8980_v25 = vpack.c.bf16 %v17141_v5, %v17141_v5  ;;  %v15290_v5 = vld [vmem:[%s15776_s12 + $0x190] ss:$500 sps:$4 sm:$0xff]  }
 0x51e   : > { %11233 = vmatmul.mubr.bf16.vlgmr.msra.gmra.mrb[192].mxu0 %v8955_v38  ;;  %v15272_v38 = vld [vmem:[%s15776_s12 + $0x160] ss:$500 sps:$4 sm:$0xff]  }
 0x51f   : > { %11273 = vmatmul.mubr.bf16.vlgmr.msra.gmra.mrb[204].mxu1 %v8957_v31  ;;  %11281 = vmatpush1.bf16.xpose.msra.mxu0 %v15254_v48  ;;  %v17701_v48 = vld [vmem:[#allocation53_spill] sm:$0xff] }
 0x520   : > { %11312 = vmatprep.mubr.bf16.mxu0 %v8960_v41  ;;  %11321 = vmatpush1.bf16.xpose.msra.mxu1 %v15257_v62  ;;  %v8970_v37 = vpack.c.bf16 %v17701_v48, %v17701_v48  ;;  %v17702_v62 = vld [vmem:[#allocation50_spill] sm:$0xff] }
 0x521   : > { %11352 = vmatprep.mubr.bf16.mxu1 %v8962_v4  ;;  %11360 = vmatprep.subr.bf16.mxu0 %v15262_v52  ;;  %v8967_v16 = vpack.c.bf16 %v17702_v62, %v17702_v62  ;;  %v15275_v31 = vld [vmem:[%s15776_s12 + $0x168] ss:$500 sps:$4 sm:$0xff]  }
 0x522   : > { %11400 = vmatprep.subr.bf16.mxu1 %v15265_v8  ;;  %v17703_v52 = vld [vmem:[#allocation51_spill] sm:$0xff]  ;;  %v17704_v8 = vld [vmem:[#allocation56_spill] sm:$0xff] }
 0x523   : > { %v8969_v9 = vpack.c.bf16 %v17703_v52, %v17703_v52  ;;  %v15280_v41 = vld [vmem:[%s15776_s12 + $0x174] ss:$500 sps:$4 sm:$0xff]   ;;  %v8972_v11 = vpack.c.bf16 %v17704_v8, %v17704_v8  ;;  %v15283_v4 = vld [vmem:[%s15776_s12 + $0x17c] ss:$500 sps:$4 sm:$0xff]   ;;  %v8981_v52 = vpack.c.bf16 %v17136_v6, %v17136_v6  ;;  %v8986_v8 = vpack.c.bf16 %v17191_v14, %v17191_v14 }
 0x524   : > { %v17406_v7 = vpop.f32.mrb[116].mxu0  ;;  %v17409_v27 = vpop.f32.mrb[116].mxu1  ;;  %v8985_v14 = vpack.c.bf16 %v17185_v22, %v17185_v22 }
 0x525   : > { %v17413_v28 = vpop.f32.mrb[117].mxu0  ;;  %v17415_v46 = vpop.f32.mrb[117].mxu1 }
 0x526   : > { %v8716_v20 = vpop.f32.mrb[118].mxu0  ;;  %11313 = vmatmul.mubr.bf16.vlgmr.msra.gmra.mrb[196].mxu0 %v8959_v24  ;;  %v8757_v21 = vpop.f32.mrb[118].mxu1  ;;  %v15278_v24 = vld [vmem:[%s15776_s12 + $0x170] ss:$500 sps:$4 sm:$0xff]  }
 0x527   : > { %11353 = vmatmul.mubr.bf16.vlgmr.msra.gmra.mrb[208].mxu1 %v8961_v13  ;;  %v8717_v44 = vpop.f32.mrb[119].mxu0  ;;  %11361 = vmatpush1.bf16.xpose.msra.mxu0 %v15260_v63  ;;  %v8758_v58 = vpop.f32.mrb[119].mxu1  ;;  %v17705_v63 = vld [vmem:[#allocation57_spill] sm:$0xff]  ;;  %v17708_v20 = vld [vmem:[#allocation60_spill] sm:$0xff] }
 0x528   : > { %11392 = vmatprep.mubr.bf16.mxu0 %v8964_v60  ;;  %11401 = vmatpush1.bf16.xpose.msra.mxu1 %v15263_v29  ;;  %v8974_v0 = vpack.c.bf16 %v17705_v63, %v17705_v63  ;;  %v17706_v29 = vld [vmem:[#allocation54_spill] sm:$0xff]  ;;  %v8976_v21 = vpack.c.bf16 %v17708_v20, %v17708_v20 }
 0x529   : > { %11432 = vmatprep.mubr.bf16.mxu1 %v8966_v30  ;;  %11440 = vmatprep.subr.bf16.mxu0 %v15268_v35  ;;  %v8971_v1 = vpack.c.bf16 %v17706_v29, %v17706_v29  ;;  %v15281_v13 = vld [vmem:[%s15776_s12 + $0x178] ss:$500 sps:$4 sm:$0xff]   ;;  %v15284_v30 = vld [vmem:[%s15776_s12 + $0x180] ss:$500 sps:$4 sm:$0xff]   ;;  %v8988_v29 = vpack.c.bf16 %v17245_v10, %v17245_v10  ;;  %v15302_v10 = vld [vmem:[%s15776_s12 + $0x1b0] ss:$500 sps:$4 sm:$0xff]  }
 0x52a   : > { %11480 = vmatprep.subr.bf16.mxu1 %v15271_v61  ;;  %v17707_v35 = vld [vmem:[#allocation55_spill] sm:$0xff]  ;;  %v17709_v44 = vld [vmem:[#allocation58_spill] sm:$0xff] }
 0x52b   : > { %v8973_v47 = vpack.c.bf16 %v17707_v35, %v17707_v35  ;;  %v15286_v60 = vld [vmem:[%s15776_s12 + $0x184] ss:$500 sps:$4 sm:$0xff]   ;;  %v15289_v61 = vld [vmem:[%s15776_s12 + $0x18c] ss:$500 sps:$4 sm:$0xff]   ;;  %v8975_v58 = vpack.c.bf16 %v17709_v44, %v17709_v44  ;;  %v8994_v44 = vpack.c.bf16 %v17303_v50, %v17303_v50 }
 0x52e   : > { %11393 = vmatmul.mubr.bf16.vlgmr.msra.gmra.mrb[200].mxu0 %v8963_v40 }
 0x52f   : > { %11433 = vmatmul.mubr.bf16.vlgmr.msra.gmra.mrb[212].mxu1 %v8965_v18  ;;  %11441 = vmatpush1.bf16.xpose.msra.mxu0 %v15266_v49 }
 0x530   : > { %11472 = vmatprep.mubr.bf16.mxu0 %v8968_v54  ;;  %11481 = vmatpush1.bf16.xpose.msra.mxu1 %v15269_v59  ;;  %v17710_v59 = vld [vmem:[#allocation59_spill] sm:$0xff] }
 0x531   : > { %11512 = vmatprep.mubr.bf16.mxu1 %v8970_v37  ;;  %11520 = vmatprep.subr.bf16.mxu0 %v15274_v34  ;;  %v8977_v19 = vpack.c.bf16 %v17710_v59, %v17710_v59  ;;  %v15292_v34 = vld [vmem:[%s15776_s12 + $0x194] ss:$500 sps:$4 sm:$0xff]   ;;  %v8982_v37 = vpack.c.bf16 %v17143_v53, %v17143_v53  ;;  %v15298_v53 = vld [vmem:[%s15776_s12 + $0x1a4] ss:$500 sps:$4 sm:$0xff]   ;;  %v8991_v59 = vpack.c.bf16 %v17294_v55, %v17294_v55 }
 0x532   : > { %11560 = vmatprep.subr.bf16.mxu1 %v15277_v23  ;;  %v15295_v23 = vld [vmem:[%s15776_s12 + $0x19c] ss:$500 sps:$4 sm:$0xff]  }
 0x536   : > { %11473 = vmatmul.mubr.bf16.vlgmr.msra.gmra.mrb[204].mxu0 %v8967_v16  ;;  %v8979_v16 = vpack.c.bf16 %v17134_v42, %v17134_v42 }
 0x537   : > { %11513 = vmatmul.mubr.bf16.vlgmr.msra.gmra.mrb[216].mxu1 %v8969_v9  ;;  %11521 = vmatpush1.bf16.xpose.msra.mxu0 %v15272_v38  ;;  %v8984_v9 = vpack.c.bf16 %v17189_v2, %v17189_v2  ;;  %v8983_v2 = vpack.c.bf16 %v17182_v15, %v17182_v15 }
 0x538   : > { %11552 = vmatprep.mubr.bf16.mxu0 %v8972_v11  ;;  %11561 = vmatpush1.bf16.xpose.msra.mxu1 %v15275_v31  ;;  %v15293_v31 = vld [vmem:[%s15776_s12 + $0x198] ss:$500 sps:$4 sm:$0xff]  }
 0x539   : > { %11592 = vmatprep.mubr.bf16.mxu1 %v8974_v0  ;;  %11600 = vmatprep.subr.bf16.mxu0 %v15280_v41  ;;  %v15301_v41 = vld [vmem:[%s15776_s12 + $0x1ac] ss:$500 sps:$4 sm:$0xff]   ;;  %v15299_v0 = vld [vmem:[%s15776_s12 + $0x1a8] ss:$500 sps:$4 sm:$0xff]  }
 0x53a   : > { %11640 = vmatprep.subr.bf16.mxu1 %v15283_v4  ;;  %v15296_v4 = vld [vmem:[%s15776_s12 + $0x1a0] ss:$500 sps:$4 sm:$0xff]  }
 0x53e   : > { %11553 = vmatmul.mubr.bf16.vlgmr.msra.gmra.mrb[208].mxu0 %v8971_v1  ;;  %v15307_v1 = vld [vmem:[%s15776_s12 + $0x1bc] ss:$500 sps:$4 sm:$0xff]  }
 0x53f   : > { %11593 = vmatmul.mubr.bf16.vlgmr.msra.gmra.mrb[220].mxu1 %v8973_v47  ;;  %11601 = vmatpush1.bf16.xpose.msra.mxu0 %v15278_v24  ;;  %v15304_v24 = vld [vmem:[%s15776_s12 + $0x1b4] ss:$500 sps:$4 sm:$0xff]  }
 0x540   : > { %11632 = vmatprep.mubr.bf16.mxu0 %v8976_v21  ;;  %11641 = vmatpush1.bf16.xpose.msra.mxu1 %v15281_v13  ;;  %v8990_v13 = vpack.c.bf16 %v17247_v36, %v17247_v36  ;;  %v15305_v21 = vld [vmem:[%s15776_s12 + $0x1b8] ss:$500 sps:$4 sm:$0xff]   ;;  %v8989_v36 = vpack.c.bf16 %v17241_v3, %v17241_v3 }
 0x541   : > { %11672 = vmatprep.mubr.bf16.mxu1 %v8978_v43  ;;  %11680 = vmatprep.subr.bf16.mxu0 %v15286_v60  ;;  %v8987_v60 = vpack.c.bf16 %v17238_v45, %v17238_v45  ;;  %v8992_v43 = vpack.c.bf16 %v17301_v57, %v17301_v57  ;;  %v15308_v57 = vld [vmem:[%s15776_s12 + $0x1c0] ss:$500 sps:$4 sm:$0xff]  }
 0x542   : > { %11720 = vmatprep.subr.bf16.mxu1 %v15289_v61  ;;  %v15310_v61 = vld [vmem:[%s15776_s12 + $0x1c4] ss:$500 sps:$4 sm:$0xff]  }
 0x544   : > { %v17462_v49 = vpop.f32.mrb[120].mxu0  ;;  %v17465_v40 = vpop.f32.mrb[120].mxu1 }
 0x545   : > { %v17469_v33 = vpop.f32.mrb[121].mxu0  ;;  %v17471_v18 = vpop.f32.mrb[121].mxu1 }
 0x546   : > { %v8798_v54 = vpop.f32.mrb[122].mxu0  ;;  %11633 = vmatmul.mubr.bf16.vlgmr.msra.gmra.mrb[212].mxu0 %v8975_v58  ;;  %v8839_v48 = vpop.f32.mrb[122].mxu1 }
 0x547   : > { %11673 = vmatmul.mubr.bf16.vlgmr.msra.gmra.mrb[224].mxu1 %v8977_v19  ;;  %v8799_v38 = vpop.f32.mrb[123].mxu0  ;;  %11681 = vmatpush1.bf16.xpose.msra.mxu0 %v15284_v30  ;;  %v8840_v62 = vpop.f32.mrb[123].mxu1  ;;  %v15313_v30 = vld [vmem:[%s15776_s12 + $0x1cc] ss:$500 sps:$4 sm:$0xff]   ;;  %v8996_v48 = vpack.c.bf16 %v17357_v32, %v17357_v32 }
 0x548   : > { %11712 = vmatprep.mubr.bf16.mxu0 %v8980_v25  ;;  %11721 = vmatpush1.bf16.xpose.msra.mxu1 %v15287_v39  ;;  %v8993_v25 = vpack.c.bf16 %v17297_v26, %v17297_v26  ;;  %v15319_v38 = vld [vmem:[%s15776_s12 + $0x1dc] ss:$500 sps:$4 sm:$0xff]   ;;  %v8998_v62 = vpack.c.bf16 %v17359_v12, %v17359_v12 }
 0x549   : > { %11752 = vmatprep.mubr.bf16.mxu1 %v8982_v37  ;;  %11760 = vmatprep.subr.bf16.mxu0 %v15292_v34  ;;  %v15311_v34 = vld [vmem:[%s15776_s12 + $0x1c8] ss:$500 sps:$4 sm:$0xff]  }
 0x54a   : > { %11800 = vmatprep.subr.bf16.mxu1 %v15295_v23  ;;  %v15316_v23 = vld [vmem:[%s15776_s12 + $0x1d4] ss:$500 sps:$4 sm:$0xff]  }
 0x54e   : > { %11713 = vmatmul.mubr.bf16.vlgmr.msra.gmra.mrb[216].mxu0 %v8979_v16 }
 0x54f   : > { %11753 = vmatmul.mubr.bf16.vlgmr.msra.gmra.mrb[228].mxu1 %v8981_v52  ;;  %11761 = vmatpush1.bf16.xpose.msra.mxu0 %v15290_v5  ;;  %v8995_v52 = vpack.c.bf16 %v17350_v56, %v17350_v56 }
 0x550   : > { %11792 = vmatprep.mubr.bf16.mxu0 %v8984_v9  ;;  %11801 = vmatpush1.bf16.xpose.msra.mxu1 %v15293_v31  ;;  %v15314_v31 = vld [vmem:[%s15776_s12 + $0x1d0] ss:$500 sps:$4 sm:$0xff]   ;;  %v8997_v9 = vpack.c.bf16 %v17353_v51, %v17353_v51 }
 0x551   : > { %11832 = vmatprep.mubr.bf16.mxu1 %v8986_v8  ;;  %v9794_v42 = vpop.f32.mrb[124].mxu1  ;;  %11840 = vmatprep.subr.bf16.mxu0 %v15298_v53  ;;  %v15317_v53 = vld [vmem:[%s15776_s12 + $0x1d8] ss:$500 sps:$4 sm:$0xff]   ;;  %v9000_v8 = vpack.c.bf16 %v17413_v28, %v17413_v28 }
 0x552   : > { %v9796_v6 = vpop.f32.mrb[125].mxu1  ;;  %11880 = vmatprep.subr.bf16.mxu1 %v15301_v41  ;;  %v15322_v41 = vld [vmem:[%s15776_s12 + $0x1e4] ss:$500 sps:$4 sm:$0xff]  }
 0x553   : > { %v9797_v11 = vpop.f32.mrb[126].mxu1  ;;  %v9002_v6 = vpack.c.bf16 %v17415_v46, %v17415_v46 }
 0x554   : > { %v9798_v63 = vpop.f32.mrb[127].mxu1 }
 0x556   : > { %11793 = vmatmul.mubr.bf16.vlgmr.msra.gmra.mrb[220].mxu0 %v8983_v2 }
 0x557   : > { %11833 = vmatmul.mubr.bf16.vlgmr.msra.gmra.mrb[232].mxu1 %v8985_v14  ;;  %11841 = vmatpush1.bf16.xpose.msra.mxu0 %v15296_v4  ;;  %v8999_v14 = vpack.c.bf16 %v17406_v7, %v17406_v7 }
 0x558   : > { %11872 = vmatprep.mubr.bf16.mxu0 %v8988_v29  ;;  %11881 = vmatpush1.bf16.xpose.msra.mxu1 %v15299_v0  ;;  %v15320_v0 = vld [vmem:[%s15776_s12 + $0x1e0] ss:$500 sps:$4 sm:$0xff]  }
 0x559   : > { %11912 = vmatprep.mubr.bf16.mxu1 %v8990_v13  ;;  %v9834_v15 = vpop.f32.mrb[128].mxu1  ;;  %11920 = vmatprep.subr.bf16.mxu0 %v15304_v24  ;;  %v9001_v13 = vpack.c.bf16 %v17409_v27, %v17409_v27 }
 0x55a   : > { %v9835_v22 = vadd.f32 %v9834_v15, %v9794_v42  ;;  %v9836_v35 = vpop.f32.mrb[129].mxu1  ;;  %11960 = vmatprep.subr.bf16.mxu1 %v15307_v1  ;;  %v15325_v42 = vld [vmem:[%s15776_s12 + $0x1ec] ss:$500 sps:$4 sm:$0xff]   ;;  %v15323_v1 = vld [vmem:[%s15776_s12 + $0x1e8] ss:$500 sps:$4 sm:$0xff]   ;;  %v9004_v15 = vpack.c.bf16 %v17469_v33, %v17469_v33  ;;  %v9003_v33 = vpack.c.bf16 %v17462_v49, %v17462_v49 }
 0x55b   : > { %v9837_v47 = vpop.f32.mrb[130].mxu1 }
 0x55c   : > { %v9838_v20 = vpop.f32.mrb[131].mxu1 }
 0x55d   : > { %v15326_v20 = vld [vmem:[%s15776_s12 + $0x1f0] ss:$500 sps:$4 sm:$0xff]  }
 0x55e   : > { %11873 = vmatmul.mubr.bf16.vlgmr.msra.gmra.mrb[224].mxu0 %v8987_v60 }
 0x55f   : > { %11913 = vmatmul.mubr.bf16.vlgmr.msra.gmra.mrb[236].mxu1 %v8989_v36  ;;  %11921 = vmatpush1.bf16.xpose.msra.mxu0 %v15302_v10 }
 0x560   : > { %11952 = vmatprep.mubr.bf16.mxu0 %v8992_v43  ;;  %11961 = vmatpush1.bf16.xpose.msra.mxu1 %v15305_v21 }
 0x561   : > { %11992 = vmatprep.mubr.bf16.mxu1 %v8994_v44  ;;  %v9874_v45 = vpop.f32.mrb[132].mxu1  ;;  %12000 = vmatprep.subr.bf16.mxu0 %v15310_v61  ;;  %v9005_v61 = vpack.c.bf16 %v17465_v40, %v17465_v40 }
 0x562   : > { %v9875_v3 = vadd.f32 %v9874_v45, %v9835_v22  ;;  %v9876_v58 = vpop.f32.mrb[133].mxu1  ;;  %12040 = vmatprep.subr.bf16.mxu1 %v15313_v30  ;;  %v9006_v22 = vpack.c.bf16 %v17471_v18, %v17471_v18 }
 0x563   : > { %v9877_v39 = vpop.f32.mrb[134].mxu1 }
 0x564   : > { %v9878_v19 = vpop.f32.mrb[135].mxu1  ;;  %v17519_v50 = vpop.f32.mrb[124].mxu0 }
 0x565   : > { %v13554_v54 = vpop.f32.mrb[125].mxu0  ;;  %v9007_v49 = vpack.c.bf16 %v17519_v50, %v17519_v50 }
 0x566   : > { %11953 = vmatmul.mubr.bf16.vlgmr.msra.gmra.mrb[228].mxu0 %v8991_v59  ;;  %v8879_v37 = vpop.f32.mrb[126].mxu0 }
 0x567   : > { %11993 = vmatmul.mubr.bf16.vlgmr.msra.gmra.mrb[240].mxu1 %v8993_v25  ;;  %12001 = vmatpush1.bf16.xpose.msra.mxu0 %v15308_v57  ;;  %v13555_v55 = vpop.f32.mrb[127].mxu0 }
 0x568   : > { %12032 = vmatprep.mubr.bf16.mxu0 %v8996_v48  ;;  %12041 = vmatpush1.bf16.xpose.msra.mxu1 %v15311_v34 }
 0x569   : > { %12072 = vmatprep.mubr.bf16.mxu1 %v8998_v62  ;;  %v9914_v26 = vpop.f32.mrb[136].mxu1  ;;  %12080 = vmatprep.subr.bf16.mxu0 %v15316_v23 }
 0x56a   : > { %v9915_v5 = vadd.f32 %v9914_v26, %v9875_v3  ;;  %v9916_v32 = vpop.f32.mrb[137].mxu1  ;;  %12120 = vmatprep.subr.bf16.mxu1 %v15319_v38 }
 0x56b   : > { %v9917_v16 = vpop.f32.mrb[138].mxu1 }
 0x56c   : > { %v9918_v12 = vpop.f32.mrb[139].mxu1 }
 0x56e   : > { %12033 = vmatmul.mubr.bf16.vlgmr.msra.gmra.mrb[232].mxu0 %v8995_v52 }
 0x56f   : > { %12073 = vmatmul.mubr.bf16.vlgmr.msra.gmra.mrb[244].mxu1 %v8997_v9  ;;  %12081 = vmatpush1.bf16.xpose.msra.mxu0 %v15314_v31 }
 0x570   : > { %12112 = vmatprep.mubr.bf16.mxu0 %v9000_v8  ;;  %12121 = vmatpush1.bf16.xpose.msra.mxu1 %v15317_v53 }
 0x571   : > { %12152 = vmatprep.mubr.bf16.mxu1 %v9002_v6  ;;  %v9954_v56 = vpop.f32.mrb[128].mxu0  ;;  %v9994_v11 = vpop.f32.mrb[140].mxu1  ;;  %12160 = vmatprep.subr.bf16.mxu0 %v15322_v41 }
 0x572   : > { %v9955_v51 = vadd.f32 %v9954_v56, %v9915_v5  ;;  %v9956_v4 = vpop.f32.mrb[129].mxu0  ;;  %v9996_v2 = vpop.f32.mrb[141].mxu1  ;;  %12200 = vmatprep.subr.bf16.mxu1 %v15325_v42 }
 0x573   : > { %v9957_v28 = vpop.f32.mrb[130].mxu0  ;;  %v9997_v63 = vpop.f32.mrb[142].mxu1 }
 0x574   : > { %v9995_v46 = vadd.f32 %v9994_v11, %v9955_v51  ;;  %v9958_v24 = vpop.f32.mrb[131].mxu0  ;;  %v9998_v29 = vpop.f32.mrb[143].mxu1 }
 0x576   : > { %12113 = vmatmul.mubr.bf16.vlgmr.msra.gmra.mrb[236].mxu0 %v8999_v14 }
 0x577   : > { %12153 = vmatmul.mubr.bf16.vlgmr.msra.gmra.mrb[248].mxu1 %v9001_v13  ;;  %12161 = vmatpush1.bf16.xpose.msra.mxu0 %v15320_v0 }
 0x578   : > { %12192 = vmatprep.mubr.bf16.mxu0 %v9004_v15  ;;  %12201 = vmatpush1.bf16.xpose.msra.mxu1 %v15323_v1 }
 0x579   : > { %12232 = vmatprep.mubr.bf16.mxu1 %v9006_v22  ;;  %v10034_v7 = vpop.f32.mrb[132].mxu0  ;;  %13556 = vmatprep.subr.bf16.mxu0 %v15531_v17 }
 0x57a   : > { %v10035_v35 = vadd.f32 %v10034_v7, %v9995_v46  ;;  %v10074_v47 = vpop.f32.mrb[144].mxu1  ;;  %v10036_v10 = vpop.f32.mrb[133].mxu0 }
 0x57b   : > { %v10076_v27 = vpop.f32.mrb[145].mxu1  ;;  %v10037_v60 = vpop.f32.mrb[134].mxu0 }
 0x57c   : > { %v10075_v21 = vadd.f32 %v10074_v47, %v10035_v35  ;;  %v10077_v36 = vpop.f32.mrb[146].mxu1  ;;  %v10038_v18 = vpop.f32.mrb[135].mxu0 }
 0x57d   : > { %v10078_v43 = vpop.f32.mrb[147].mxu1 }
 0x57e   : > { %12193 = vmatmul.mubr.bf16.vlgmr.msra.gmra.mrb[240].mxu0 %v9003_v33 }
 0x57f   : > { %12233 = vmatmul.mubr.bf16.vlgmr.msra.gmra.mrb[252].mxu1 %v9005_v61  ;;  %13557 = vmatpush3.bf16.xpose.msra.mxu0 %v15326_v20 }
 0x580   : > { %13558 = vmatprep.mubr.msk.bf16.mxu0 %vm15532_vm1, %v15531_v17 }
 0x581   : > { %v10114_v30 = vpop.f32.mrb[136].mxu0 }
 0x582   : > { %v10115_v44 = vadd.f32 %v10114_v30, %v10075_v21  ;;  %v10154_v45 = vpop.f32.mrb[148].mxu1  ;;  %v10116_v3 = vpop.f32.mrb[137].mxu0 }
 0x583   : > { %v10156_v58 = vpop.f32.mrb[149].mxu1  ;;  %v10117_v39 = vpop.f32.mrb[138].mxu0 }
 0x584   : > { %v10155_v57 = vadd.f32 %v10154_v45, %v10115_v44  ;;  %v10157_v59 = vpop.f32.mrb[150].mxu1  ;;  %v10118_v19 = vpop.f32.mrb[139].mxu0 }
 0x585   : > { %v10158_v40 = vpop.f32.mrb[151].mxu1 }
 0x586   : > { %13559 = vmatmul.mubr.bf16.vlgmr.msra.gmra.mrb[244].mxu0 %v9007_v49 }
 0x589   : > { %v10194_v34 = vpop.f32.mrb[140].mxu0 }
 0x58a   : > { %v10195_v25 = vadd.f32 %v10194_v34, %v10155_v57  ;;  %v10234_v54 = vpop.f32.mrb[152].mxu1  ;;  %v10196_v23 = vpop.f32.mrb[141].mxu0 }
 0x58b   : > { %v10236_v48 = vpop.f32.mrb[153].mxu1  ;;  %v10197_v17 = vpop.f32.mrb[142].mxu0 }
 0x58c   : > { %v10235_v37 = vadd.f32 %v10234_v54, %v10195_v25  ;;  %v10237_v38 = vpop.f32.mrb[154].mxu1  ;;  %v10198_v62 = vpop.f32.mrb[143].mxu0 }
 0x58d   : > { %v10238_v55 = vpop.f32.mrb[155].mxu1 }
 0x591   : > { %v10274_v26 = vpop.f32.mrb[144].mxu0 }
 0x592   : > { %v10275_v5 = vadd.f32 %v10274_v26, %v10235_v37  ;;  %v10314_v32 = vpop.f32.mrb[156].mxu1  ;;  %v10276_v16 = vpop.f32.mrb[145].mxu0 }
 0x593   : > { %v10316_v50 = vpop.f32.mrb[157].mxu1  ;;  %v10277_v31 = vpop.f32.mrb[146].mxu0 }
 0x594   : > { %v10315_v52 = vadd.f32 %v10314_v32, %v10275_v5  ;;  %v10317_v12 = vpop.f32.mrb[158].mxu1  ;;  %v10278_v53 = vpop.f32.mrb[147].mxu0 }
 0x595   : > { %v10318_v9 = vpop.f32.mrb[159].mxu1 }
 0x599   : > { %v10354_v41 = vpop.f32.mrb[148].mxu0 }
 0x59a   : > { %v10355_v8 = vadd.f32 %v10354_v41, %v10315_v52  ;;  %v10394_v42 = vpop.f32.mrb[160].mxu1  ;;  %v10356_v6 = vpop.f32.mrb[149].mxu0 }
 0x59b   : > { %v10396_v56 = vpop.f32.mrb[161].mxu1  ;;  %v10357_v11 = vpop.f32.mrb[150].mxu0 }
 0x59c   : > { %v10395_v51 = vadd.f32 %v10394_v42, %v10355_v8  ;;  %v10397_v4 = vpop.f32.mrb[162].mxu1  ;;  %v10358_v2 = vpop.f32.mrb[151].mxu0 }
 0x59d   : > { %v10398_v28 = vpop.f32.mrb[163].mxu1 }
 0x5a1   : > { %v10434_v63 = vpop.f32.mrb[152].mxu0 }
 0x5a2   : > { %v10435_v0 = vadd.f32 %v10434_v63, %v10395_v51  ;;  %v10474_v14 = vpop.f32.mrb[164].mxu1  ;;  %v10436_v46 = vpop.f32.mrb[153].mxu0 }
 0x5a3   : > { %v10476_v24 = vpop.f32.mrb[165].mxu1  ;;  %v10437_v29 = vpop.f32.mrb[154].mxu0 }
 0x5a4   : > { %v10475_v1 = vadd.f32 %v10474_v14, %v10435_v0  ;;  %v10477_v13 = vpop.f32.mrb[166].mxu1  ;;  %v10438_v15 = vpop.f32.mrb[155].mxu0 }
 0x5a5   : > { %v10478_v22 = vpop.f32.mrb[167].mxu1 }
 0x5a9   : > { %v10514_v7 = vpop.f32.mrb[156].mxu0 }
 0x5aa   : > { %v10515_v35 = vadd.f32 %v10514_v7, %v10475_v1  ;;  %v10554_v47 = vpop.f32.mrb[168].mxu1  ;;  %v10516_v10 = vpop.f32.mrb[157].mxu0 }
 0x5ab   : > { %v10556_v27 = vpop.f32.mrb[169].mxu1  ;;  %v10517_v60 = vpop.f32.mrb[158].mxu0 }
 0x5ac   : > { %v10555_v20 = vadd.f32 %v10554_v47, %v10515_v35  ;;  %v10557_v33 = vpop.f32.mrb[170].mxu1  ;;  %v10518_v21 = vpop.f32.mrb[159].mxu0 }
 0x5ad   : > { %v10558_v36 = vpop.f32.mrb[171].mxu1 }
 0x5b1   : > { %v10594_v18 = vpop.f32.mrb[160].mxu0 }
 0x5b2   : > { %v10595_v61 = vadd.f32 %v10594_v18, %v10555_v20  ;;  %v10634_v43 = vpop.f32.mrb[172].mxu1  ;;  %v10596_v30 = vpop.f32.mrb[161].mxu0 }
 0x5b3   : > { %v10636_v44 = vpop.f32.mrb[173].mxu1  ;;  %v10597_v45 = vpop.f32.mrb[162].mxu0 }
 0x5b4   : > { %v10635_v3 = vadd.f32 %v10634_v43, %v10595_v61  ;;  %v10637_v58 = vpop.f32.mrb[174].mxu1  ;;  %v10598_v39 = vpop.f32.mrb[163].mxu0 }
 0x5b5   : > { %v10638_v49 = vpop.f32.mrb[175].mxu1 }
 0x5b9   : > { %v10674_v57 = vpop.f32.mrb[164].mxu0 }
 0x5ba   : > { %v10675_v59 = vadd.f32 %v10674_v57, %v10635_v3  ;;  %v10714_v19 = vpop.f32.mrb[176].mxu1  ;;  %v10676_v40 = vpop.f32.mrb[165].mxu0 }
 0x5bb   : > { %v10716_v34 = vpop.f32.mrb[177].mxu1  ;;  %v10677_v25 = vpop.f32.mrb[166].mxu0 }
 0x5bc   : > { %v10715_v54 = vadd.f32 %v10714_v19, %v10675_v59  ;;  %v10717_v23 = vpop.f32.mrb[178].mxu1  ;;  %v10678_v48 = vpop.f32.mrb[167].mxu0 }
 0x5bd   : > { %v10718_v17 = vpop.f32.mrb[179].mxu1 }
 0x5c1   : > { %v10754_v37 = vpop.f32.mrb[168].mxu0 }
 0x5c2   : > { %v10755_v38 = vadd.f32 %v10754_v37, %v10715_v54  ;;  %v10794_v62 = vpop.f32.mrb[180].mxu1  ;;  %v10756_v55 = vpop.f32.mrb[169].mxu0 }
 0x5c3   : > { %v10796_v26 = vpop.f32.mrb[181].mxu1  ;;  %v10757_v5 = vpop.f32.mrb[170].mxu0 }
 0x5c4   : > { %v10795_v32 = vadd.f32 %v10794_v62, %v10755_v38  ;;  %v10797_v16 = vpop.f32.mrb[182].mxu1  ;;  %v10758_v50 = vpop.f32.mrb[171].mxu0 }
 0x5c5   : > { %v10798_v31 = vpop.f32.mrb[183].mxu1 }
 0x5c9   : > { %v10834_v52 = vpop.f32.mrb[172].mxu0 }
 0x5ca   : > { %v10835_v12 = vadd.f32 %v10834_v52, %v10795_v32  ;;  %v10874_v53 = vpop.f32.mrb[184].mxu1  ;;  %v10836_v9 = vpop.f32.mrb[173].mxu0 }
 0x5cb   : > { %v10876_v41 = vpop.f32.mrb[185].mxu1  ;;  %v10837_v8 = vpop.f32.mrb[174].mxu0 }
 0x5cc   : > { %v10875_v42 = vadd.f32 %v10874_v53, %v10835_v12  ;;  %v10877_v6 = vpop.f32.mrb[186].mxu1  ;;  %v10838_v56 = vpop.f32.mrb[175].mxu0 }
 0x5cd   : > { %v10878_v11 = vpop.f32.mrb[187].mxu1 }
 0x5d1   : > { %v10914_v51 = vpop.f32.mrb[176].mxu0 }
 0x5d2   : > { %v10915_v4 = vadd.f32 %v10914_v51, %v10875_v42  ;;  %v10954_v2 = vpop.f32.mrb[188].mxu1  ;;  %v10916_v28 = vpop.f32.mrb[177].mxu0 }
 0x5d3   : > { %v10956_v63 = vpop.f32.mrb[189].mxu1  ;;  %v10917_v0 = vpop.f32.mrb[178].mxu0 }
 0x5d4   : > { %v10955_v14 = vadd.f32 %v10954_v2, %v10915_v4  ;;  %v10957_v46 = vpop.f32.mrb[190].mxu1  ;;  %v10918_v24 = vpop.f32.mrb[179].mxu0 }
 0x5d5   : > { %v10958_v29 = vpop.f32.mrb[191].mxu1 }
 0x5d9   : > { %v10994_v1 = vpop.f32.mrb[180].mxu0 }
 0x5da   : > { %v10995_v13 = vadd.f32 %v10994_v1, %v10955_v14  ;;  %v11034_v15 = vpop.f32.mrb[192].mxu1  ;;  %v10996_v22 = vpop.f32.mrb[181].mxu0 }
 0x5db   : > { %v11036_v7 = vpop.f32.mrb[193].mxu1  ;;  %v10997_v35 = vpop.f32.mrb[182].mxu0 }
 0x5dc   : > { %v11035_v47 = vadd.f32 %v11034_v15, %v10995_v13  ;;  %v11037_v10 = vpop.f32.mrb[194].mxu1  ;;  %v10998_v27 = vpop.f32.mrb[183].mxu0 }
 0x5dd   : > { %v11038_v60 = vpop.f32.mrb[195].mxu1 }
 0x5e1   : > { %v11074_v20 = vpop.f32.mrb[184].mxu0 }
 0x5e2   : > { %v11075_v33 = vadd.f32 %v11074_v20, %v11035_v47  ;;  %v11114_v21 = vpop.f32.mrb[196].mxu1  ;;  %v11076_v36 = vpop.f32.mrb[185].mxu0 }
 0x5e3   : > { %v11116_v18 = vpop.f32.mrb[197].mxu1  ;;  %v11077_v61 = vpop.f32.mrb[186].mxu0 }
 0x5e4   : > { %v11115_v43 = vadd.f32 %v11114_v21, %v11075_v33  ;;  %v11117_v30 = vpop.f32.mrb[198].mxu1  ;;  %v11078_v44 = vpop.f32.mrb[187].mxu0 }
 0x5e5   : > { %v11118_v45 = vpop.f32.mrb[199].mxu1 }
 0x5e9   : > { %v11154_v3 = vpop.f32.mrb[188].mxu0 }
 0x5ea   : > { %v11155_v58 = vadd.f32 %v11154_v3, %v11115_v43  ;;  %v11194_v39 = vpop.f32.mrb[200].mxu1  ;;  %v11156_v49 = vpop.f32.mrb[189].mxu0 }
 0x5eb   : > { %v11196_v57 = vpop.f32.mrb[201].mxu1  ;;  %v11157_v59 = vpop.f32.mrb[190].mxu0 }
 0x5ec   : > { %v11195_v19 = vadd.f32 %v11194_v39, %v11155_v58  ;;  %v11197_v40 = vpop.f32.mrb[202].mxu1  ;;  %v11158_v34 = vpop.f32.mrb[191].mxu0 }
 0x5ed   : > { %v11198_v25 = vpop.f32.mrb[203].mxu1 }
 0x5f1   : > { %v11234_v54 = vpop.f32.mrb[192].mxu0 }
 0x5f2   : > { %v11235_v23 = vadd.f32 %v11234_v54, %v11195_v19  ;;  %v11274_v48 = vpop.f32.mrb[204].mxu1  ;;  %v11236_v17 = vpop.f32.mrb[193].mxu0 }
 0x5f3   : > { %v11276_v37 = vpop.f32.mrb[205].mxu1  ;;  %v11237_v38 = vpop.f32.mrb[194].mxu0 }
 0x5f4   : > { %v11275_v62 = vadd.f32 %v11274_v48, %v11235_v23  ;;  %v11277_v55 = vpop.f32.mrb[206].mxu1  ;;  %v11238_v26 = vpop.f32.mrb[195].mxu0 }
 0x5f5   : > { %v11278_v5 = vpop.f32.mrb[207].mxu1 }
 0x5f9   : > { %v11314_v32 = vpop.f32.mrb[196].mxu0 }
 0x5fa   : > { %v11315_v16 = vadd.f32 %v11314_v32, %v11275_v62  ;;  %v11354_v50 = vpop.f32.mrb[208].mxu1  ;;  %v11316_v31 = vpop.f32.mrb[197].mxu0 }
 0x5fb   : > { %v11356_v52 = vpop.f32.mrb[209].mxu1  ;;  %v11317_v12 = vpop.f32.mrb[198].mxu0 }
 0x5fc   : > { %v11355_v53 = vadd.f32 %v11354_v50, %v11315_v16  ;;  %v11357_v9 = vpop.f32.mrb[210].mxu1  ;;  %v11318_v41 = vpop.f32.mrb[199].mxu0 }
 0x5fd   : > { %v11358_v8 = vpop.f32.mrb[211].mxu1 }
 0x601   : > { %v11394_v42 = vpop.f32.mrb[200].mxu0 }
 0x602   : > { %v11395_v6 = vadd.f32 %v11394_v42, %v11355_v53  ;;  %v11434_v56 = vpop.f32.mrb[212].mxu1  ;;  %v11396_v11 = vpop.f32.mrb[201].mxu0 }
 0x603   : > { %v11436_v51 = vpop.f32.mrb[213].mxu1  ;;  %v11397_v4 = vpop.f32.mrb[202].mxu0 }
 0x604   : > { %v11435_v2 = vadd.f32 %v11434_v56, %v11395_v6  ;;  %v11437_v28 = vpop.f32.mrb[214].mxu1  ;;  %v11398_v63 = vpop.f32.mrb[203].mxu0 }
 0x605   : > { %v11438_v0 = vpop.f32.mrb[215].mxu1 }
 0x609   : > { %v11474_v14 = vpop.f32.mrb[204].mxu0 }
 0x60a   : > { %v11475_v46 = vadd.f32 %v11474_v14, %v11435_v2  ;;  %v11514_v24 = vpop.f32.mrb[216].mxu1  ;;  %v11476_v29 = vpop.f32.mrb[205].mxu0 }
 0x60b   : > { %v11516_v1 = vpop.f32.mrb[217].mxu1  ;;  %v11477_v13 = vpop.f32.mrb[206].mxu0 }
 0x60c   : > { %v11515_v15 = vadd.f32 %v11514_v24, %v11475_v46  ;;  %v11517_v22 = vpop.f32.mrb[218].mxu1  ;;  %v11478_v7 = vpop.f32.mrb[207].mxu0 }
 0x60d   : > { %v11518_v35 = vpop.f32.mrb[219].mxu1 }
 0x611   : > { %v11554_v47 = vpop.f32.mrb[208].mxu0 }
 0x612   : > { %v11555_v10 = vadd.f32 %v11554_v47, %v11515_v15  ;;  %v11594_v27 = vpop.f32.mrb[220].mxu1  ;;  %v11556_v60 = vpop.f32.mrb[209].mxu0 }
 0x613   : > { %v11596_v20 = vpop.f32.mrb[221].mxu1  ;;  %v11557_v33 = vpop.f32.mrb[210].mxu0 }
 0x614   : > { %v11595_v21 = vadd.f32 %v11594_v27, %v11555_v10  ;;  %v11597_v36 = vpop.f32.mrb[222].mxu1  ;;  %v11558_v18 = vpop.f32.mrb[211].mxu0 }
 0x615   : > { %v11598_v61 = vpop.f32.mrb[223].mxu1 }
 0x619   : > { %v11634_v43 = vpop.f32.mrb[212].mxu0 }
 0x61a   : > { %v11635_v30 = vadd.f32 %v11634_v43, %v11595_v21  ;;  %v11674_v44 = vpop.f32.mrb[224].mxu1  ;;  %v11636_v45 = vpop.f32.mrb[213].mxu0 }
 0x61b   : > { %v11676_v3 = vpop.f32.mrb[225].mxu1  ;;  %v11637_v58 = vpop.f32.mrb[214].mxu0 }
 0x61c   : > { %v11675_v39 = vadd.f32 %v11674_v44, %v11635_v30  ;;  %v11677_v49 = vpop.f32.mrb[226].mxu1  ;;  %v11638_v57 = vpop.f32.mrb[215].mxu0 }
 0x61d   : > { %v11678_v59 = vpop.f32.mrb[227].mxu1 }
 0x621   : > { %v11714_v19 = vpop.f32.mrb[216].mxu0 }
 0x622   : > { %v11715_v40 = vadd.f32 %v11714_v19, %v11675_v39  ;;  %v11754_v34 = vpop.f32.mrb[228].mxu1  ;;  %v11716_v25 = vpop.f32.mrb[217].mxu0 }
 0x623   : > { %v11756_v54 = vpop.f32.mrb[229].mxu1  ;;  %v11717_v23 = vpop.f32.mrb[218].mxu0 }
 0x624   : > { %v11755_v48 = vadd.f32 %v11754_v34, %v11715_v40  ;;  %v11757_v17 = vpop.f32.mrb[230].mxu1  ;;  %v11718_v37 = vpop.f32.mrb[219].mxu0 }
 0x625   : > { %v11758_v38 = vpop.f32.mrb[231].mxu1 }
 0x629   : > { %v11794_v62 = vpop.f32.mrb[220].mxu0 }
 0x62a   : > { %v11795_v55 = vadd.f32 %v11794_v62, %v11755_v48  ;;  %v11834_v26 = vpop.f32.mrb[232].mxu1  ;;  %v11796_v5 = vpop.f32.mrb[221].mxu0  ;;  %v8882_v48 = vld [vmem:[#allocation10] sm:$0xff] }
 0x62b   : > { %v11836_v32 = vpop.f32.mrb[233].mxu1  ;;  %v11797_v16 = vpop.f32.mrb[222].mxu0 }
 0x62c   : > { %v11835_v50 = vadd.f32 %v11834_v26, %v11795_v55  ;;  %v11837_v31 = vpop.f32.mrb[234].mxu1  ;;  %v11798_v52 = vpop.f32.mrb[223].mxu0 }
 0x62d   : > { %v11838_v12 = vpop.f32.mrb[235].mxu1 }
 0x631   : > { %v11874_v53 = vpop.f32.mrb[224].mxu0 }
 0x632   : > { %v11875_v9 = vadd.f32 %v11874_v53, %v11835_v50  ;;  %v11914_v41 = vpop.f32.mrb[236].mxu1  ;;  %v11876_v8 = vpop.f32.mrb[225].mxu0 }
 0x633   : > { %v11916_v42 = vpop.f32.mrb[237].mxu1  ;;  %v11877_v6 = vpop.f32.mrb[226].mxu0 }
 0x634   : > { %v11915_v56 = vadd.f32 %v11914_v41, %v11875_v9  ;;  %v11917_v11 = vpop.f32.mrb[238].mxu1  ;;  %v11878_v51 = vpop.f32.mrb[227].mxu0 }
 0x635   : > { %v11918_v4 = vpop.f32.mrb[239].mxu1 }
 0x639   : > { %v11954_v2 = vpop.f32.mrb[228].mxu0 }
 0x63a   : > { %v11955_v28 = vadd.f32 %v11954_v2, %v11915_v56  ;;  %v11994_v63 = vpop.f32.mrb[240].mxu1  ;;  %v11956_v0 = vpop.f32.mrb[229].mxu0 }
 0x63b   : > { %v11996_v14 = vpop.f32.mrb[241].mxu1  ;;  %v11957_v46 = vpop.f32.mrb[230].mxu0 }
 0x63c   : > { %v11995_v24 = vadd.f32 %v11994_v63, %v11955_v28  ;;  %v11997_v29 = vpop.f32.mrb[242].mxu1  ;;  %v11958_v1 = vpop.f32.mrb[231].mxu0 }
 0x63d   : > { %v11998_v13 = vpop.f32.mrb[243].mxu1 }
 0x641   : > { %v12034_v15 = vpop.f32.mrb[232].mxu0 }
 0x642   : > { %v12035_v22 = vadd.f32 %v12034_v15, %v11995_v24  ;;  %v12074_v7 = vpop.f32.mrb[244].mxu1  ;;  %v12036_v35 = vpop.f32.mrb[233].mxu0 }
 0x643   : > { %v12076_v47 = vpop.f32.mrb[245].mxu1  ;;  %v12037_v10 = vpop.f32.mrb[234].mxu0 }
 0x644   : > { %v12075_v27 = vadd.f32 %v12074_v7, %v12035_v22  ;;  %v12077_v60 = vpop.f32.mrb[246].mxu1  ;;  %v12038_v20 = vpop.f32.mrb[235].mxu0 }
 0x645   : > { %v12078_v33 = vpop.f32.mrb[247].mxu1 }
 0x649   : > { %v12114_v21 = vpop.f32.mrb[236].mxu0 }
 0x64a   : > { %v12115_v36 = vadd.f32 %v12114_v21, %v12075_v27  ;;  %v12154_v18 = vpop.f32.mrb[248].mxu1  ;;  %v12116_v61 = vpop.f32.mrb[237].mxu0 }
 0x64b   : > { %v12156_v43 = vpop.f32.mrb[249].mxu1  ;;  %v12117_v30 = vpop.f32.mrb[238].mxu0 }
 0x64c   : > { %v12155_v44 = vadd.f32 %v12154_v18, %v12115_v36  ;;  %v12157_v45 = vpop.f32.mrb[250].mxu1  ;;  %v12118_v3 = vpop.f32.mrb[239].mxu0 }
 0x64d   : > { %v12158_v58 = vpop.f32.mrb[251].mxu1 }
 0x651   : > { %v12194_v39 = vpop.f32.mrb[240].mxu0 }
 0x652   : > { %v12195_v49 = vadd.f32 %v12194_v39, %v12155_v44  ;;  %v12234_v57 = vpop.f32.mrb[252].mxu1  ;;  %v12196_v59 = vpop.f32.mrb[241].mxu0 }
 0x653   : > { %v12236_v19 = vpop.f32.mrb[253].mxu1  ;;  %v12197_v40 = vpop.f32.mrb[242].mxu0 }
 0x654   : > { %v12235_v34 = vadd.f32 %v12234_v57, %v12195_v49  ;;  %v12237_v25 = vpop.f32.mrb[254].mxu1  ;;  %v12198_v54 = vpop.f32.mrb[243].mxu0 }
 0x655   : > { %v12238_v23 = vpop.f32.mrb[255].mxu1 }
 0x659   : > { %v12274_v17 = vpop.f32.mrb[244].mxu0 }
 0x65a   : > { %v12275_v37 = vadd.f32 %v12274_v17, %v12235_v34  ;;  %v13560_v38 = vpop.f32.mrb[245].mxu0 }
 0x65b   : > { %v12277_v62 = vpop.f32.mrb[246].mxu0 }
 0x65c   : > { %v12280_v55 = vadd.f32 %v12275_v37, %v8882_v48  ;;  %v13561_v26 = vpop.f32.mrb[247].mxu0 }
 0x65e   : > { %12282 = vst.msk [vmem:[#allocation10] sm:$0xff] %vm12281_vm2, %v12280_v55 }
 0x65f   : > { %15462 = shalt.err (!%p15459_p7)
}
 0x660   : > { %s15463_s20 = scalar_lea.hbm %s17601_s4, 128 }
 0x661   : > { %p15464_p12 = scmp.ne.s32.totalorder %s17601_s4, %s15463_s20  ;;  %p15469_p6 = scmp.lt.u32.totalorder %s15463_s20, %s17601_s4 }
 0x663   : > { %p15465_p1 = pnand %p15464_p12, %p13601_p5 }
 0x665   : > { %p15466_p2 = pneg %p15465_p1 }
 0x667   : > { %p15471_p3 = pnand %p15469_p6, %p15466_p2 }
 0x669   : > { %15474 = shalt.err (!%p15471_p3)
}
 0x66a   : > { %13579 = dma.vmem_to_hbm [thread:$0]  (%p13601_p5), %s12291_s25, 128, %s17601_s4, [#allocation4]  }
 0x66b   : > { %15504 = dma.done.wait (%p13601_p5), [#allocation4], 128  }
 0x66c   : > { %15506 = vsyncadd (%p13601_p5), [#allocation4], 4294967168 }
 0x66d PF: > { %p17_p11 = scmp.ge.s32.totalorder %s15580_s19, 4   ;;  %s17711_s15 = smov %s15513_s16 }
 0x66e   : > { %s17712_s16 = smov %s15517_s17  ;;  %s17713_s17 = smov %s15590_s22 }
 0x66f   : > { %s17714_s18 = smov %s15580_s19  ;;  %19 = sbr.rel (!%p17_p11) target bundleno = 6 (0x6), region = 97 }
 0x676   :  { %12303 = vsyncpa [#allocation3], 1 }
 0x677   :  { %12305 = vsyncpa [#allocation3 + $0x1], 1 }
 0x678   :  { %12306 = vsyncpa [#allocation6], 1 }
 0x679   :  { %12308 = vsyncpa [#allocation6 + $0x1], 1 }
 0x67a   :  { %12309 = vsyncpa [#allocation9], 1 }
 0x67b   :  { %12310 = vsyncpa [#allocation4], 1 }
 0x67c   :  { %12312 = vsyncpa [#allocation4 + $0x1], 1 }

</bundles_post_ra>
